<compile_context>
chip_gen: v5e
topology: v5e:2x2
jax: 0.10.0
libtpu: 0.0.40
codegen_flags: <defaults>
</compile_context>

<pallas_src>
import functools

import jax
import jax.numpy as jnp
from jax.experimental import pallas as pl
from jax.experimental.pallas import tpu as pltpu


# ---------------------------------------------------------------------------
# In-kernel helper: 3x3 conv (im2col matmul on the MXU) + folded-BN bias + act
# ---------------------------------------------------------------------------
def _conv3x3_bias_act(inp, w_flat, bias, act, slope):
    """inp: (R+2, W+2, cin) bf16 value, zero-padded by 1 column on each side.
    w_flat: (9*cin, cout) bf16 value with the BN scale pre-folded in.
    bias: (1, cout) f32 folded BN bias.
    Returns (R, W, cout) f32 after bias + activation."""
    Rp, Wp, cin = inp.shape
    R, W = Rp - 2, Wp - 2
    cout = w_flat.shape[-1]

    if 9 * cin <= 256:
        # Single MXU matmul: M = R*W, K = 9*cin.
        taps = [inp[dy:dy + R, dx:dx + W, :] for dy in range(3) for dx in range(3)]
        patch = jnp.concatenate(taps, axis=-1).reshape(R * W, 9 * cin)   # bf16
        acc = jnp.dot(patch, w_flat, preferred_element_type=jnp.float32)
    else:
        # K per tap is already large; keep 9 dense 2-D matmuls.
        acc = jnp.zeros((R * W, cout), jnp.float32)
        t = 0
        for dy in range(3):
            for dx in range(3):
                tap = inp[dy:dy + R, dx:dx + W, :].reshape(R * W, cin)
                acc = acc + jnp.dot(tap, w_flat[t * cin:(t + 1) * cin, :],
                                    preferred_element_type=jnp.float32)
                t += 1

    y = acc.reshape(R, W, cout) + bias                          # folded BN bias (f32, VPU)
    if act == "relu":
        y = jnp.maximum(y, 0.0)
    elif act == "leaky":
        y = jnp.where(y >= 0.0, y, slope * y)
    return y


def _mask_rows(y, start_img_row, H):
    """Zero out rows of y (R, W, C) whose image-row index falls outside [0, H)."""
    R = y.shape[0]
    rows = start_img_row + jax.lax.broadcasted_iota(jnp.int32, (R, 1, 1), 0)
    valid = (rows >= 0) & (rows < H)
    return jnp.where(valid, y, 0.0)


# ---------------------------------------------------------------------------
# Fused SSH kernel: one TH-row output slab of one batch element per grid step
# ---------------------------------------------------------------------------
def _ssh_fused_kernel(x_ref, w3_ref, b3_ref, w51_ref, b51_ref, w52_ref, b52_ref,
                      w72_ref, b72_ref, w73_ref, b73_ref, o_ref, pad5_ref, pad7_ref,
                      *, H, W, TH, leaky):
    # x_ref : (1, H+6, W+2, cin) f32 — whole padded image of this batch element (3-row /
    #         1-col zero borders); DMA'd once per n (block index constant over the h axis).
    # o_ref : (1, TH, W, c2+2*c4) f32 output slab (channel-concatenated branches).
    r0 = pl.multiple_of(pl.program_id(1) * TH, TH)      # first output row of this slab

    # Input window with a 3-row halo on each side (padded coords == image rows r0-3 .. r0+TH+2),
    # cast to bf16 once and shared by conv3x3 and conv5x5_1.
    xt = x_ref[0, pl.ds(r0, TH + 6), :, :].astype(jnp.bfloat16)          # (TH+6, W+2, cin)

    # ---- shared trunk: conv5x5_1 (leaky) on TH+4 halo rows ----------------------------------
    y51 = _conv3x3_bias_act(xt, w51_ref[...], b51_ref[...], "leaky", leaky)   # (TH+4, W, c4)
    y51 = _mask_rows(y51, r0 - 2, H)                    # emulate SAME zero-pad at image borders
    pad5_ref[...] = jnp.zeros(pad5_ref.shape, pad5_ref.dtype)
    pad5_ref[:, 1:W + 1, :] = y51                       # 1-col zero borders live in scratch
    p5 = pad5_ref[...].astype(jnp.bfloat16)             # cast once, consumed by two convs

    # ---- conv7x7_2 (leaky) on TH+2 halo rows ------------------------------------------------
    y72 = _conv3x3_bias_act(p5, w72_ref[...], b72_ref[...], "leaky", leaky)
    y72 = _mask_rows(y72, r0 - 1, H)                    # (TH+2, W, c4)
    pad7_ref[...] = jnp.zeros(pad7_ref.shape, pad7_ref.dtype)
    pad7_ref[:, 1:W + 1, :] = y72
    p7 = pad7_ref[...].astype(jnp.bfloat16)

    # ---- branch-terminal convs; F.relu(concat) fused as per-branch relu ---------------------
    y3 = _conv3x3_bias_act(xt[2:TH + 4], w3_ref[...], b3_ref[...], "relu", leaky)  # (TH,W,c2)
    y5 = _conv3x3_bias_act(p5[1:TH + 3], w52_ref[...], b52_ref[...], "relu", leaky)
    y7 = _conv3x3_bias_act(p7, w73_ref[...], b73_ref[...], "relu", leaky)

    # Single lane-dense store of all output channels.
    o_ref[0] = jnp.concatenate([y3, y5, y7], axis=-1).astype(o_ref.dtype)


# ---------------------------------------------------------------------------
# Deterministic parameter construction (conv weight + folded BN, eval mode)
# ---------------------------------------------------------------------------
def _make_layer_params(key, cin, cout, eps=1e-5):
    kw, kg, kb, km, kv = jax.random.split(key, 5)
    w = jax.random.normal(kw, (3, 3, cin, cout), jnp.float32) * 0.1
    gamma = jax.random.uniform(kg, (cout,), jnp.float32, 0.5, 1.5)
    beta = jax.random.normal(kb, (cout,), jnp.float32) * 0.1
    mean = jax.random.normal(km, (cout,), jnp.float32) * 0.1
    var = jax.random.uniform(kv, (cout,), jnp.float32, 0.5, 1.5)
    scale = gamma / jnp.sqrt(var + eps)
    bias = beta - mean * scale
    return {"w": w, "scale": scale, "bias": bias}


def make_ssh_params(key, in_channel, out_channel):
    assert out_channel % 4 == 0
    keys = jax.random.split(key, 5)
    return {
        "conv3x3":   _make_layer_params(keys[0], in_channel, out_channel // 2),
        "conv5x5_1": _make_layer_params(keys[1], in_channel, out_channel // 4),
        "conv5x5_2": _make_layer_params(keys[2], out_channel // 4, out_channel // 4),
        "conv7x7_2": _make_layer_params(keys[3], out_channel // 4, out_channel // 4),
        "conv7x7_3": _make_layer_params(keys[4], out_channel // 4, out_channel // 4),
    }


# ---------------------------------------------------------------------------
# SSH forward (Pallas) — input / output are NCHW to match PyTorch
# ---------------------------------------------------------------------------
def ssh_forward(params, x_nchw, out_channel, *, tile_h=8):
    N, cin, H, W = x_nchw.shape
    assert out_channel % 4 == 0
    c2, c4 = out_channel // 2, out_channel // 4
    leaky = 0.1 if out_channel <= 64 else 0.0

    th = min(tile_h, H)
    while H % th:                                       # largest divisor of H that is <= tile_h
        th -= 1

    x = jnp.transpose(x_nchw, (0, 2, 3, 1))             # NCHW -> NHWC (channels on lanes)
    x_pad = jnp.pad(x, ((0, 0), (3, 3), (1, 1), (0, 0)))  # 3-row halo chain, 1-col SAME pad

    def wflat(p):     # fold BN scale into weights, (3,3,cin,cout) -> (9*cin, cout) bf16
        k = p["w"] * p["scale"]
        return k.reshape(9 * k.shape[2], k.shape[3]).astype(jnp.bfloat16)

    def bpack(p):     # (1, cout) f32 folded BN bias
        return p["bias"].reshape(1, -1).astype(jnp.float32)

    kern = functools.partial(_ssh_fused_kernel, H=H, W=W, TH=th, leaky=leaky)

    def const_spec(shape):
        return pl.BlockSpec(shape, lambda n, h: (0,) * len(shape))

    out = pl.pallas_call(
        kern,
        out_shape=jax.ShapeDtypeStruct((N, H, W, out_channel), jnp.float32),
        grid=(N, H // th),
        in_specs=[
            pl.BlockSpec((1, H + 6, W + 2, cin), lambda n, h: (n, 0, 0, 0)),
            const_spec((9 * cin, c2)), const_spec((1, c2)),    # conv3x3
            const_spec((9 * cin, c4)), const_spec((1, c4)),    # conv5x5_1
            const_spec((9 * c4, c4)),  const_spec((1, c4)),    # conv5x5_2
            const_spec((9 * c4, c4)),  const_spec((1, c4)),    # conv7x7_2
            const_spec((9 * c4, c4)),  const_spec((1, c4)),    # conv7x7_3
        ],
        out_specs=pl.BlockSpec((1, th, W, out_channel), lambda n, h: (n, h, 0, 0)),
        scratch_shapes=[
            pltpu.VMEM((th + 4, W + 2, c4), jnp.float32),       # 1-col padded conv5x5_1 slab
            pltpu.VMEM((th + 2, W + 2, c4), jnp.float32),       # 1-col padded conv7x7_2 slab
        ],
        compiler_params=pltpu.CompilerParams(
            dimension_semantics=("parallel", "parallel"),
            vmem_limit_bytes=64 * 1024 * 1024),
    )(
        x_pad,
        wflat(params["conv3x3"]),   bpack(params["conv3x3"]),
        wflat(params["conv5x5_1"]), bpack(params["conv5x5_1"]),
        wflat(params["conv5x5_2"]), bpack(params["conv5x5_2"]),
        wflat(params["conv7x7_2"]), bpack(params["conv7x7_2"]),
        wflat(params["conv7x7_3"]), bpack(params["conv7x7_3"]),
    )
    return jnp.transpose(out, (0, 3, 1, 2))             # NHWC -> NCHW


# ---------------------------------------------------------------------------
# Pure-JAX reference mirroring the kernel numerics (scale-folded bf16 weights, f32 accum)
# ---------------------------------------------------------------------------
def _ref_conv(x_nhwc, p, act, slope):
    w = (p["w"] * p["scale"]).astype(jnp.bfloat16)
    y = jax.lax.conv_general_dilated(
        x_nhwc.astype(jnp.bfloat16), w,
        window_strides=(1, 1), padding="SAME",
        dimension_numbers=("NHWC", "HWIO", "NHWC"),
        preferred_element_type=jnp.float32)
    y = y + p["bias"]
    if act == "relu":
        y = jnp.maximum(y, 0.0)
    elif act == "leaky":
        y = jnp.where(y >= 0.0, y, slope * y)
    return y


def ssh_forward_ref(params, x_nchw, out_channel):
    leaky = 0.1 if out_channel <= 64 else 0.0
    x = jnp.transpose(x_nchw, (0, 2, 3, 1))
    c3 = _ref_conv(x, params["conv3x3"], "none", leaky)
    c5_1 = _ref_conv(x, params["conv5x5_1"], "leaky", leaky)
    c5 = _ref_conv(c5_1, params["conv5x5_2"], "none", leaky)
    c7_2 = _ref_conv(c5_1, params["conv7x7_2"], "leaky", leaky)
    c7 = _ref_conv(c7_2, params["conv7x7_3"], "none", leaky)
    out = jnp.maximum(jnp.concatenate([c3, c5, c7], axis=-1), 0.0)
    return jnp.transpose(out, (0, 3, 1, 2))


# ---------------------------------------------------------------------------
if __name__ == "__main__":
    N, IN_CH, OUT_CH, H, W = 2, 8, 16, 16, 16

    key = jax.random.PRNGKey(0)
    k_x, k_p = jax.random.split(key)
    x = jax.random.normal(k_x, (N, IN_CH, H, W), jnp.float32)  # NCHW, like PyTorch
    params = make_ssh_params(k_p, IN_CH, OUT_CH)

    out = jax.block_until_ready(ssh_forward(params, x, OUT_CH))
    ref = jax.block_until_ready(ssh_forward_ref(params, x, OUT_CH))

    assert out.shape == (N, OUT_CH, H, W), out.shape
    assert jnp.allclose(out, ref, rtol=2e-2, atol=2e-2), float(jnp.max(jnp.abs(out - ref)))

    print("KERNEL_OK")
</pallas_src>

<mosaic_0001>
module attributes {stable_mosaic.version = 11 : i64} {
  func.func @_ssh_fused_kernel(%arg0: i32, %arg1: i32, %arg2: memref<1x22x18x8xf32, #tpu.memory_space<vmem>>, %arg3: memref<72x8xbf16, #tpu.memory_space<vmem>>, %arg4: memref<1x8xf32, #tpu.memory_space<vmem>>, %arg5: memref<72x4xbf16, #tpu.memory_space<vmem>>, %arg6: memref<1x4xf32, #tpu.memory_space<vmem>>, %arg7: memref<36x4xbf16, #tpu.memory_space<vmem>>, %arg8: memref<1x4xf32, #tpu.memory_space<vmem>>, %arg9: memref<36x4xbf16, #tpu.memory_space<vmem>>, %arg10: memref<1x4xf32, #tpu.memory_space<vmem>>, %arg11: memref<36x4xbf16, #tpu.memory_space<vmem>>, %arg12: memref<1x4xf32, #tpu.memory_space<vmem>>, %arg13: memref<1x8x16x16xf32, #tpu.memory_space<vmem>>, %arg14: memref<12x18x4xf32, #tpu.memory_space<vmem>>, %arg15: memref<10x18x4xf32, #tpu.memory_space<vmem>>) attributes {dimension_semantics = [#tpu.dimension_semantics<parallel>, #tpu.dimension_semantics<parallel>], iteration_bounds = array<i64: 2, 2>, scalar_prefetch = 0 : i64, scratch_operands = 2 : i64, tpu.core_type = #tpu.core_type<tc>, window_params = [{transform_indices = @transform_0, window_bounds = array<i64: 1, 22, 18, 8>}, {pipeline_mode = #tpu.pipeline_mode<synchronous>, transform_indices = @transform_1, window_bounds = array<i64: 72, 8>}, {pipeline_mode = #tpu.pipeline_mode<synchronous>, transform_indices = @transform_2, window_bounds = array<i64: 1, 8>}, {pipeline_mode = #tpu.pipeline_mode<synchronous>, transform_indices = @transform_3, window_bounds = array<i64: 72, 4>}, {pipeline_mode = #tpu.pipeline_mode<synchronous>, transform_indices = @transform_4, window_bounds = array<i64: 1, 4>}, {pipeline_mode = #tpu.pipeline_mode<synchronous>, transform_indices = @transform_5, window_bounds = array<i64: 36, 4>}, {pipeline_mode = #tpu.pipeline_mode<synchronous>, transform_indices = @transform_6, window_bounds = array<i64: 1, 4>}, {pipeline_mode = #tpu.pipeline_mode<synchronous>, transform_indices = @transform_7, window_bounds = array<i64: 36, 4>}, {pipeline_mode = #tpu.pipeline_mode<synchronous>, transform_indices = @transform_8, window_bounds = array<i64: 1, 4>}, {pipeline_mode = #tpu.pipeline_mode<synchronous>, transform_indices = @transform_9, window_bounds = array<i64: 36, 4>}, {pipeline_mode = #tpu.pipeline_mode<synchronous>, transform_indices = @transform_10, window_bounds = array<i64: 1, 4>}, {transform_indices = @transform_11, window_bounds = array<i64: 1, 8, 16, 16>}]} {
    %c8_i32 = arith.constant 8 : i32
    %0 = arith.muli %arg1, %c8_i32 : i32
    %1 = tpu.assume_multiple %0, 8 : i32
    %c0 = arith.constant 0 : index
    %2 = arith.index_cast %1 : i32 to index
    %c0_0 = arith.constant 0 : index
    %c0_1 = arith.constant 0 : index
    %3 = vector.load %arg2[%c0, %2, %c0_0, %c0_1] : memref<1x22x18x8xf32, #tpu.memory_space<vmem>>, vector<1x14x18x8xf32>
    %4 = vector.shape_cast %3 : vector<1x14x18x8xf32> to vector<14x18x8xf32>
    %5 = arith.truncf %4 : vector<14x18x8xf32> to vector<14x18x8xbf16>
    %c0_2 = arith.constant 0 : index
    %c0_3 = arith.constant 0 : index
    %6 = vector.load %arg5[%c0_2, %c0_3] : memref<72x4xbf16, #tpu.memory_space<vmem>>, vector<72x4xbf16>
    %c0_4 = arith.constant 0 : index
    %c0_5 = arith.constant 0 : index
    %7 = vector.load %arg6[%c0_4, %c0_5] : memref<1x4xf32, #tpu.memory_space<vmem>>, vector<1x4xf32>
    %8 = vector.extract_strided_slice %5 {offsets = [0, 0, 0], sizes = [12, 16, 8], strides = [1, 1, 1]} : vector<14x18x8xbf16> to vector<12x16x8xbf16>
    %9 = vector.extract_strided_slice %5 {offsets = [0, 1, 0], sizes = [12, 16, 8], strides = [1, 1, 1]} : vector<14x18x8xbf16> to vector<12x16x8xbf16>
    %10 = vector.extract_strided_slice %5 {offsets = [0, 2, 0], sizes = [12, 16, 8], strides = [1, 1, 1]} : vector<14x18x8xbf16> to vector<12x16x8xbf16>
    %11 = vector.extract_strided_slice %5 {offsets = [1, 0, 0], sizes = [12, 16, 8], strides = [1, 1, 1]} : vector<14x18x8xbf16> to vector<12x16x8xbf16>
    %12 = vector.extract_strided_slice %5 {offsets = [1, 1, 0], sizes = [12, 16, 8], strides = [1, 1, 1]} : vector<14x18x8xbf16> to vector<12x16x8xbf16>
    %13 = vector.extract_strided_slice %5 {offsets = [1, 2, 0], sizes = [12, 16, 8], strides = [1, 1, 1]} : vector<14x18x8xbf16> to vector<12x16x8xbf16>
    %14 = vector.extract_strided_slice %5 {offsets = [2, 0, 0], sizes = [12, 16, 8], strides = [1, 1, 1]} : vector<14x18x8xbf16> to vector<12x16x8xbf16>
    %15 = vector.extract_strided_slice %5 {offsets = [2, 1, 0], sizes = [12, 16, 8], strides = [1, 1, 1]} : vector<14x18x8xbf16> to vector<12x16x8xbf16>
    %16 = vector.extract_strided_slice %5 {offsets = [2, 2, 0], sizes = [12, 16, 8], strides = [1, 1, 1]} : vector<14x18x8xbf16> to vector<12x16x8xbf16>
    %17 = tpu.concatenate %8, %9, %10, %11, %12, %13, %14, %15, %16 in 2 : vector<12x16x8xbf16>, vector<12x16x8xbf16>, vector<12x16x8xbf16>, vector<12x16x8xbf16>, vector<12x16x8xbf16>, vector<12x16x8xbf16>, vector<12x16x8xbf16>, vector<12x16x8xbf16>, vector<12x16x8xbf16> -> vector<12x16x72xbf16>
    %18 = vector.shape_cast %17 : vector<12x16x72xbf16> to vector<192x72xbf16>
    %cst = arith.constant dense<0.000000e+00> : vector<192x4xf32>
    %19 = tpu.matmul %18, %6, %cst {dimension_numbers = #tpu.dot_dimension_numbers<[1], [0], [0], [1], [0, 0, 1, 1], [], []>} : vector<192x72xbf16>, vector<72x4xbf16>, vector<192x4xf32> -> vector<192x4xf32>
    %20 = vector.shape_cast %19 : vector<192x4xf32> to vector<12x16x4xf32>
    %21 = vector.shape_cast %7 : vector<1x4xf32> to vector<1x1x4xf32>
    %22 = vector.broadcast %21 : vector<1x1x4xf32> to vector<12x16x4xf32>
    %23 = arith.addf %20, %22 : vector<12x16x4xf32>
    %cst_6 = arith.constant 0.000000e+00 : f32
    %24 = vector.broadcast %cst_6 : f32 to vector<12x16x4xf32>
    %25 = arith.cmpf oge, %23, %24 : vector<12x16x4xf32>
    %cst_7 = arith.constant 1.000000e-01 : f32
    %26 = vector.broadcast %cst_7 : f32 to vector<12x16x4xf32>
    %27 = arith.mulf %26, %23 : vector<12x16x4xf32>
    %28 = arith.select %25, %23, %27 : vector<12x16x4xi1>, vector<12x16x4xf32>
    %c2_i32 = arith.constant 2 : i32
    %29 = arith.subi %1, %c2_i32 : i32
    %30 = tpu.iota {dimensions = array<i32: 0>} : vector<12x1x1xi32>
    %31 = vector.broadcast %29 : i32 to vector<12x1x1xi32>
    %32 = arith.addi %31, %30 : vector<12x1x1xi32>
    %c0_i32 = arith.constant 0 : i32
    %33 = vector.broadcast %c0_i32 : i32 to vector<12x1x1xi32>
    %34 = arith.cmpi sge, %32, %33 : vector<12x1x1xi32>
    %c16_i32 = arith.constant 16 : i32
    %35 = vector.broadcast %c16_i32 : i32 to vector<12x1x1xi32>
    %36 = arith.cmpi slt, %32, %35 : vector<12x1x1xi32>
    %37 = arith.andi %34, %36 : vector<12x1x1xi1>
    %cst_8 = arith.constant 0.000000e+00 : f32
    %38 = vector.shape_cast %37 : vector<12x1x1xi1> to vector<12x1x1xi1>
    %39 = vector.broadcast %38 : vector<12x1x1xi1> to vector<12x16x4xi1>
    %40 = vector.broadcast %cst_8 : f32 to vector<12x16x4xf32>
    %41 = arith.select %39, %28, %40 : vector<12x16x4xi1>, vector<12x16x4xf32>
    %cst_9 = arith.constant 0.000000e+00 : f32
    %42 = vector.broadcast %cst_9 : f32 to vector<12x18x4xf32>
    %c0_10 = arith.constant 0 : index
    %c0_11 = arith.constant 0 : index
    %c0_12 = arith.constant 0 : index
    %43 = vector.load %arg14[%c0_10, %c0_11, %c0_12] : memref<12x18x4xf32, #tpu.memory_space<vmem>>, vector<12x18x4xf32>
    tpu.vector_store %arg14[%c0_10, %c0_11, %c0_12], %42 {strides = array<i32>} : memref<12x18x4xf32, #tpu.memory_space<vmem>>, vector<12x18x4xf32>,
    %c0_13 = arith.constant 0 : index
    %c1 = arith.constant 1 : index
    %c0_14 = arith.constant 0 : index
    %44 = vector.load %arg14[%c0_13, %c1, %c0_14] : memref<12x18x4xf32, #tpu.memory_space<vmem>>, vector<12x16x4xf32>
    tpu.vector_store %arg14[%c0_13, %c1, %c0_14], %41 {strides = array<i32>} : memref<12x18x4xf32, #tpu.memory_space<vmem>>, vector<12x16x4xf32>,
    %c0_15 = arith.constant 0 : index
    %c0_16 = arith.constant 0 : index
    %c0_17 = arith.constant 0 : index
    %45 = vector.load %arg14[%c0_15, %c0_16, %c0_17] : memref<12x18x4xf32, #tpu.memory_space<vmem>>, vector<12x18x4xf32>
    %46 = arith.truncf %45 : vector<12x18x4xf32> to vector<12x18x4xbf16>
    %c0_18 = arith.constant 0 : index
    %c0_19 = arith.constant 0 : index
    %47 = vector.load %arg9[%c0_18, %c0_19] : memref<36x4xbf16, #tpu.memory_space<vmem>>, vector<36x4xbf16>
    %c0_20 = arith.constant 0 : index
    %c0_21 = arith.constant 0 : index
    %48 = vector.load %arg10[%c0_20, %c0_21] : memref<1x4xf32, #tpu.memory_space<vmem>>, vector<1x4xf32>
    %49 = vector.extract_strided_slice %46 {offsets = [0, 0, 0], sizes = [10, 16, 4], strides = [1, 1, 1]} : vector<12x18x4xbf16> to vector<10x16x4xbf16>
    %50 = vector.extract_strided_slice %46 {offsets = [0, 1, 0], sizes = [10, 16, 4], strides = [1, 1, 1]} : vector<12x18x4xbf16> to vector<10x16x4xbf16>
    %51 = vector.extract_strided_slice %46 {offsets = [0, 2, 0], sizes = [10, 16, 4], strides = [1, 1, 1]} : vector<12x18x4xbf16> to vector<10x16x4xbf16>
    %52 = vector.extract_strided_slice %46 {offsets = [1, 0, 0], sizes = [10, 16, 4], strides = [1, 1, 1]} : vector<12x18x4xbf16> to vector<10x16x4xbf16>
    %53 = vector.extract_strided_slice %46 {offsets = [1, 1, 0], sizes = [10, 16, 4], strides = [1, 1, 1]} : vector<12x18x4xbf16> to vector<10x16x4xbf16>
    %54 = vector.extract_strided_slice %46 {offsets = [1, 2, 0], sizes = [10, 16, 4], strides = [1, 1, 1]} : vector<12x18x4xbf16> to vector<10x16x4xbf16>
    %55 = vector.extract_strided_slice %46 {offsets = [2, 0, 0], sizes = [10, 16, 4], strides = [1, 1, 1]} : vector<12x18x4xbf16> to vector<10x16x4xbf16>
    %56 = vector.extract_strided_slice %46 {offsets = [2, 1, 0], sizes = [10, 16, 4], strides = [1, 1, 1]} : vector<12x18x4xbf16> to vector<10x16x4xbf16>
    %57 = vector.extract_strided_slice %46 {offsets = [2, 2, 0], sizes = [10, 16, 4], strides = [1, 1, 1]} : vector<12x18x4xbf16> to vector<10x16x4xbf16>
    %58 = tpu.concatenate %49, %50, %51, %52, %53, %54, %55, %56, %57 in 2 : vector<10x16x4xbf16>, vector<10x16x4xbf16>, vector<10x16x4xbf16>, vector<10x16x4xbf16>, vector<10x16x4xbf16>, vector<10x16x4xbf16>, vector<10x16x4xbf16>, vector<10x16x4xbf16>, vector<10x16x4xbf16> -> vector<10x16x36xbf16>
    %59 = vector.shape_cast %58 : vector<10x16x36xbf16> to vector<160x36xbf16>
    %cst_22 = arith.constant dense<0.000000e+00> : vector<160x4xf32>
    %60 = tpu.matmul %59, %47, %cst_22 {dimension_numbers = #tpu.dot_dimension_numbers<[1], [0], [0], [1], [0, 0, 1, 1], [], []>} : vector<160x36xbf16>, vector<36x4xbf16>, vector<160x4xf32> -> vector<160x4xf32>
    %61 = vector.shape_cast %60 : vector<160x4xf32> to vector<10x16x4xf32>
    %62 = vector.shape_cast %48 : vector<1x4xf32> to vector<1x1x4xf32>
    %63 = vector.broadcast %62 : vector<1x1x4xf32> to vector<10x16x4xf32>
    %64 = arith.addf %61, %63 : vector<10x16x4xf32>
    %cst_23 = arith.constant 0.000000e+00 : f32
    %65 = vector.broadcast %cst_23 : f32 to vector<10x16x4xf32>
    %66 = arith.cmpf oge, %64, %65 : vector<10x16x4xf32>
    %cst_24 = arith.constant 1.000000e-01 : f32
    %67 = vector.broadcast %cst_24 : f32 to vector<10x16x4xf32>
    %68 = arith.mulf %67, %64 : vector<10x16x4xf32>
    %69 = arith.select %66, %64, %68 : vector<10x16x4xi1>, vector<10x16x4xf32>
    %c1_i32 = arith.constant 1 : i32
    %70 = arith.subi %1, %c1_i32 : i32
    %71 = tpu.iota {dimensions = array<i32: 0>} : vector<10x1x1xi32>
    %72 = vector.broadcast %70 : i32 to vector<10x1x1xi32>
    %73 = arith.addi %72, %71 : vector<10x1x1xi32>
    %c0_i32_25 = arith.constant 0 : i32
    %74 = vector.broadcast %c0_i32_25 : i32 to vector<10x1x1xi32>
    %75 = arith.cmpi sge, %73, %74 : vector<10x1x1xi32>
    %c16_i32_26 = arith.constant 16 : i32
    %76 = vector.broadcast %c16_i32_26 : i32 to vector<10x1x1xi32>
    %77 = arith.cmpi slt, %73, %76 : vector<10x1x1xi32>
    %78 = arith.andi %75, %77 : vector<10x1x1xi1>
    %cst_27 = arith.constant 0.000000e+00 : f32
    %79 = vector.shape_cast %78 : vector<10x1x1xi1> to vector<10x1x1xi1>
    %80 = vector.broadcast %79 : vector<10x1x1xi1> to vector<10x16x4xi1>
    %81 = vector.broadcast %cst_27 : f32 to vector<10x16x4xf32>
    %82 = arith.select %80, %69, %81 : vector<10x16x4xi1>, vector<10x16x4xf32>
    %cst_28 = arith.constant 0.000000e+00 : f32
    %83 = vector.broadcast %cst_28 : f32 to vector<10x18x4xf32>
    %c0_29 = arith.constant 0 : index
    %c0_30 = arith.constant 0 : index
    %c0_31 = arith.constant 0 : index
    %84 = vector.load %arg15[%c0_29, %c0_30, %c0_31] : memref<10x18x4xf32, #tpu.memory_space<vmem>>, vector<10x18x4xf32>
    tpu.vector_store %arg15[%c0_29, %c0_30, %c0_31], %83 {strides = array<i32>} : memref<10x18x4xf32, #tpu.memory_space<vmem>>, vector<10x18x4xf32>,
    %c0_32 = arith.constant 0 : index
    %c1_33 = arith.constant 1 : index
    %c0_34 = arith.constant 0 : index
    %85 = vector.load %arg15[%c0_32, %c1_33, %c0_34] : memref<10x18x4xf32, #tpu.memory_space<vmem>>, vector<10x16x4xf32>
    tpu.vector_store %arg15[%c0_32, %c1_33, %c0_34], %82 {strides = array<i32>} : memref<10x18x4xf32, #tpu.memory_space<vmem>>, vector<10x16x4xf32>,
    %c0_35 = arith.constant 0 : index
    %c0_36 = arith.constant 0 : index
    %c0_37 = arith.constant 0 : index
    %86 = vector.load %arg15[%c0_35, %c0_36, %c0_37] : memref<10x18x4xf32, #tpu.memory_space<vmem>>, vector<10x18x4xf32>
    %87 = arith.truncf %86 : vector<10x18x4xf32> to vector<10x18x4xbf16>
    %88 = vector.extract_strided_slice %5 {offsets = [2, 0, 0], sizes = [10, 18, 8], strides = [1, 1, 1]} : vector<14x18x8xbf16> to vector<10x18x8xbf16>
    %c0_38 = arith.constant 0 : index
    %c0_39 = arith.constant 0 : index
    %89 = vector.load %arg3[%c0_38, %c0_39] : memref<72x8xbf16, #tpu.memory_space<vmem>>, vector<72x8xbf16>
    %c0_40 = arith.constant 0 : index
    %c0_41 = arith.constant 0 : index
    %90 = vector.load %arg4[%c0_40, %c0_41] : memref<1x8xf32, #tpu.memory_space<vmem>>, vector<1x8xf32>
    %91 = vector.extract_strided_slice %88 {offsets = [0, 0, 0], sizes = [8, 16, 8], strides = [1, 1, 1]} : vector<10x18x8xbf16> to vector<8x16x8xbf16>
    %92 = vector.extract_strided_slice %88 {offsets = [0, 1, 0], sizes = [8, 16, 8], strides = [1, 1, 1]} : vector<10x18x8xbf16> to vector<8x16x8xbf16>
    %93 = vector.extract_strided_slice %88 {offsets = [0, 2, 0], sizes = [8, 16, 8], strides = [1, 1, 1]} : vector<10x18x8xbf16> to vector<8x16x8xbf16>
    %94 = vector.extract_strided_slice %88 {offsets = [1, 0, 0], sizes = [8, 16, 8], strides = [1, 1, 1]} : vector<10x18x8xbf16> to vector<8x16x8xbf16>
    %95 = vector.extract_strided_slice %88 {offsets = [1, 1, 0], sizes = [8, 16, 8], strides = [1, 1, 1]} : vector<10x18x8xbf16> to vector<8x16x8xbf16>
    %96 = vector.extract_strided_slice %88 {offsets = [1, 2, 0], sizes = [8, 16, 8], strides = [1, 1, 1]} : vector<10x18x8xbf16> to vector<8x16x8xbf16>
    %97 = vector.extract_strided_slice %88 {offsets = [2, 0, 0], sizes = [8, 16, 8], strides = [1, 1, 1]} : vector<10x18x8xbf16> to vector<8x16x8xbf16>
    %98 = vector.extract_strided_slice %88 {offsets = [2, 1, 0], sizes = [8, 16, 8], strides = [1, 1, 1]} : vector<10x18x8xbf16> to vector<8x16x8xbf16>
    %99 = vector.extract_strided_slice %88 {offsets = [2, 2, 0], sizes = [8, 16, 8], strides = [1, 1, 1]} : vector<10x18x8xbf16> to vector<8x16x8xbf16>
    %100 = tpu.concatenate %91, %92, %93, %94, %95, %96, %97, %98, %99 in 2 : vector<8x16x8xbf16>, vector<8x16x8xbf16>, vector<8x16x8xbf16>, vector<8x16x8xbf16>, vector<8x16x8xbf16>, vector<8x16x8xbf16>, vector<8x16x8xbf16>, vector<8x16x8xbf16>, vector<8x16x8xbf16> -> vector<8x16x72xbf16>
    %101 = vector.shape_cast %100 : vector<8x16x72xbf16> to vector<128x72xbf16>
    %cst_42 = arith.constant dense<0.000000e+00> : vector<128x8xf32>
    %102 = tpu.matmul %101, %89, %cst_42 {dimension_numbers = #tpu.dot_dimension_numbers<[1], [0], [0], [1], [0, 0, 1, 1], [], []>} : vector<128x72xbf16>, vector<72x8xbf16>, vector<128x8xf32> -> vector<128x8xf32>
    %103 = vector.shape_cast %102 : vector<128x8xf32> to vector<8x16x8xf32>
    %104 = vector.shape_cast %90 : vector<1x8xf32> to vector<1x1x8xf32>
    %105 = vector.broadcast %104 : vector<1x1x8xf32> to vector<8x16x8xf32>
    %106 = arith.addf %103, %105 : vector<8x16x8xf32>
    %cst_43 = arith.constant 0.000000e+00 : f32
    %107 = vector.broadcast %cst_43 : f32 to vector<8x16x8xf32>
    %108 = arith.maximumf %106, %107 : vector<8x16x8xf32>
    %109 = vector.extract_strided_slice %46 {offsets = [1, 0, 0], sizes = [10, 18, 4], strides = [1, 1, 1]} : vector<12x18x4xbf16> to vector<10x18x4xbf16>
    %c0_44 = arith.constant 0 : index
    %c0_45 = arith.constant 0 : index
    %110 = vector.load %arg7[%c0_44, %c0_45] : memref<36x4xbf16, #tpu.memory_space<vmem>>, vector<36x4xbf16>
    %c0_46 = arith.constant 0 : index
    %c0_47 = arith.constant 0 : index
    %111 = vector.load %arg8[%c0_46, %c0_47] : memref<1x4xf32, #tpu.memory_space<vmem>>, vector<1x4xf32>
    %112 = vector.extract_strided_slice %109 {offsets = [0, 0, 0], sizes = [8, 16, 4], strides = [1, 1, 1]} : vector<10x18x4xbf16> to vector<8x16x4xbf16>
    %113 = vector.extract_strided_slice %109 {offsets = [0, 1, 0], sizes = [8, 16, 4], strides = [1, 1, 1]} : vector<10x18x4xbf16> to vector<8x16x4xbf16>
    %114 = vector.extract_strided_slice %109 {offsets = [0, 2, 0], sizes = [8, 16, 4], strides = [1, 1, 1]} : vector<10x18x4xbf16> to vector<8x16x4xbf16>
    %115 = vector.extract_strided_slice %109 {offsets = [1, 0, 0], sizes = [8, 16, 4], strides = [1, 1, 1]} : vector<10x18x4xbf16> to vector<8x16x4xbf16>
    %116 = vector.extract_strided_slice %109 {offsets = [1, 1, 0], sizes = [8, 16, 4], strides = [1, 1, 1]} : vector<10x18x4xbf16> to vector<8x16x4xbf16>
    %117 = vector.extract_strided_slice %109 {offsets = [1, 2, 0], sizes = [8, 16, 4], strides = [1, 1, 1]} : vector<10x18x4xbf16> to vector<8x16x4xbf16>
    %118 = vector.extract_strided_slice %109 {offsets = [2, 0, 0], sizes = [8, 16, 4], strides = [1, 1, 1]} : vector<10x18x4xbf16> to vector<8x16x4xbf16>
    %119 = vector.extract_strided_slice %109 {offsets = [2, 1, 0], sizes = [8, 16, 4], strides = [1, 1, 1]} : vector<10x18x4xbf16> to vector<8x16x4xbf16>
    %120 = vector.extract_strided_slice %109 {offsets = [2, 2, 0], sizes = [8, 16, 4], strides = [1, 1, 1]} : vector<10x18x4xbf16> to vector<8x16x4xbf16>
    %121 = tpu.concatenate %112, %113, %114, %115, %116, %117, %118, %119, %120 in 2 : vector<8x16x4xbf16>, vector<8x16x4xbf16>, vector<8x16x4xbf16>, vector<8x16x4xbf16>, vector<8x16x4xbf16>, vector<8x16x4xbf16>, vector<8x16x4xbf16>, vector<8x16x4xbf16>, vector<8x16x4xbf16> -> vector<8x16x36xbf16>
    %122 = vector.shape_cast %121 : vector<8x16x36xbf16> to vector<128x36xbf16>
    %cst_48 = arith.constant dense<0.000000e+00> : vector<128x4xf32>
    %123 = tpu.matmul %122, %110, %cst_48 {dimension_numbers = #tpu.dot_dimension_numbers<[1], [0], [0], [1], [0, 0, 1, 1], [], []>} : vector<128x36xbf16>, vector<36x4xbf16>, vector<128x4xf32> -> vector<128x4xf32>
    %124 = vector.shape_cast %123 : vector<128x4xf32> to vector<8x16x4xf32>
    %125 = vector.shape_cast %111 : vector<1x4xf32> to vector<1x1x4xf32>
    %126 = vector.broadcast %125 : vector<1x1x4xf32> to vector<8x16x4xf32>
    %127 = arith.addf %124, %126 : vector<8x16x4xf32>
    %cst_49 = arith.constant 0.000000e+00 : f32
    %128 = vector.broadcast %cst_49 : f32 to vector<8x16x4xf32>
    %129 = arith.maximumf %127, %128 : vector<8x16x4xf32>
    %c0_50 = arith.constant 0 : index
    %c0_51 = arith.constant 0 : index
    %130 = vector.load %arg11[%c0_50, %c0_51] : memref<36x4xbf16, #tpu.memory_space<vmem>>, vector<36x4xbf16>
    %c0_52 = arith.constant 0 : index
    %c0_53 = arith.constant 0 : index
    %131 = vector.load %arg12[%c0_52, %c0_53] : memref<1x4xf32, #tpu.memory_space<vmem>>, vector<1x4xf32>
    %132 = vector.extract_strided_slice %87 {offsets = [0, 0, 0], sizes = [8, 16, 4], strides = [1, 1, 1]} : vector<10x18x4xbf16> to vector<8x16x4xbf16>
    %133 = vector.extract_strided_slice %87 {offsets = [0, 1, 0], sizes = [8, 16, 4], strides = [1, 1, 1]} : vector<10x18x4xbf16> to vector<8x16x4xbf16>
    %134 = vector.extract_strided_slice %87 {offsets = [0, 2, 0], sizes = [8, 16, 4], strides = [1, 1, 1]} : vector<10x18x4xbf16> to vector<8x16x4xbf16>
    %135 = vector.extract_strided_slice %87 {offsets = [1, 0, 0], sizes = [8, 16, 4], strides = [1, 1, 1]} : vector<10x18x4xbf16> to vector<8x16x4xbf16>
    %136 = vector.extract_strided_slice %87 {offsets = [1, 1, 0], sizes = [8, 16, 4], strides = [1, 1, 1]} : vector<10x18x4xbf16> to vector<8x16x4xbf16>
    %137 = vector.extract_strided_slice %87 {offsets = [1, 2, 0], sizes = [8, 16, 4], strides = [1, 1, 1]} : vector<10x18x4xbf16> to vector<8x16x4xbf16>
    %138 = vector.extract_strided_slice %87 {offsets = [2, 0, 0], sizes = [8, 16, 4], strides = [1, 1, 1]} : vector<10x18x4xbf16> to vector<8x16x4xbf16>
    %139 = vector.extract_strided_slice %87 {offsets = [2, 1, 0], sizes = [8, 16, 4], strides = [1, 1, 1]} : vector<10x18x4xbf16> to vector<8x16x4xbf16>
    %140 = vector.extract_strided_slice %87 {offsets = [2, 2, 0], sizes = [8, 16, 4], strides = [1, 1, 1]} : vector<10x18x4xbf16> to vector<8x16x4xbf16>
    %141 = tpu.concatenate %132, %133, %134, %135, %136, %137, %138, %139, %140 in 2 : vector<8x16x4xbf16>, vector<8x16x4xbf16>, vector<8x16x4xbf16>, vector<8x16x4xbf16>, vector<8x16x4xbf16>, vector<8x16x4xbf16>, vector<8x16x4xbf16>, vector<8x16x4xbf16>, vector<8x16x4xbf16> -> vector<8x16x36xbf16>
    %142 = vector.shape_cast %141 : vector<8x16x36xbf16> to vector<128x36xbf16>
    %cst_54 = arith.constant dense<0.000000e+00> : vector<128x4xf32>
    %143 = tpu.matmul %142, %130, %cst_54 {dimension_numbers = #tpu.dot_dimension_numbers<[1], [0], [0], [1], [0, 0, 1, 1], [], []>} : vector<128x36xbf16>, vector<36x4xbf16>, vector<128x4xf32> -> vector<128x4xf32>
    %144 = vector.shape_cast %143 : vector<128x4xf32> to vector<8x16x4xf32>
    %145 = vector.shape_cast %131 : vector<1x4xf32> to vector<1x1x4xf32>
    %146 = vector.broadcast %145 : vector<1x1x4xf32> to vector<8x16x4xf32>
    %147 = arith.addf %144, %146 : vector<8x16x4xf32>
    %cst_55 = arith.constant 0.000000e+00 : f32
    %148 = vector.broadcast %cst_55 : f32 to vector<8x16x4xf32>
    %149 = arith.maximumf %147, %148 : vector<8x16x4xf32>
    %150 = tpu.concatenate %108, %129, %149 in 2 : vector<8x16x8xf32>, vector<8x16x4xf32>, vector<8x16x4xf32> -> vector<8x16x16xf32>
    %c0_56 = arith.constant 0 : index
    %c0_57 = arith.constant 0 : index
    %c0_58 = arith.constant 0 : index
    %c0_59 = arith.constant 0 : index
    %151 = vector.load %arg13[%c0_56, %c0_57, %c0_58, %c0_59] : memref<1x8x16x16xf32, #tpu.memory_space<vmem>>, vector<1x8x16x16xf32>
    %152 = vector.shape_cast %151 : vector<1x8x16x16xf32> to vector<8x16x16xf32>
    %153 = vector.shape_cast %150 : vector<8x16x16xf32> to vector<1x8x16x16xf32>
    tpu.vector_store %arg13[%c0_56, %c0_57, %c0_58, %c0_59], %153 {strides = array<i32>} : memref<1x8x16x16xf32, #tpu.memory_space<vmem>>, vector<1x8x16x16xf32>,
    return
  }
  func.func @transform_0(%arg0: i32, %arg1: i32) -> (i32, i32, i32, i32) {
    %c0_i32 = arith.constant 0 : i32
    %c0_i32_0 = arith.constant 0 : i32
    %c0_i32_1 = arith.constant 0 : i32
    %c0_i32_2 = arith.constant 0 : i32
    return %arg0, %c0_i32, %c0_i32_0, %c0_i32_1 : i32, i32, i32, i32
  }
  func.func @transform_1(%arg0: i32, %arg1: i32) -> (i32, i32) {
    %c0_i32 = arith.constant 0 : i32
    %c0_i32_0 = arith.constant 0 : i32
    %c0_i32_1 = arith.constant 0 : i32
    return %c0_i32, %c0_i32_0 : i32, i32
  }
  func.func @transform_2(%arg0: i32, %arg1: i32) -> (i32, i32) {
    %c0_i32 = arith.constant 0 : i32
    %c0_i32_0 = arith.constant 0 : i32
    %c0_i32_1 = arith.constant 0 : i32
    return %c0_i32, %c0_i32_0 : i32, i32
  }
  func.func @transform_3(%arg0: i32, %arg1: i32) -> (i32, i32) {
    %c0_i32 = arith.constant 0 : i32
    %c0_i32_0 = arith.constant 0 : i32
    %c0_i32_1 = arith.constant 0 : i32
    return %c0_i32, %c0_i32_0 : i32, i32
  }
  func.func @transform_4(%arg0: i32, %arg1: i32) -> (i32, i32) {
    %c0_i32 = arith.constant 0 : i32
    %c0_i32_0 = arith.constant 0 : i32
    %c0_i32_1 = arith.constant 0 : i32
    return %c0_i32, %c0_i32_0 : i32, i32
  }
  func.func @transform_5(%arg0: i32, %arg1: i32) -> (i32, i32) {
    %c0_i32 = arith.constant 0 : i32
    %c0_i32_0 = arith.constant 0 : i32
    %c0_i32_1 = arith.constant 0 : i32
    return %c0_i32, %c0_i32_0 : i32, i32
  }
  func.func @transform_6(%arg0: i32, %arg1: i32) -> (i32, i32) {
    %c0_i32 = arith.constant 0 : i32
    %c0_i32_0 = arith.constant 0 : i32
    %c0_i32_1 = arith.constant 0 : i32
    return %c0_i32, %c0_i32_0 : i32, i32
  }
  func.func @transform_7(%arg0: i32, %arg1: i32) -> (i32, i32) {
    %c0_i32 = arith.constant 0 : i32
    %c0_i32_0 = arith.constant 0 : i32
    %c0_i32_1 = arith.constant 0 : i32
    return %c0_i32, %c0_i32_0 : i32, i32
  }
  func.func @transform_8(%arg0: i32, %arg1: i32) -> (i32, i32) {
    %c0_i32 = arith.constant 0 : i32
    %c0_i32_0 = arith.constant 0 : i32
    %c0_i32_1 = arith.constant 0 : i32
    return %c0_i32, %c0_i32_0 : i32, i32
  }
  func.func @transform_9(%arg0: i32, %arg1: i32) -> (i32, i32) {
    %c0_i32 = arith.constant 0 : i32
    %c0_i32_0 = arith.constant 0 : i32
    %c0_i32_1 = arith.constant 0 : i32
    return %c0_i32, %c0_i32_0 : i32, i32
  }
  func.func @transform_10(%arg0: i32, %arg1: i32) -> (i32, i32) {
    %c0_i32 = arith.constant 0 : i32
    %c0_i32_0 = arith.constant 0 : i32
    %c0_i32_1 = arith.constant 0 : i32
    return %c0_i32, %c0_i32_0 : i32, i32
  }
  func.func @transform_11(%arg0: i32, %arg1: i32) -> (i32, i32, i32, i32) {
    %c0_i32 = arith.constant 0 : i32
    %c0_i32_0 = arith.constant 0 : i32
    %c0_i32_1 = arith.constant 0 : i32
    return %arg0, %arg1, %c0_i32, %c0_i32_0 : i32, i32, i32, i32
  }
}

</mosaic_0001>

<bundles_post_ra>
// kernel: tpu_custom_call.1
= control target key start
LH: loop header
LB: loop body
LE: loop exit
PB: predicated region body
PF: predicated region fallthrough
CT: control target
= control target key end

     0   :  { %s6180_s0 = inlined_call_operand.vmem [shape: f32[2,22,18,8], index: 0, kind: input, shape index: {}]   ;;  %s6181_s1 = inlined_call_operand.vmem [shape: bf16[72,8], index: 1, kind: input, shape index: {}]   ;;  %s6182_s2 = inlined_call_operand.vmem [shape: f32[1,8], index: 2, kind: input, shape index: {}]   ;;  %s6183_s3 = inlined_call_operand.vmem [shape: bf16[72,4], index: 3, kind: input, shape index: {}]   ;;  %s6184_s4 = inlined_call_operand.vmem [shape: f32[1,4], index: 4, kind: input, shape index: {}]   ;;  %s6185_s5 = inlined_call_operand.vmem [shape: bf16[36,4], index: 5, kind: input, shape index: {}]   ;;  %s6186_s6 = inlined_call_operand.vmem [shape: f32[1,4], index: 6, kind: input, shape index: {}]   ;;  %s6187_s7 = inlined_call_operand.vmem [shape: bf16[36,4], index: 7, kind: input, shape index: {}]   ;;  %s6188_s8 = inlined_call_operand.vmem [shape: f32[1,4], index: 8, kind: input, shape index: {}]   ;;  %s6189_s9 = inlined_call_operand.vmem [shape: bf16[36,4], index: 9, kind: input, shape index: {}]   ;;  %s6190_s10 = inlined_call_operand.vmem [shape: f32[1,4], index: 10, kind: input, shape index: {}]   ;;  %s6191_s11 = inlined_call_operand.hbm [shape: f32[2,16,16,16], index: 11, kind: output, shape index: {}]  }
   0x1   :  { %6213 = sst [smem:[#allocation12_spill]] %s6180_s0 }
   0x2   :  { %6214 = sst [smem:[#allocation13_spill]] %s6181_s1 }
   0x3   :  { %16 = vsyncpa [#allocation5], 0 }
   0x4   :  { %18 = vsyncpa [#allocation5 + $0x1], 0  ;;  %s4163_s17 = smov 0   ;;  %s4165_s18 = smov 0  }
   0x5   :  { %s4167_s19 = smov 0   ;;  %s4169_s20 = smov 0  }
   0x6   :  { %s4171_s21 = smov 0   ;;  %s4173_s22 = smov 0  }
   0x7   :  { %s4175_s23 = smov 0   ;;  %s4177_s24 = smov 0  }
   0x8 LB: > { %6215 = sst [smem:[#allocation7_spill]] %s4059_s17  ;;  %s3762_s25 = sadd.s32 4294967295, %s4087_s24   ;;  %s4087_s24 = sphi %s4177_s24, %s24_s24   ;;  %s4083_s23 = sphi %s4175_s23, %s6339_s23   ;;  %s4079_s22 = sphi %s4173_s22, %s6334_s22   ;;  %s4075_s21 = sphi %s4171_s21, %s6338_s21   ;;  %s4071_s20 = sphi %s4169_s20, %s6333_s20   ;;  %s4067_s19 = sphi %s4167_s19, %s6337_s19   ;;  %s4063_s18 = sphi %s4165_s18, %s6336_s18   ;;  %s4059_s17 = sphi %s4163_s17, %s6335_s17  }
   0x9   : > { %6216 = sst [smem:[#allocation8_spill]] %s4079_s22  ;;  %s3763_s26 = sadd.s32 4294967294, %s4087_s24  }
   0xa   : > { %6217 = sst [smem:[#allocation9_spill]] %s4087_s24  ;;  %s33_s27 = sadd.s32 1, %s4079_s22 }
   0xb   : > { %p34_p0 = scmp.ge.s32.totalorder %s33_s27, 2  ;;  %s36_s28 = sadd.s32 1, %s4083_s23 }
   0xc   : > { %p291_p1 = scmp.ne.s32.totalorder %s4067_s19, %s4063_s18  ;;  %p292_p2 = scmp.eq.s32.totalorder %s3762_s25, 3 }
   0xd   : > { %s6341_s27 = smov (%p34_p0, %s33_s27), 0  ;;  %s6343_s28 = smov (!%p34_p0, %s36_s28), %s4083_s23 }
   0xe   : > { %6218 = sst [smem:[#allocation10_spill]] %s6341_s27  ;;  %s277_s29 = ssub.s32 %s4079_s22, %s6341_s27 }
   0xf   : > { %p4214_p3 = por %p292_p2, %p291_p1  ;;  %p38_p4 = scmp.ge.s32.totalorder %s6343_s28, 2 }
  0x10   : > { %p297_p5 = scmp.ne.s32.totalorder %s4063_s18, %s4059_s17  ;;  %p298_p6 = scmp.eq.s32.totalorder %s3763_s26, 3 }
  0x11   : > { %p3766_p7 = scmp.ge.s32.totalorder %s4087_s24, 1  ;;  %s6345_s28 = smov (%p38_p4, %s6343_s28), 0 }
  0x12   : > { %p4223_p8 = por %p298_p6, %p297_p5  ;;  %p354_p9 = scmp.lt.s32.totalorder %s4087_s24, 5 }
  0x13   : > { %s276_s13 = ssub.s32 %s4083_s23, %s6345_s28  ;;  %s281_s14 = sadd.s32 1, %s4067_s19 }
  0x14   : > { %s6220_s12 = scalar_select %p4223_p8, 1, 0 }
  0x15   : > { %s278_s15 = sor.u32 %s277_s29, %s276_s13  ;;  %p355_p10 = pnand %p3766_p7, %p354_p9 }
  0x16   : > { %6221 = sst [smem:[#allocation11_spill]] %s6220_s12  ;;  %p279_p11 = scmp.eq.s32.totalorder %s278_s15, 0 }
  0x17   : > { %358 = sbr.rel (%p355_p10) target bundleno = 1233 (0x4d1), region = 64  ;;  %p394_p12 = scmp.lt.s32.totalorder (!%p355_p10), %s4075_s21, 1 }
  0x18   : > { %s4232_s16 = scalar_select %p279_p11, %s4067_s19, %s281_s14  }
  0x19   : > { %s3770_s26 = smul.u32 (!%p355_p10), 192, %s4071_s20  ;;  %s6222_s0 = sld [smem:[#allocation12_spill]] (!%p355_p10) }
  0x1a   : > { %s4089_s17 = smov (!%p355_p10), 48   ;;  %s4090_s22 = smov (!%p355_p10), 24  }
  0x1b   : > { %s6204_s29 = smov (!%p355_p10), 16   ;;  %s6198_s13 = smov (!%p355_p10), 56  }
  0x1c   : > { %s395_s25 = scalar_select %p394_p12, %s4075_s21, 1  ;;  %vm763_vm0 = vcmask 1046528   ;;  %vm594_vm1 = vsmask.f32 7424  ;;  %vm1266_vm2 = vcmask 1043456   ;;  %vm1014_vm3 = vcmask 64512  }
  0x1d   : > { %s6200_s14 = smov 64   ;;  %s4096_s15 = smov 32   ;;  %vm6206_vm4 = vcmask 130048   ;;  %vm6207_vm5 = vcmask 195584   ;;  %vm1089_vm6 = vcmask 261120   ;;  %vm1114_vm7 = vcmask 326656  }
  0x1e   : > { %s3900_s27 = smul.u32 528, %s395_s25  ;;  %s6223_s25 = smov 64   ;;  %vm1139_vm8 = vcmask 392192   ;;  %vm1164_vm9 = vcmask 457728   ;;  %vm1189_vm10 = vcmask 523264   ;;  %vm1241_vm11 = vcmask 588800  }
  0x1f   : > { %s6225_s1 = sld [smem:[#allocation13_spill]]  ;;  %vm1535_vm12 = vcmask 31744  }
  0x20   : > { %s398_s12 = scalar_lea.vmem %s6222_s0, %s3900_s27  ;;  %s6202_s27 = smov 8  }
  0x21   : > { %s4240_s24 = scalar_lea.vmem %s398_s12, %s3770_s26  ;;  %s4093_s12 = smov 40  }
  0x22   : > { %v410_v0 = vld [vmem:[%s4240_s24 + $0x30] sm:$0xff]  ;;  %v411_v1 = vld [vmem:[%s4240_s24 + $0x38] sm:$0xff]  ;;  %v408_v5 = vld [vmem:[%s4240_s24 + $0x20] sm:$0xff]  ;;  %s6224_s26 = smov 56  }
  0x23   : > { %v407_v2 = vld [vmem:[%s4240_s24 + $0x18] sm:$0xff]  ;;  %v452_v3 = vpack.c.bf16 %v410_v0, %v410_v0  ;;  %v453_v4 = vpack.c.bf16 %v411_v1, %v411_v1  ;;  %v404_v7 = vld [vmem:[%s4240_s24] sm:$0xff]  ;;  %v405_v8 = vld [vmem:[%s4240_s24 + $0x8] sm:$0xff]  ;;  %v450_v9 = vpack.c.bf16 %v408_v5, %v408_v5 }
  0x24   : > { %v449_v6 = vpack.c.bf16 %v407_v2, %v407_v2  ;;  %v406_v10 = vld [vmem:[%s4240_s24 + $0x10] sm:$0x3]  ;;  %v446_v11 = vpack.c.bf16 %v404_v7, %v404_v7  ;;  %v447_v12 = vpack.c.bf16 %v405_v8, %v405_v8  ;;  %v412_v13 = vld [vmem:[%s4240_s24 + $0x40] sm:$0x3]  ;;  %v409_v14 = vld [vmem:[%s4240_s24 + $0x28] sm:$0x3] }
  0x25   : > { %v526_v15 = vunpack.c.l.b16 %v452_v3  ;;  %v527_v16 = vunpack.c.l.b16 %v453_v4  ;;  %v448_v18 = vpack.c.bf16 %v406_v10, %v406_v10  ;;  %v525_v19 = vunpack.c.l.b16 %v450_v9  ;;  %v413_v63 = vld [vmem:[%s4240_s24 + $0x48] sm:$0xff]  ;;  %v414_v0 = vld [vmem:[%s4240_s24 + $0x50] sm:$0xff]  ;;  %v415_v3 = vld [vmem:[%s4240_s24 + $0x58] sm:$0x3] }
  0x26   : > { %v524_v17 = vunpack.c.l.b16 %v449_v6  ;;  %v522_v20 = vunpack.c.l.b16 %v446_v11  ;;  %v523_v21 = vunpack.c.l.b16 %v447_v12  ;;  %v454_v22 = vpack.c.bf16 %v412_v13, %v412_v13  ;;  %v416_v9 = vld [vmem:[%s4240_s24 + $0x60] sm:$0xff]  ;;  %v417_v10 = vld [vmem:[%s4240_s24 + $0x68] sm:$0xff] }
  0x27   : > { %v4251_v23 = vpack.c.b16 %v527_v16, %v526_v15  ;;  %v570_v24 = vunpack.c.l.b16 %v448_v18  ;;  %v451_v25 = vpack.c.bf16 %v409_v14, %v409_v14  ;;  %v455_v1 = vpack.c.bf16 %v413_v63, %v413_v63  ;;  %v418_v15 = vld [vmem:[%s4240_s24 + $0x70] sm:$0x3] }
  0x28   : > { %v4253_v26 = vpack.c.b16 %v525_v19, %v524_v17  ;;  %v4255_v27 = vpack.c.b16 %v523_v21, %v522_v20  ;;  %v572_v28 = vunpack.c.l.b16 %v454_v22  ;;  %v456_v2 = vpack.c.bf16 %v414_v0, %v414_v0  ;;  %v496_v0 = vld [vmem:[%s6183_s3 + $0x20] sm:$0xf] }
  0x29   : > { %924 = vrot.lane.b32.xlu0 %v4251_v23, %s4089_s17  ;;  %v582_v29 = vpack.c.b16 %v570_v24, %v570_v24  ;;  %v571_v30 = vunpack.c.l.b16 %v451_v25  ;;  %v622_v34 = vshll.u32 %v4251_v23, 16  ;;  %v620_v42 = vshrl.u32 %v4251_v23, 16 }
  0x2a   : > { %829 = vrot.lane.b32.xlu1 %v4253_v26, %s4090_s22  ;;  %v764_v31 = vrot.slane %v4255_v27, 1  ;;  %v596_v32 = vshrl.u32 %v4255_v27, 16  ;;  %v598_v33 = vshll.u32 %v4255_v27, 16  ;;  %v584_v37 = vpack.c.b16 %v572_v28, %v572_v28 }
  0x2b   : > { %v765_v35 = vrot.slane %v582_v29, 1  ;;  %v603_v36 = vshll.u32 %v582_v29, 16  ;;  %v583_v38 = vpack.c.b16 %v571_v30, %v571_v30  ;;  %v610_v40 = vshll.u32 %v4253_v26, 16 }
  0x2c   : > { %v600_v39 = vrot.slane %v598_v33, 1  ;;  %v608_v43 = vshrl.u32 %v4253_v26, 16  ;;  %v767_v47 = vrot.slane %v4253_v26, 1  ;;  %v624_v49 = vrot.slane %v622_v34, 1 }
  0x2d   : > { %v605_v41 = vrot.slane %v603_v36, 1  ;;  %v612_v45 = vrot.slane %v610_v40, 1  ;;  %v615_v46 = vshll.u32 %v583_v38, 16  ;;  %v766_v48 = vsel %vm763_vm0, %v764_v31, %v765_v35  ;;  %v419_v40 = vld [vmem:[%s4240_s24 + $0x78] sm:$0xff] }
  0x2e   : > { %v601_v44 = vor.u32 %v600_v39, %v596_v32  ;;  %v627_v50 = vshll.u32 %v584_v37, 16  ;;  %v768_v51 = vrot.slane %v583_v38, 1  ;;  %v625_v56 = vor.u32 %v624_v49, %v620_v42 }
  0x2f   : > { %v613_v54 = vor.u32 %v612_v45, %v608_v43  ;;  %v617_v55 = vrot.slane %v615_v46, 1  ;;  %v770_v58 = vrot.slane %v4251_v23, 1  ;;  %v771_v59 = vrot.slane %v584_v37, 1  ;;  %v421_v45 = vld [vmem:[%s4240_s24 + $0x88] sm:$0x3] }
  0x30   : > { %v606_v52 = vsel %vm594_vm1, %v601_v44, %v605_v41  ;;  %v769_v53 = vsel %vm763_vm0, %v767_v47, %v768_v51  ;;  %v629_v57 = vrot.slane %v627_v50, 1  ;;  %v457_v4 = vpack.c.bf16 %v415_v3, %v415_v3  ;;  %v420_v41 = vld [vmem:[%s4240_s24 + $0x80] sm:$0xff]  ;;  %v422_v3 = vld [vmem:[%s4240_s24 + $0x90] sm:$0xff] }
  0x31   : > { %739 = vrot.lane.b32.xlu0 %v606_v52, %s6202_s27  ;;  %895 = vrot.lane.b32.xlu2 %v769_v53, %s4093_s12  ;;  %v618_v60 = vsel %vm594_vm1, %v613_v54, %v617_v55  ;;  %v772_v62 = vsel %vm763_vm0, %v770_v58, %v771_v59  ;;  %v528_v5 = vunpack.c.l.b16 %v455_v1  ;;  %v529_v6 = vunpack.c.l.b16 %v456_v2 }
  0x32   : > { %800 = vrot.lane.b32.xlu1 %v766_v48, %s6204_s29  ;;  %v630_v61 = vsel %vm594_vm1, %v625_v56, %v629_v57  ;;  %v573_v7 = vunpack.c.l.b16 %v457_v4  ;;  %v458_v13 = vpack.c.bf16 %v416_v9, %v416_v9  ;;  %v459_v14 = vpack.c.bf16 %v417_v10, %v417_v10  ;;  %v423_v4 = vld [vmem:[%s4240_s24 + $0x98] sm:$0xff]  ;;  %v424_v9 = vld [vmem:[%s4240_s24 + $0xa0] sm:$0x3] }
  0x33   : > { %v4289_v8 = vpack.c.b16 %v529_v6, %v528_v5  ;;  %v460_v24 = vpack.c.bf16 %v418_v15, %v418_v15  ;;  %v461_v42 = vpack.c.bf16 %v419_v40, %v419_v40  ;;  %v462_v43 = vpack.c.bf16 %v420_v41, %v420_v41 }
  0x34   : > { %v585_v12 = vpack.c.b16 %v573_v7, %v573_v7  ;;  %v530_v21 = vunpack.c.l.b16 %v458_v13  ;;  %v531_v22 = vunpack.c.l.b16 %v459_v14  ;;  %v463_v46 = vpack.c.bf16 %v421_v45, %v421_v45 }
  0x35   : > { %v634_v11 = vshll.u32 %v4289_v8, 16  ;;  %v632_v16 = vshrl.u32 %v4289_v8, 16  ;;  %v773_v19 = vrot.slane %v4289_v8, 1  ;;  %v574_v31 = vunpack.c.l.b16 %v460_v24 }
  0x36   : > { %v639_v18 = vshll.u32 %v585_v12, 16  ;;  %v774_v20 = vrot.slane %v585_v12, 1  ;;  %v4302_v30 = vpack.c.b16 %v531_v22, %v530_v21  ;;  %v532_v47 = vunpack.c.l.b16 %v461_v42  ;;  %v3883_v22 = vld [vmem:[%s6183_s3 + $0x8] sm:$0xff] }
  0x37   : > { %v636_v17 = vrot.slane %v634_v11, 1  ;;  %v586_v33 = vpack.c.b16 %v574_v31, %v574_v31  ;;  %v533_v48 = vunpack.c.l.b16 %v462_v43  ;;  %v575_v52 = vunpack.c.l.b16 %v463_v46  ;;  %v3885_v11 = vld [vmem:[%s6183_s3 + $0x18] sm:$0xff] }
  0x38   : > { %v641_v28 = vrot.slane %v639_v18, 1  ;;  %v775_v29 = vsel %vm763_vm0, %v773_v19, %v774_v20  ;;  %v646_v34 = vshll.u32 %v4302_v30, 16  ;;  %v644_v35 = vshrl.u32 %v4302_v30, 16  ;;  %v425_v18 = vld [vmem:[%s4240_s24 + $0xa8] sm:$0xff]  ;;  %v426_v19 = vld [vmem:[%s4240_s24 + $0xb0] sm:$0xff] }
  0x39   : > { %741 = vrot.lane.b32.xlu0 %v618_v60, %s6202_s27  ;;  %990 = vrot.lane.b32.xlu2 %v772_v62, %s6200_s14  ;;  %v637_v25 = vor.u32 %v636_v17, %v632_v16  ;;  %v651_v37 = vshll.u32 %v586_v33, 16  ;;  %v776_v49 = vrot.slane %v4302_v30, 1  ;;  %v777_v50 = vrot.slane %v586_v33, 1  ;;  %v3884_v16 = vld [vmem:[%s6183_s3 + $0x10] sm:$0xff] }
  0x3a   : > { %963 = vrot.lane.b32.xlu1 %v630_v61, %s6198_s13  ;;  %v648_v36 = vrot.slane %v646_v34, 1  ;;  %v4323_v51 = vpack.c.b16 %v533_v48, %v532_v47  ;;  %v587_v54 = vpack.c.b16 %v575_v52, %v575_v52  ;;  %v1231_v2 = vunpack.c.l.b16 %v496_v0  ;;  %v2655_v0 = vld [vmem:[%s6225_s1 + $0x20] sm:$0xf] }
  0x3b   : > { %v642_v32 = vsel %vm594_vm1, %v637_v25, %v641_v28  ;;  %v653_v39 = vrot.slane %v651_v37, 1  ;;  %v464_v6 = vpack.c.bf16 %v422_v3, %v422_v3  ;;  %v465_v7 = vpack.c.bf16 %v423_v4, %v423_v4  ;;  %v427_v28 = vld [vmem:[%s4240_s24 + $0xb8] sm:$0x3] }
  0x3c   : > { %v649_v38 = vor.u32 %v648_v36, %v644_v35  ;;  %v658_v55 = vshll.u32 %v4323_v51, 16  ;;  %v656_v56 = vshrl.u32 %v4323_v51, 16  ;;  %v663_v58 = vshll.u32 %v587_v54, 16  ;;  %v3882_v35 = vld [vmem:[%s6183_s3] sm:$0xff] }
  0x3d   : > { %v1236_v5 = vpack.c.b16 %v1231_v2, %v1231_v2  ;;  %v466_v12 = vpack.c.bf16 %v424_v9, %v424_v9  ;;  %v534_v13 = vunpack.c.l.b16 %v464_v6  ;;  %v535_v14 = vunpack.c.l.b16 %v465_v7 }
  0x3e   : > { %v654_v44 = vsel %vm594_vm1, %v649_v38, %v653_v39  ;;  %v660_v57 = vrot.slane %v658_v55, 1  ;;  %v467_v24 = vpack.c.bf16 %v425_v18, %v425_v18  ;;  %v468_v25 = vpack.c.bf16 %v426_v19, %v426_v19 }
  0x3f   : > { %v1268_v10 = vsel %vm1266_vm2, %v1236_v5, 0  ;;  %v576_v15 = vunpack.c.l.b16 %v466_v12  ;;  %v4362_v17 = vpack.c.b16 %v535_v14, %v534_v13  ;;  %v469_v38 = vpack.c.bf16 %v427_v28, %v427_v28  ;;  %v3890_v28 = vld [vmem:[%s6225_s1 + $0x10] sm:$0xff] }
  0x40   : > { %v661_v59 = vor.u32 %v660_v57, %v656_v56  ;;  %1273 = vmatpush.bf16.msra.mxu0 %v1268_v10  ;;  %v536_v36 = vunpack.c.l.b16 %v467_v24  ;;  %v537_v37 = vunpack.c.l.b16 %v468_v25  ;;  %v428_v56 = vld [vmem:[%s4240_s24 + $0xc0] sm:$0xff]  ;;  %v429_v57 = vld [vmem:[%s4240_s24 + $0xc8] sm:$0xff]  ;;  %v2674_v2 = vunpack.c.l.b16 %v2655_v0 }
  0x41   : > { %802 = vrot.lane.b32.xlu0 %v769_v53, %s6204_s29  ;;  %868 = vrot.lane.b32.xlu2 %v618_v60, %s4096_s15  ;;  %v778_v53 = vsel %vm763_vm0, %v776_v49, %v777_v50  ;;  %v665_v60 = vrot.slane %v663_v58, 1  ;;  %v670_v20 = vshll.u32 %v4362_v17, 16  ;;  %v588_v21 = vpack.c.b16 %v576_v15, %v576_v15 }
  0x42   : > { %831 = vrot.lane.b32.xlu1 %v4251_v23, %s4090_s22  ;;  %v782_v33 = vrot.slane %v4362_v17, 1  ;;  %v4382_v43 = vpack.c.b16 %v537_v37, %v536_v36  ;;  %v2679_v5 = vpack.c.b16 %v2674_v2, %v2674_v2 }
  0x43   : > { %v666_v63 = vsel %vm594_vm1, %v661_v59, %v665_v60  ;;  %v672_v31 = vrot.slane %v670_v20, 1  ;;  %v783_v34 = vrot.slane %v588_v21, 1  ;;  %v470_v60 = vpack.c.bf16 %v428_v56, %v428_v56 }
  0x44   : > { %1274 = vmatpush.bf16.msra.mxu0 %v3885_v11  ;;  %v682_v47 = vshll.u32 %v4382_v43, 16  ;;  %v680_v49 = vshrl.u32 %v4382_v43, 16  ;;  %v2685_v11 = vsel %vm1266_vm2, %v2679_v5, 0  ;;  %v785_v13 = vrot.slane %v4382_v43, 1 }
  0x45   : > { %v784_v42 = vsel %vm763_vm0, %v782_v33, %v783_v34  ;;  %v538_v3 = vunpack.c.l.b16 %v470_v60  ;;  %2690 = vmatpush.bf16.msra.mxu2 %v2685_v11 }
  0x46   : > { %v684_v50 = vrot.slane %v682_v47, 1 }
  0x48   : > { %1275 = vmatpush.bf16.msra.mxu0 %v3884_v16 }
  0x49   : > { %897 = vrot.lane.b32.xlu0 %v772_v62, %s4093_s12  ;;  %870 = vrot.lane.b32.xlu2 %v630_v61, %s4096_s15 }
  0x4a   : > { %926 = vrot.lane.b32.xlu1 %v4289_v8, %s4089_s17 }
  0x4c   : > { %1276 = vmatpush.bf16.msra.mxu0 %v3883_v22 }
  0x50   : > { %1277 = vmatpush.bf16.msra.mxu0 %v3882_v35 }
  0x51   : > { %992 = vrot.lane.b32.xlu0 %v775_v29, %s6200_s14  ;;  %965 = vrot.lane.b32.xlu2 %v642_v32, %s6198_s13 }
  0x52   : > { %743 = vrot.lane.b32.xlu1 %v630_v61, %s6202_s27  ;;  %v779_v61 = vrot.slane %v4323_v51, 1 }
  0x59   : > { %833 = vrot.lane.b32.xlu0 %v4289_v8, %s4090_s22  ;;  %804 = vrot.lane.b32.xlu2 %v772_v62, %s6204_s29  ;;  %v780_v62 = vrot.slane %v587_v54, 1  ;;  %v685_v54 = vor.u32 %v684_v50, %v680_v49 }
  0x5a   : > { %872 = vrot.lane.b32.xlu1 %v642_v32, %s4096_s15 }
  0x5b   : > { %v4341_v1 = vsel %vm763_vm0, %v779_v61, %v780_v62  ;;  %v471_v61 = vpack.c.bf16 %v429_v57, %v429_v57 }
  0x5d   : > { %v539_v4 = vunpack.c.l.b16 %v471_v61 }
  0x5f   : > { %v4419_v16 = vpack.c.b16 %v539_v4, %v538_v3 }
  0x61   : > { %928 = vrot.lane.b32.xlu0 %v4302_v30, %s4089_s17  ;;  %899 = vrot.lane.b32.xlu2 %v775_v29, %s4093_s12  ;;  %v694_v24 = vshll.u32 %v4419_v16, 16  ;;  %v692_v35 = vshrl.u32 %v4419_v16, 16 }
  0x62   : > { %967 = vrot.lane.b32.xlu1 %v654_v44, %s6198_s13 }
  0x63   : > { %v696_v36 = vrot.slane %v694_v24, 1 }
  0x69   : > { %745 = vrot.lane.b32.xlu0 %v642_v32, %s6202_s27  ;;  %994 = vrot.lane.b32.xlu2 %v778_v53, %s6200_s14  ;;  %v675_v32 = vshll.u32 %v588_v21, 16 }
  0x6a   : > { %806 = vrot.lane.b32.xlu1 %v775_v29, %s6204_s29  ;;  %v668_v29 = vshrl.u32 %v4362_v17, 16 }
  0x6b   : > { %v677_v41 = vrot.slane %v675_v32, 1 }
  0x6c   : > { %v673_v40 = vor.u32 %v672_v31, %v668_v29 }
  0x6e   : > { %v678_v45 = vsel %vm594_vm1, %v673_v40, %v677_v41 }
  0x71   : > { %874 = vrot.lane.b32.xlu0 %v654_v44, %s4096_s15  ;;  %835 = vrot.lane.b32.xlu2 %v4302_v30, %s4090_s22 }
  0x72   : > { %901 = vrot.lane.b32.xlu1 %v778_v53, %s4093_s12 }
  0x79   : > { %969 = vrot.lane.b32.xlu0 %v666_v63, %s6198_s13  ;;  %930 = vrot.lane.b32.xlu2 %v4323_v51, %s4089_s17  ;;  %s6226_s13 = smov 16  }
  0x7a   : > { %996 = vrot.lane.b32.xlu1 %v4341_v1, %s6200_s14  ;;  %s6227_s14 = smov 8  }
  0x81   : > { %808 = vrot.lane.b32.xlu0 %v778_v53, %s6204_s29  ;;  %747 = vrot.lane.b32.xlu2 %v654_v44, %s6202_s27  ;;  %v577_v44 = vunpack.c.l.b16 %v469_v38  ;;  %v3889_v38 = vld [vmem:[%s6225_s1 + $0x8] sm:$0xff] }
  0x82   : > { %837 = vrot.lane.b32.xlu1 %v4323_v51, %s4090_s22 }
  0x83   : > { %v589_v46 = vpack.c.b16 %v577_v44, %v577_v44 }
  0x85   : > { %v687_v52 = vshll.u32 %v589_v46, 16  ;;  %v786_v14 = vrot.slane %v589_v46, 1 }
  0x87   : > { %v689_v55 = vrot.slane %v687_v52, 1  ;;  %v787_v21 = vsel %vm763_vm0, %v785_v13, %v786_v14  ;;  %v435_v13 = vld [vmem:[%s4240_s24 + $0xf8] sm:$0xff] }
  0x89   : > { %903 = vrot.lane.b32.xlu0 %v4341_v1, %s4093_s12  ;;  %876 = vrot.lane.b32.xlu2 %v666_v63, %s4096_s15  ;;  %v4400_v62 = vsel %vm594_vm1, %v685_v54, %v689_v55  ;;  %v432_v54 = vld [vmem:[%s4240_s24 + $0xe0] sm:$0xff] }
  0x8a   : > { %932 = vrot.lane.b32.xlu1 %v4362_v17, %s4089_s17  ;;  %v474_v57 = vpack.c.bf16 %v432_v54, %v432_v54 }
  0x8b   : > { %v896_v39 = vpop.permute.xlu2 %895 }
  0x91   : > { %998 = vrot.lane.b32.xlu0 %v784_v42, %s6223_s25  ;;  %971 = vrot.lane.b32.xlu2 %v678_v45, %s6224_s26 }
  0x92   : > { %749 = vrot.lane.b32.xlu1 %v666_v63, %s6202_s27  ;;  %v430_v63 = vld [vmem:[%s4240_s24 + $0xd0] sm:$0x3] }
  0x93   : > { %v4389_v48 = vpop.permute.xlu2 %990 }
  0x99   : > { %839 = vrot.lane.b32.xlu0 %v4362_v17, %s4090_s22  ;;  %810 = vrot.lane.b32.xlu2 %v4341_v1, %s6204_s29  ;;  %v472_v1 = vpack.c.bf16 %v430_v63, %v430_v63 }
  0x9a   : > { %878 = vrot.lane.b32.xlu1 %v678_v45, %s4096_s15 }
  0x9b   : > { %v925_v53 = vpop.permute.xlu0 %924  ;;  %v869_v59 = vpop.permute.xlu2 %868  ;;  %v578_v18 = vunpack.c.l.b16 %v472_v1  ;;  %v541_v1 = vunpack.c.l.b16 %v474_v57 }
  0x9c   : > { %v830_v58 = vpop.permute.xlu1 %829 }
  0x9d   : > { %v590_v22 = vpack.c.b16 %v578_v18, %v578_v18 }
  0x9f   : > { %v699_v37 = vshll.u32 %v590_v22, 16  ;;  %v789_v44 = vrot.slane %v590_v22, 1 }
  0xa1   : > { %934 = vrot.lane.b32.xlu0 %v4382_v43, %s4089_s17  ;;  %905 = vrot.lane.b32.xlu2 %v784_v42, %s4093_s12  ;;  %v701_v40 = vrot.slane %v699_v37, 1 }
  0xa2   : > { %973 = vrot.lane.b32.xlu1 %v4400_v62, %s6224_s26 }
  0xa3   : > { %v740_v6 = vpop.permute.xlu0 %739  ;;  %v4413_v10 = vpop.permute.xlu2 %870 }
  0xa4   : > { %v801_v7 = vpop.permute.xlu1 %800  ;;  %v1016_v9 = vsel %vm1014_vm3, %v4255_v27, %v740_v6  ;;  %v3891_v27 = vld [vmem:[%s6225_s1 + $0x18] sm:$0xff] }
  0xa5   : > { %v1041_v12 = vsel %vm6206_vm4, %v1016_v9, %v801_v7  ;;  %2691 = vmatpush.bf16.msra.mxu2 %v3891_v27  ;;  %v477_v27 = vpack.c.bf16 %v435_v13, %v435_v13 }
  0xa6   : > { %v1066_v15 = vsel %vm6207_vm5, %v1041_v12, %v830_v58  ;;  %v433_v58 = vld [vmem:[%s4240_s24 + $0xe8] sm:$0x3]  ;;  %v434_v12 = vld [vmem:[%s4240_s24 + $0xf0] sm:$0xff] }
  0xa7   : > { %v1091_v19 = vsel %vm1089_vm6, %v1066_v15, %v869_v59  ;;  %v475_v0 = vpack.c.bf16 %v433_v58, %v433_v58 }
  0xa8   : > { %v1116_v20 = vsel %vm1114_vm7, %v1091_v19, %v896_v39  ;;  %v697_v39 = vor.u32 %v696_v36, %v692_v35  ;;  %v436_v19 = vld [vmem:[%s4240_s24 + $0x100] sm:$0x3] }
  0xa9   : > { %751 = vrot.lane.b32.xlu0 %v678_v45, %s6202_s27  ;;  %1000 = vrot.lane.b32.xlu2 %v787_v21, %s6223_s25  ;;  %v1141_v31 = vsel %vm1139_vm8, %v1116_v20, %v925_v53  ;;  %v3888_v45 = vld [vmem:[%s6225_s1] sm:$0xff]  ;;  %v431_v53 = vld [vmem:[%s4240_s24 + $0xd8] sm:$0xff]  ;;  %v579_v4 = vunpack.c.l.b16 %v475_v0  ;;  %s4099_s27 = smov 12  }
  0xaa   : > { %812 = vrot.lane.b32.xlu1 %v784_v42, %s6204_s29  ;;  %2692 = vmatpush.bf16.msra.mxu2 %v3890_v28  ;;  %v788_v42 = vrot.slane %v4419_v16, 1  ;;  %v4456_v50 = vsel %vm594_vm1, %v697_v39, %v701_v40  ;;  %v473_v56 = vpack.c.bf16 %v431_v53, %v431_v53  ;;  %s4100_s29 = smov 20  }
  0xab   : > { %v742_v25 = vpop.permute.xlu0 %741  ;;  %v966_v32 = vpop.permute.xlu2 %965  ;;  %v591_v15 = vpack.c.b16 %v579_v4, %v579_v4 }
  0xac   : > { %v964_v29 = vpop.permute.xlu1 %963  ;;  %v4459_v52 = vsel %vm763_vm0, %v788_v42, %v789_v44  ;;  %v540_v2 = vunpack.c.l.b16 %v473_v56 }
  0xad   : > { %v1166_v33 = vsel %vm1164_vm9, %v1141_v31, %v964_v29  ;;  %v711_v22 = vshll.u32 %v591_v15, 16  ;;  %v792_v28 = vrot.slane %v591_v15, 1  ;;  %v543_v31 = vunpack.c.l.b16 %v477_v27 }
  0xae   : > { %v1191_v34 = vsel %vm1189_vm10, %v1166_v33, %v4389_v48  ;;  %2693 = vmatpush.bf16.msra.mxu2 %v3889_v38  ;;  %v1018_v48 = vsel %vm1014_vm3, %v4253_v26, %v742_v25  ;;  %v4481_v7 = vpack.c.b16 %v541_v1, %v540_v2 }
  0xaf   : > { %3787 = vmatmul.msk.bf16.vlgmr.msra.gmra.mxu0 %vm1241_vm11, %v1191_v34  ;;  %v713_v37 = vrot.slane %v711_v22, 1 }
  0xb0   : > { %v706_v14 = vshll.u32 %v4481_v7, 16  ;;  %v704_v20 = vshrl.u32 %v4481_v7, 16  ;;  %v791_v25 = vrot.slane %v4481_v7, 1 }
  0xb1   : > { %880 = vrot.lane.b32.xlu0 %v4400_v62, %s4096_s15  ;;  %841 = vrot.lane.b32.xlu2 %v4382_v43, %s4090_s22 }
  0xb2   : > { %907 = vrot.lane.b32.xlu1 %v787_v21, %s4093_s12  ;;  %2694 = vmatpush.bf16.msra.mxu2 %v3888_v45  ;;  %v793_v38 = vsel %vm763_vm0, %v791_v25, %v792_v28 }
  0xb3   : > { %v803_v41 = vpop.permute.xlu0 %802  ;;  %v805_v47 = vpop.permute.xlu2 %804 }
  0xb4   : > { %v832_v46 = vpop.permute.xlu1 %831  ;;  %v1043_v49 = vsel %vm6206_vm4, %v1018_v48, %v803_v41 }
  0xb5   : > { %v1068_v55 = vsel %vm6207_vm5, %v1043_v49, %v832_v46 }
  0xb6   : > { %v1093_v59 = vsel %vm1089_vm6, %v1068_v55, %v4413_v10 }
  0xb9   : > { %975 = vrot.lane.b32.xlu0 %v4456_v50, %s6224_s26  ;;  %936 = vrot.lane.b32.xlu2 %v4419_v16, %s4089_s17 }
  0xba   : > { %1002 = vrot.lane.b32.xlu1 %v4459_v52, %s6223_s25 }
  0xbb   : > { %v898_v26 = vpop.permute.xlu0 %897  ;;  %v900_v61 = vpop.permute.xlu2 %899 }
  0xbc   : > { %v927_v60 = vpop.permute.xlu1 %926  ;;  %v1118_v63 = vsel %vm1114_vm7, %v1093_v59, %v898_v26 }
  0xbd   : > { %v1143_v3 = vsel %vm1139_vm8, %v1118_v63, %v927_v60  ;;  %v437_v60 = vld [vmem:[%s4240_s24 + $0x108] sm:$0xff] }
  0xbe   : > { %v1168_v5 = vsel %vm1164_vm9, %v1143_v3, %v966_v32  ;;  %v478_v32 = vpack.c.bf16 %v436_v19, %v436_v19  ;;  %v479_v1 = vpack.c.bf16 %v437_v60, %v437_v60 }
  0xc0   : > { %v580_v40 = vunpack.c.l.b16 %v478_v32 }
  0xc1   : > { %814 = vrot.lane.b32.xlu0 %v787_v21, %s6226_s13  ;;  %753 = vrot.lane.b32.xlu2 %v4400_v62, %s6227_s14  ;;  %v476_v62 = vpack.c.bf16 %v434_v12, %v434_v12  ;;  %v708_v21 = vrot.slane %v706_v14, 1 }
  0xc2   : > { %843 = vrot.lane.b32.xlu1 %v4419_v16, %s4090_s22  ;;  %v592_v46 = vpack.c.b16 %v580_v40, %v580_v40 }
  0xc3   : > { %v993_v6 = vpop.permute.xlu0 %992  ;;  %v995_v11 = vpop.permute.xlu2 %994  ;;  %v542_v29 = vunpack.c.l.b16 %v476_v62  ;;  %v709_v36 = vor.u32 %v708_v21, %v704_v20 }
  0xc4   : > { %v744_v9 = vpop.permute.xlu1 %743  ;;  %v1193_v10 = vsel %vm1189_vm10, %v1168_v5, %v993_v6  ;;  %v723_v56 = vshll.u32 %v592_v46, 16  ;;  %v439_v5 = vld [vmem:[%s4240_s24 + $0x118] sm:$0x3] }
  0xc5   : > { %3788 = vmatmul.msk.bf16.gmra.mxu0 %vm1241_vm11, %v1193_v10  ;;  %v1020_v18 = vsel %vm1014_vm3, %v4251_v23, %v744_v9  ;;  %v4502_v39 = vpack.c.b16 %v543_v31, %v542_v29  ;;  %v714_v42 = vsel %vm594_vm1, %v709_v36, %v713_v37  ;;  %v544_v9 = vunpack.c.l.b16 %v479_v1 }
  0xc6   : > { %v1045_v24 = vsel %vm6206_vm4, %v1020_v18, %v805_v47  ;;  %v725_v59 = vrot.slane %v723_v56, 1  ;;  %v795_v18 = vrot.slane %v592_v46, 1 }
  0xc7   : > { %v718_v47 = vshll.u32 %v4502_v39, 16  ;;  %v794_v15 = vrot.slane %v4502_v39, 1 }
  0xc9   : > { %909 = vrot.lane.b32.xlu0 %v4459_v52, %s4093_s12  ;;  %882 = vrot.lane.b32.xlu2 %v4456_v50, %s4096_s15  ;;  %v720_v26 = vrot.slane %v718_v47, 1  ;;  %v796_v20 = vsel %vm763_vm0, %v794_v15, %v795_v18 }
  0xca   : > { %938 = vrot.lane.b32.xlu1 %v4481_v7, %s4089_s17 }
  0xcb   : > { %v834_v23 = vpop.permute.xlu0 %833  ;;  %v836_v34 = vpop.permute.xlu2 %835 }
  0xcc   : > { %v873_v33 = vpop.permute.xlu1 %872  ;;  %v1070_v35 = vsel %vm6207_vm5, %v1045_v24, %v834_v23 }
  0xcd   : > { %v1095_v41 = vsel %vm1089_vm6, %v1070_v35, %v873_v33 }
  0xce   : > { %v1120_v44 = vsel %vm1114_vm7, %v1095_v41, %v900_v61  ;;  %v438_v61 = vld [vmem:[%s4240_s24 + $0x110] sm:$0xff] }
  0xcf   : > { %v480_v3 = vpack.c.bf16 %v438_v61, %v438_v61 }
  0xd1   : > { %1004 = vrot.lane.b32.xlu0 %v793_v38, %s6223_s25  ;;  %977 = vrot.lane.b32.xlu2 %v714_v42, %s6224_s26  ;;  %v545_v10 = vunpack.c.l.b16 %v480_v3 }
  0xd2   : > { %755 = vrot.lane.b32.xlu1 %v4456_v50, %s6227_s14  ;;  %v716_v50 = vshrl.u32 %v4502_v39, 16 }
  0xd3   : > { %v929_v45 = vpop.permute.xlu0 %928  ;;  %v931_v53 = vpop.permute.xlu2 %930  ;;  %v4540_v62 = vpack.c.b16 %v545_v10, %v544_v9  ;;  %v443_v9 = vld [vmem:[%s4240_s24 + $0x138] sm:$0xff]  ;;  %v444_v10 = vld [vmem:[%s4240_s24 + $0x140] sm:$0xff] }
  0xd4   : > { %v1145_v48 = vsel %vm1139_vm8, %v1120_v44, %v929_v45  ;;  %v968_v49 = vpop.permute.xlu1 %967  ;;  %v721_v58 = vor.u32 %v720_v26, %v716_v50  ;;  %v442_v50 = vld [vmem:[%s4240_s24 + $0x130] sm:$0x3] }
  0xd5   : > { %v1170_v54 = vsel %vm1164_vm9, %v1145_v48, %v968_v49  ;;  %v730_v22 = vshll.u32 %v4540_v62, 16  ;;  %v728_v32 = vshrl.u32 %v4540_v62, 16  ;;  %v797_v40 = vrot.slane %v4540_v62, 1  ;;  %v440_v48 = vld [vmem:[%s4240_s24 + $0x120] sm:$0xff]  ;;  %v441_v49 = vld [vmem:[%s4240_s24 + $0x128] sm:$0xff] }
  0xd6   : > { %v1195_v55 = vsel %vm1189_vm10, %v1170_v54, %v995_v11  ;;  %v4528_v4 = vsel %vm594_vm1, %v721_v58, %v725_v59  ;;  %v482_v54 = vpack.c.bf16 %v440_v48, %v440_v48  ;;  %v484_v59 = vpack.c.bf16 %v442_v50, %v442_v50 }
  0xd7   : > { %3789 = vmatmul.msk.bf16.gmra.mxu0 %vm1241_vm11, %v1195_v55  ;;  %3835 = vmatmul.msk.bf16.vlgmr.msra.gmra.mxu2 %vm1241_vm11, %v1195_v55  ;;  %v732_v33 = vrot.slane %v730_v22, 1  ;;  %v483_v55 = vpack.c.bf16 %v441_v49, %v441_v49 }
  0xd8   : > { %v826_v60 = vunpack.c.l.b16 %v482_v54 }
  0xd9   : > { %845 = vrot.lane.b32.xlu0 %v4481_v7, %s4090_s22  ;;  %816 = vrot.lane.b32.xlu2 %v4459_v52, %s6226_s13  ;;  %v481_v52 = vpack.c.bf16 %v439_v5, %v439_v5  ;;  %v733_v35 = vor.u32 %v732_v33, %v728_v32  ;;  %v827_v61 = vunpack.c.l.b16 %v483_v55 }
  0xda   : > { %884 = vrot.lane.b32.xlu1 %v714_v42, %s4096_s15 }
  0xdb   : > { %v746_v57 = vpop.permute.xlu0 %745  ;;  %v748_v0 = vpop.permute.xlu2 %747  ;;  %v581_v27 = vunpack.c.l.b16 %v481_v52  ;;  %v4588_v3 = vpack.c.b16 %v827_v61, %v826_v60 }
  0xdc   : > { %v807_v63 = vpop.permute.xlu1 %806  ;;  %v1022_v2 = vsel %vm1014_vm3, %v4289_v8, %v746_v57  ;;  %v1024_v37 = vsel %vm1014_vm3, %v4302_v30, %v748_v0  ;;  %v854_v0 = vunpack.c.l.b16 %v484_v59 }
  0xdd   : > { %v1047_v6 = vsel %vm6206_vm4, %v1022_v2, %v807_v63  ;;  %v593_v21 = vpack.c.b16 %v581_v27, %v581_v27  ;;  %v857_v15 = vshrl.u32 %v4588_v3, 16 }
  0xde   : > { %v1072_v11 = vsel %vm6207_vm5, %v1047_v6, %v836_v34 }
  0xdf   : > { %v735_v34 = vshll.u32 %v593_v21, 16  ;;  %v798_v41 = vrot.slane %v593_v21, 1 }
  0xe1   : > { %940 = vrot.lane.b32.xlu0 %v4502_v39, %s4089_s17  ;;  %911 = vrot.lane.b32.xlu2 %v793_v38, %s4093_s12  ;;  %v737_v36 = vrot.slane %v735_v34, 1  ;;  %v4567_v47 = vsel %vm763_vm0, %v797_v40, %v798_v41 }
  0xe2   : > { %979 = vrot.lane.b32.xlu1 %v4528_v4, %s6224_s26 }
  0xe3   : > { %v875_v8 = vpop.permute.xlu0 %874  ;;  %v877_v13 = vpop.permute.xlu2 %876  ;;  %v4564_v46 = vsel %vm594_vm1, %v733_v35, %v737_v36 }
  0xe4   : > { %v902_v12 = vpop.permute.xlu1 %901  ;;  %v1097_v14 = vsel %vm1089_vm6, %v1072_v11, %v875_v8  ;;  %v859_v8 = vshll.u32 %v4588_v3, 16  ;;  %v855_v11 = vpack.c.b16 %v854_v0, %v854_v0 }
  0xe5   : > { %v1122_v19 = vsel %vm1114_vm7, %v1097_v14, %v902_v12  ;;  %v485_v12 = vpack.c.bf16 %v443_v9, %v443_v9  ;;  %v445_v14 = vld [vmem:[%s4240_s24 + $0x148] sm:$0x3]  ;;  %s6208_s24 = sshll.u32 %s4071_s20, 3 }
  0xe6   : > { %v1147_v24 = vsel %vm1139_vm8, %v1122_v19, %v931_v53  ;;  %v861_v18 = vrot.slane %v859_v8, 1  ;;  %v864_v27 = vshll.u32 %v855_v11, 16  ;;  %v893_v21 = vrot.slane %v855_v11, 1 }
  0xe7   : > { %v921_v22 = vunpack.c.l.b16 %v485_v12 }
  0xe8   : > { %v866_v32 = vrot.slane %v864_v27, 1 }
  0xe9   : > { %757 = vrot.lane.b32.xlu0 %v714_v42, %s6227_s14  ;;  %1006 = vrot.lane.b32.xlu2 %v796_v20, %s6223_s25 }
  0xea   : > { %818 = vrot.lane.b32.xlu1 %v793_v38, %s6226_s13 }
  0xeb   : > { %v970_v25 = vpop.permute.xlu0 %969  ;;  %v972_v29 = vpop.permute.xlu2 %971 }
  0xec   : > { %v1172_v28 = vsel %vm1164_vm9, %v1147_v24, %v970_v25  ;;  %v997_v23 = vpop.permute.xlu1 %996  ;;  %v487_v25 = vpack.c.bf16 %v445_v14, %v445_v14 }
  0xed   : > { %v1197_v31 = vsel %vm1189_vm10, %v1172_v28, %v997_v23 }
  0xee   : > { %3790 = vmatmul.msk.bf16.gmra.mxu0 %vm1241_vm11, %v1197_v31  ;;  %3836 = vmatmul.msk.bf16.gmra.mxu2 %vm1241_vm11, %v1197_v31  ;;  %v862_v31 = vor.u32 %v861_v18, %v857_v15  ;;  %v949_v35 = vunpack.c.l.b16 %v487_v25 }
  0xf1   : > { %886 = vrot.lane.b32.xlu0 %v4528_v4, %s4096_s15  ;;  %847 = vrot.lane.b32.xlu2 %v4502_v39, %s4090_s22 }
  0xf2   : > { %913 = vrot.lane.b32.xlu1 %v796_v20, %s4093_s12 }
  0xf3   : > { %v809_v38 = vpop.permute.xlu0 %808  ;;  %v811_v44 = vpop.permute.xlu2 %810 }
  0xf4   : > { %v838_v42 = vpop.permute.xlu1 %837  ;;  %v1049_v45 = vsel %vm6206_vm4, %v1024_v37, %v809_v38  ;;  %v867_v37 = vsel %vm594_vm1, %v862_v31, %v866_v32  ;;  %v4097_v38 = vmov 0.0  }
  0xf5   : > { %v1074_v53 = vsel %vm6207_vm5, %v1049_v45, %v838_v42  ;;  %1536 = vst.msk [vmem:[#allocation2] sm:$0xff] %vm1535_vm12, %v4097_v38  ;;  %v950_v42 = vpack.c.b16 %v949_v35, %v949_v35 }
  0xf6   : > { %v1099_v26 = vsel %vm1089_vm6, %v1074_v53, %v877_v13  ;;  %v486_v13 = vpack.c.bf16 %v444_v10, %v444_v10  ;;  %1537 = vst.msk [vmem:[#allocation2 + $0x8] sm:$0xff] %vm1535_vm12, %v4097_v38 }
  0xf7   : > { %1540 = vst.msk [vmem:[#allocation2 + $0x18] sm:$0xff] %vm1535_vm12, %v4097_v38  ;;  %v959_v55 = vshll.u32 %v950_v42, 16 }
  0xf8   : > { %v922_v24 = vunpack.c.l.b16 %v486_v13  ;;  %1541 = vst.msk [vmem:[#allocation2 + $0x20] sm:$0xff] %vm1535_vm12, %v4097_v38 }
  0xf9   : > { %981 = vrot.lane.b32.xlu0 %v4564_v46, %s6224_s26  ;;  %942 = vrot.lane.b32.xlu2 %v4540_v62, %s4089_s17  ;;  %1543 = vst.msk [vmem:[#allocation2 + $0x30] sm:$0xff] %vm1535_vm12, %v4097_v38 }
  0xfa   : > { %1008 = vrot.lane.b32.xlu1 %v4567_v47, %s6223_s25  ;;  %v4612_v34 = vpack.c.b16 %v922_v24, %v921_v22  ;;  %1544 = vst.msk [vmem:[#allocation2 + $0x38] sm:$0xff] %vm1535_vm12, %v4097_v38 }
  0xfb   : > { %v904_v30 = vpop.permute.xlu0 %903  ;;  %v906_v57 = vpop.permute.xlu2 %905  ;;  %1546 = vst.msk [vmem:[#allocation2 + $0x48] sm:$0xff] %vm1535_vm12, %v4097_v38 }
  0xfc   : > { %v933_v56 = vpop.permute.xlu1 %932  ;;  %v1124_v58 = vsel %vm1114_vm7, %v1099_v26, %v904_v30  ;;  %v952_v30 = vshrl.u32 %v4612_v34, 16  ;;  %1547 = vst.msk [vmem:[#allocation2 + $0x50] sm:$0xff] %vm1535_vm12, %v4097_v38  ;;  %v987_v61 = vrot.slane %v4612_v34, 1 }
  0xfd   : > { %v1149_v63 = vsel %vm1139_vm8, %v1124_v58, %v933_v56  ;;  %1549 = vst.msk [vmem:[#allocation2 + $0x60] sm:$0xff] %vm1535_vm12, %v4097_v38  ;;  %v961_v56 = vrot.slane %v959_v55, 1 }
  0xfe   : > { %v1174_v2 = vsel %vm1164_vm9, %v1149_v63, %v972_v29  ;;  %1550 = vst.msk [vmem:[#allocation2 + $0x68] sm:$0xff] %vm1535_vm12, %v4097_v38  ;;  %v988_v63 = vrot.slane %v950_v42, 1 }
  0xff   : > { %1552 = vst.msk [vmem:[#allocation2 + $0x78] sm:$0xff] %vm1535_vm12, %v4097_v38 }
 0x100   : > { %1553 = vst.msk [vmem:[#allocation2 + $0x80] sm:$0xff] %vm1535_vm12, %v4097_v38 }
 0x101   : > { %820 = vrot.lane.b32.xlu0 %v796_v20, %s6226_s13  ;;  %759 = vrot.lane.b32.xlu2 %v4528_v4, %s6227_s14  ;;  %v892_v20 = vrot.slane %v4588_v3, 1  ;;  %1555 = vst.msk [vmem:[#allocation2 + $0x90] sm:$0xff] %vm1535_vm12, %v4097_v38 }
 0x102   : > { %849 = vrot.lane.b32.xlu1 %v4540_v62, %s4090_s22  ;;  %1556 = vst.msk [vmem:[#allocation2 + $0x98] sm:$0xff] %vm1535_vm12, %v4097_v38 }
 0x103   : > { %v999_v1 = vpop.permute.xlu0 %998  ;;  %v1001_v52 = vpop.permute.xlu2 %1000  ;;  %v894_v33 = vsel %vm763_vm0, %v892_v20, %v893_v21  ;;  %1558 = vst.msk [vmem:[#allocation2 + $0xa8] sm:$0xff] %vm1535_vm12, %v4097_v38 }
 0x104   : > { %v750_v5 = vpop.permute.xlu1 %749  ;;  %v1199_v6 = vsel %vm1189_vm10, %v1174_v2, %v999_v1  ;;  %1559 = vst.msk [vmem:[#allocation2 + $0xb0] sm:$0xff] %vm1535_vm12, %v4097_v38 }
 0x105   : > { %3791 = vmatmul.msk.bf16.gmra.mxu0 %vm1241_vm11, %v1199_v6  ;;  %3837 = vmatmul.msk.bf16.gmra.mxu2 %vm1241_vm11, %v1199_v6  ;;  %v1026_v4 = vsel %vm1014_vm3, %v4323_v51, %v750_v5  ;;  %1561 = vst.msk [vmem:[#allocation2 + $0xc0] sm:$0xff] %vm1535_vm12, %v4097_v38  ;;  %v989_v5 = vsel %vm763_vm0, %v987_v61, %v988_v63 }
 0x106   : > { %v1051_v19 = vsel %vm6206_vm4, %v1026_v4, %v811_v44  ;;  %v954_v44 = vshll.u32 %v4612_v34, 16  ;;  %1562 = vst.msk [vmem:[#allocation2 + $0xc8] sm:$0xff] %vm1535_vm12, %v4097_v38 }
 0x107   : > { %1564 = vst.msk [vmem:[#allocation2 + $0xd8] sm:$0xff] %vm1535_vm12, %v4097_v38 }
 0x108   : > { %v956_v54 = vrot.slane %v954_v44, 1  ;;  %1565 = vst.msk [vmem:[#allocation2 + $0xe0] sm:$0xff] %vm1535_vm12, %v4097_v38 }
 0x109   : > { %915 = vrot.lane.b32.xlu0 %v4567_v47, %s4093_s12  ;;  %888 = vrot.lane.b32.xlu2 %v4564_v46, %s4096_s15  ;;  %1567 = vst.msk [vmem:[#allocation2 + $0xf0] sm:$0xff] %vm1535_vm12, %v4097_v38 }
 0x10a   : > { %944 = vrot.lane.b32.xlu1 %v4588_v3, %s4089_s17  ;;  %v957_v26 = vor.u32 %v956_v54, %v952_v30  ;;  %1568 = vst.msk [vmem:[#allocation2 + $0xf8] sm:$0xff] %vm1535_vm12, %v4097_v38 }
 0x10b   : > { %v840_v51 = vpop.permute.xlu0 %839  ;;  %v4608_v23 = vpop.permute.xlu2 %841  ;;  %1570 = vst.msk [vmem:[#allocation2 + $0x108] sm:$0xff] %vm1535_vm12, %v4097_v38 }
 0x10c   : > { %v879_v28 = vpop.permute.xlu1 %878  ;;  %v1076_v29 = vsel %vm6207_vm5, %v1051_v19, %v840_v51  ;;  %v962_v59 = vsel %vm594_vm1, %v957_v26, %v961_v56  ;;  %1571 = vst.msk [vmem:[#allocation2 + $0x110] sm:$0xff] %vm1535_vm12, %v4097_v38 }
 0x10d   : > { %v1101_v36 = vsel %vm1089_vm6, %v1076_v29, %v879_v28  ;;  %2537 = vst.msk [vmem:[#allocation3] sm:$0xff] %vm1535_vm12, %v4097_v38 }
 0x10e   : > { %v1126_v40 = vsel %vm1114_vm7, %v1101_v36, %v906_v57  ;;  %2538 = vst.msk [vmem:[#allocation3 + $0x8] sm:$0xff] %vm1535_vm12, %v4097_v38 }
 0x10f   : > { %2540 = vst.msk [vmem:[#allocation3 + $0x18] sm:$0xff] %vm1535_vm12, %v4097_v38 }
 0x110   : > { %2541 = vst.msk [vmem:[#allocation3 + $0x20] sm:$0xff] %vm1535_vm12, %v4097_v38 }
 0x111   : > { %1010 = vrot.lane.b32.xlu0 %v894_v33, %s6223_s25  ;;  %983 = vrot.lane.b32.xlu2 %v867_v37, %s6224_s26  ;;  %2543 = vst.msk [vmem:[#allocation3 + $0x30] sm:$0xff] %vm1535_vm12, %v4097_v38 }
 0x112   : > { %761 = vrot.lane.b32.xlu1 %v4564_v46, %s6227_s14  ;;  %2544 = vst.msk [vmem:[#allocation3 + $0x38] sm:$0xff] %vm1535_vm12, %v4097_v38 }
 0x113   : > { %v935_v41 = vpop.permute.xlu0 %934  ;;  %v937_v49 = vpop.permute.xlu2 %936  ;;  %2546 = vst.msk [vmem:[#allocation3 + $0x48] sm:$0xff] %vm1535_vm12, %v4097_v38 }
 0x114   : > { %v1151_v45 = vsel %vm1139_vm8, %v1126_v40, %v935_v41  ;;  %v974_v48 = vpop.permute.xlu1 %973  ;;  %2547 = vst.msk [vmem:[#allocation3 + $0x50] sm:$0xff] %vm1535_vm12, %v4097_v38 }
 0x115   : > { %v1176_v46 = vsel %vm1164_vm9, %v1151_v45, %v974_v48  ;;  %2549 = vst.msk [vmem:[#allocation3 + $0x60] sm:$0xff] %vm1535_vm12, %v4097_v38 }
 0x116   : > { %v1201_v53 = vsel %vm1189_vm10, %v1176_v46, %v1001_v52  ;;  %v4701_v52 = vld [vmem:[%s6184_s4] ss:$0 sm:$0xff]  ;;  %2550 = vst.msk [vmem:[#allocation3 + $0x68] sm:$0xff] %vm1535_vm12, %v4097_v38 }
 0x117   : > { %3792 = vmatmul.msk.bf16.gmra.mxu0 %vm1241_vm11, %v1201_v53  ;;  %3838 = vmatmul.msk.bf16.gmra.mxu2 %vm1241_vm11, %v1201_v53  ;;  %2552 = vst.msk [vmem:[#allocation3 + $0x78] sm:$0xff] %vm1535_vm12, %v4097_v38 }
 0x118   : > { %2553 = vst.msk [vmem:[#allocation3 + $0x80] sm:$0xff] %vm1535_vm12, %v4097_v38 }
 0x119   : > { %851 = vrot.lane.b32.xlu0 %v4588_v3, %s4090_s22  ;;  %822 = vrot.lane.b32.xlu2 %v4567_v47, %s6226_s13  ;;  %2555 = vst.msk [vmem:[#allocation3 + $0x90] sm:$0xff] %vm1535_vm12, %v4097_v38 }
 0x11a   : > { %890 = vrot.lane.b32.xlu1 %v867_v37, %s4096_s15  ;;  %2556 = vst.msk [vmem:[#allocation3 + $0x98] sm:$0xff] %vm1535_vm12, %v4097_v38 }
 0x11b   : > { %v752_v50 = vpop.permute.xlu0 %751  ;;  %v754_v58 = vpop.permute.xlu2 %753  ;;  %2558 = vst.msk [vmem:[#allocation3 + $0xa8] sm:$0xff] %vm1535_vm12, %v4097_v38 }
 0x11c   : > { %v813_v57 = vpop.permute.xlu1 %812  ;;  %v1028_v47 = vsel %vm1014_vm3, %v4362_v17, %v752_v50  ;;  %v1030_v21 = vsel %vm1014_vm3, %v4382_v43, %v754_v58  ;;  %2559 = vst.msk [vmem:[#allocation3 + $0xb0] sm:$0xff] %vm1535_vm12, %v4097_v38 }
 0x11d   : > { %v1053_v60 = vsel %vm6206_vm4, %v1028_v47, %v813_v57  ;;  %2561 = vst.msk [vmem:[#allocation3 + $0xc0] sm:$0xff] %vm1535_vm12, %v4097_v38 }
 0x11e   : > { %v1078_v0 = vsel %vm6207_vm5, %v1053_v60, %v4608_v23  ;;  %2562 = vst.msk [vmem:[#allocation3 + $0xc8] sm:$0xff] %vm1535_vm12, %v4097_v38 }
 0x11f   : > { %2564 = vst.msk [vmem:[#allocation3 + $0xd8] sm:$0xff] %vm1535_vm12, %v4097_v38 }
 0x120   : > { %2565 = vst.msk [vmem:[#allocation3 + $0xe0] sm:$0xff] %vm1535_vm12, %v4097_v38 }
 0x121   : > { %946 = vrot.lane.b32.xlu0 %v4612_v34, %s4089_s17  ;;  %917 = vrot.lane.b32.xlu2 %v894_v33, %s4093_s12  ;;  %s3799_s17 = sadd.s32 4294967294, %s6208_s24  ;;  %s6254_s24 = smov 4  }
 0x122   : > { %985 = vrot.lane.b32.xlu1 %v962_v59, %s6224_s26  ;;  %v4703_v9 = vstv %s3799_s17  ;;  %s6211_s17 = smov 28  }
 0x123   : > { %v881_v17 = vpop.permute.xlu0 %880  ;;  %v4683_v1 = vpop.permute.xlu2 %882  ;;  %vm1451_vm13 = vcmp.ge.s32.totalorder %v4703_v9, 0  ;;  %vm1463_vm14 = vcmp.lt.s32.totalorder %v4703_v9, 16  ;;  %v1440_v26 = vadd.s32 1, %v4703_v9 }
 0x124   : > { %v908_v2 = vpop.permute.xlu1 %907  ;;  %v1103_v3 = vsel %vm1089_vm6, %v1078_v0, %v881_v17  ;;  %vm4726_vm2 = vmand %vm1451_vm13, %vm1463_vm14  ;;  %vm1538_vm14 = vcmask 25600  }
 0x125   : > { %v1128_v6 = vsel %vm1114_vm7, %v1103_v3, %v908_v2  ;;  %1539 = vst.msk [vmem:[#allocation2 + $0x10] sm:$0x3] %vm1538_vm14, %v4097_v38 }
 0x126   : > { %v1153_v10 = vsel %vm1139_vm8, %v1128_v6, %v937_v49  ;;  %1542 = vst.msk [vmem:[#allocation2 + $0x28] sm:$0x3] %vm1538_vm14, %v4097_v38 }
 0x127   : > { %1545 = vst.msk [vmem:[#allocation2 + $0x40] sm:$0x3] %vm1538_vm14, %v4097_v38 }
 0x128   : > { %1548 = vst.msk [vmem:[#allocation2 + $0x58] sm:$0x3] %vm1538_vm14, %v4097_v38 }
 0x129   : > { %1012 = vrot.lane.b32.xlu2 %v989_v5, %s6223_s25  ;;  %1551 = vst.msk [vmem:[#allocation2 + $0x70] sm:$0x3] %vm1538_vm14, %v4097_v38  ;;  %s6209_s25 = smov 4  }
 0x12a   : > { %1554 = vst.msk [vmem:[#allocation2 + $0x88] sm:$0x3] %vm1538_vm14, %v4097_v38 }
 0x12b   : > { %v976_v8 = vpop.permute.xlu0 %975  ;;  %v978_v15 = vpop.permute.xlu2 %977  ;;  %1557 = vst.msk [vmem:[#allocation2 + $0xa0] sm:$0x3] %vm1538_vm14, %v4097_v38 }
 0x12c   : > { %v1279_v11 = vpop.f32.mrf.mxu0  ;;  %v1178_v4 = vsel %vm1164_vm9, %v1153_v10, %v976_v8  ;;  %v1003_v12 = vpop.permute.xlu1 %1002  ;;  %1560 = vst.msk [vmem:[#allocation2 + $0xb8] sm:$0x3] %vm1538_vm14, %v4097_v38 }
 0x12d   : > { %v1342_v13 = vadd.f32 %v4701_v52, %v1279_v11  ;;  %v1203_v14 = vsel %vm1189_vm10, %v1178_v4, %v1003_v12  ;;  %1563 = vst.msk [vmem:[#allocation2 + $0xd0] sm:$0x3] %vm1538_vm14, %v4097_v38 }
 0x12e   : > { %3793 = vmatmul.msk.bf16.gmra.mxu0 %vm1241_vm11, %v1203_v14  ;;  %3839 = vmatmul.msk.bf16.gmra.mxu2 %vm1241_vm11, %v1203_v14  ;;  %1566 = vst.msk [vmem:[#allocation2 + $0xe8] sm:$0x3] %vm1538_vm14, %v4097_v38 }
 0x12f   : > { %vm1366_vm15 = vcmp.ge.f32.partialorder %v1342_v13, 0.0  ;;  %v1390_v18 = vmul.f32 0.1, %v1342_v13  ;;  %1569 = vst.msk [vmem:[#allocation2 + $0x100] sm:$0x3] %vm1538_vm14, %v4097_v38 }
 0x130   : > { %1572 = vst.msk [vmem:[#allocation2 + $0x118] sm:$0x3] %vm1538_vm14, %v4097_v38 }
 0x131   : > { %v1414_v19 = vsel %vm1366_vm15, %v1342_v13, %v1390_v18  ;;  %2539 = vst.msk [vmem:[#allocation3 + $0x10] sm:$0x3] %vm1538_vm14, %v4097_v38  ;;  %vm1452_vm15 = vcmp.ge.s32.totalorder %v1440_v26, 0  ;;  %v1441_v18 = vadd.s32 2, %v4703_v9 }
 0x132   : > { %v1511_v20 = vsel %vm4726_vm2, %v1414_v19, 0.0  ;;  %2542 = vst.msk [vmem:[#allocation3 + $0x28] sm:$0x3] %vm1538_vm14, %v4097_v38 }
 0x133   : > { %1573 = vst.msk [vmem:[#allocation2 + $0x1] sm:$0xff] %vm1535_vm12, %v1511_v20  ;;  %v815_v51 = vpop.permute.xlu0 %814  ;;  %v817_v28 = vpop.permute.xlu2 %816 }
 0x134   : > { %v1281_v22 = vpop.f32.mrf.mxu0  ;;  %v844_v24 = vpop.permute.xlu1 %843  ;;  %v1055_v23 = vsel %vm6206_vm4, %v1030_v21, %v815_v51  ;;  %2545 = vst.msk [vmem:[#allocation3 + $0x40] sm:$0x3] %vm1538_vm14, %v4097_v38 }
 0x135   : > { %v1343_v25 = vadd.f32 %v4701_v52, %v1281_v22  ;;  %v1080_v29 = vsel %vm6207_vm5, %v1055_v23, %v844_v24  ;;  %2548 = vst.msk [vmem:[#allocation3 + $0x58] sm:$0x3] %vm1538_vm14, %v4097_v38 }
 0x136   : > { %v1105_v33 = vsel %vm1089_vm6, %v1080_v29, %v4683_v1  ;;  %2551 = vst.msk [vmem:[#allocation3 + $0x70] sm:$0x3] %vm1538_vm14, %v4097_v38 }
 0x137   : > { %vm1367_vm13 = vcmp.ge.f32.partialorder %v1343_v25, 0.0  ;;  %v1391_v43 = vmul.f32 0.1, %v1343_v25  ;;  %2554 = vst.msk [vmem:[#allocation3 + $0x88] sm:$0x3] %vm1538_vm14, %v4097_v38 }
 0x138   : > { %2557 = vst.msk [vmem:[#allocation3 + $0xa0] sm:$0x3] %vm1538_vm14, %v4097_v38 }
 0x139   : > { %v1415_v31 = vsel %vm1367_vm13, %v1343_v25, %v1391_v43  ;;  %vm1464_vm13 = vcmp.lt.s32.totalorder %v1440_v26, 16  ;;  %2560 = vst.msk [vmem:[#allocation3 + $0xb8] sm:$0x3] %vm1538_vm14, %v4097_v38 }
 0x13a   : > { %v1512_v35 = vsel %vm4726_vm2, %v1415_v31, 0.0  ;;  %v1597_v45 = vld [vmem:[#allocation2] sm:$0xff]  ;;  %2563 = vst.msk [vmem:[#allocation3 + $0xd0] sm:$0x3] %vm1538_vm14, %v4097_v38 }
 0x13b   : > { %v910_v32 = vpop.permute.xlu0 %909  ;;  %v4771_v37 = vpop.permute.xlu2 %911  ;;  %1574 = vst.msk [vmem:[#allocation2 + $0x9] sm:$0xff] %vm1535_vm12, %v1512_v35  ;;  %v1633_v53 = vpack.c.bf16 %v1597_v45, %v1597_v45 }
 0x13c   : > { %v939_v34 = vpop.permute.xlu1 %938  ;;  %v1130_v36 = vsel %vm1114_vm7, %v1105_v33, %v910_v32  ;;  %2566 = vst.msk [vmem:[#allocation3 + $0xe8] sm:$0x3] %vm1538_vm14, %v4097_v38 }
 0x13d   : > { %v1155_v40 = vsel %vm1139_vm8, %v1130_v36, %v939_v34  ;;  %v1695_v47 = vunpack.c.l.b16 %v1633_v53 }
 0x13e   : > { %v1180_v42 = vsel %vm1164_vm9, %v1155_v40, %v978_v15 }
 0x142   : > { %v1284_v41 = vpop.f32.mrf.mxu0  ;;  %v1598_v54 = vld [vmem:[#allocation2 + $0x8] sm:$0xff]  ;;  %v1599_v55 = vld [vmem:[#allocation2 + $0x10] sm:$0x3] }
 0x143   : > { %v1005_v44 = vpop.permute.xlu0 %1004  ;;  %v4793_v46 = vpop.permute.xlu2 %1006  ;;  %v1344_v50 = vadd.f32 %v4701_v52, %v1284_v41  ;;  %v1634_v56 = vpack.c.bf16 %v1598_v54, %v1598_v54  ;;  %v1635_v57 = vpack.c.bf16 %v1599_v55, %v1599_v55 }
 0x144   : > { %v756_v48 = vpop.permute.xlu1 %755  ;;  %v1205_v49 = vsel %vm1189_vm10, %v1180_v42, %v1005_v44 }
 0x145   : > { %3794 = vmatmul.msk.bf16.gmra.mxu0 %vm1241_vm11, %v1205_v49  ;;  %3840 = vmatmul.msk.bf16.gmra.mxu2 %vm1241_vm11, %v1205_v49  ;;  %v1032_v30 = vsel %vm1014_vm3, %v4419_v16, %v756_v48  ;;  %v1696_v59 = vunpack.c.l.b16 %v1634_v56  ;;  %v1735_v60 = vunpack.c.l.b16 %v1635_v57  ;;  %v1392_v63 = vmul.f32 0.1, %v1344_v50 }
 0x146   : > { %v1057_v58 = vsel %vm6206_vm4, %v1032_v30, %v817_v28  ;;  %vm1368_vm2 = vcmp.ge.f32.partialorder %v1344_v50, 0.0 }
 0x147   : > { %v4815_v0 = vpack.c.b16 %v1696_v59, %v1695_v47  ;;  %v1745_v2 = vpack.c.b16 %v1735_v60, %v1735_v60  ;;  %v1416_v12 = vsel %vm1368_vm2, %v1344_v50, %v1392_v63 }
 0x149   : > { %v1895_v10 = vrot.slane %v4815_v0, 1  ;;  %v1896_v8 = vrot.slane %v1745_v2, 1  ;;  %v1758_v11 = vshll.u32 %v4815_v0, 16  ;;  %v1763_v4 = vshll.u32 %v1745_v2, 16 }
 0x14a   : > { %v1286_v16 = vpop.f32.mrf.mxu0  ;;  %v1756_v19 = vshrl.u32 %v4815_v0, 16 }
 0x14b   : > { %v1345_v17 = vadd.f32 %v4701_v52, %v1286_v16  ;;  %v846_v61 = vpop.permute.xlu0 %845  ;;  %v4820_v6 = vpop.permute.xlu2 %847  ;;  %v1897_v14 = vsel %vm763_vm0, %v1895_v10, %v1896_v8  ;;  %v1760_v20 = vrot.slane %v1758_v11, 1  ;;  %v1765_v24 = vrot.slane %v1763_v4, 1 }
 0x14c   : > { %v885_v1 = vpop.permute.xlu1 %884  ;;  %v1082_v5 = vsel %vm6207_vm5, %v1057_v58, %v846_v61  ;;  %vm4831_vm5 = vmand %vm1452_vm15, %vm1464_vm13  ;;  %1925 = vrot.lane.b32.xlu1 %v1897_v14, %s6227_s14  ;;  %vm1465_vm15 = vcmp.lt.s32.totalorder %v1441_v18, 16  ;;  %vm6234_vm13 = vcmask 130048   ;;  %v1442_v8 = vadd.s32 3, %v4703_v9 }
 0x14d   : > { %v1393_v3 = vmul.f32 0.1, %v1345_v17  ;;  %vm1369_vm4 = vcmp.ge.f32.partialorder %v1345_v17, 0.0  ;;  %v1107_v15 = vsel %vm1089_vm6, %v1082_v5, %v885_v1  ;;  %v1513_v21 = vsel %vm4831_vm5, %v1416_v12, 0.0 }
 0x14e   : > { %v1132_v51 = vsel %vm1114_vm7, %v1107_v15, %v4771_v37  ;;  %v1761_v22 = vor.u32 %v1760_v20, %v1756_v19  ;;  %1575 = vst.msk [vmem:[#allocation2 + $0x19] sm:$0xff] %vm1535_vm12, %v1513_v21 }
 0x14f   : > { %v1417_v27 = vsel %vm1369_vm4, %v1345_v17, %v1393_v3  ;;  %vm1453_vm4 = vcmp.ge.s32.totalorder %v1441_v18, 0 }
 0x150   : > { %v1514_v28 = vsel %vm4831_vm5, %v1417_v27, 0.0  ;;  %v1766_v31 = vsel %vm594_vm1, %v1761_v22, %v1765_v24  ;;  %vm4865_vm14 = vmand %vm1453_vm4, %vm1465_vm15  ;;  %vm6235_vm4 = vcmask 195584   ;;  %vm1454_vm15 = vcmp.ge.s32.totalorder %v1442_v8, 0 }
 0x151   : > { %1875 = vrot.lane.b32.xlu0 %v1766_v31, %s6209_s25  ;;  %1576 = vst.msk [vmem:[#allocation2 + $0x21] sm:$0xff] %vm1535_vm12, %v1514_v28 }
 0x153   : > { %v941_v25 = vpop.permute.xlu0 %940  ;;  %v943_v35 = vpop.permute.xlu2 %942 }
 0x154   : > { %v1157_v23 = vsel %vm1139_vm8, %v1132_v51, %v941_v25  ;;  %v980_v43 = vpop.permute.xlu1 %979  ;;  %v1289_v29 = vpop.f32.mrf.mxu0 }
 0x155   : > { %v1182_v32 = vsel %vm1164_vm9, %v1157_v23, %v980_v43  ;;  %v1346_v33 = vadd.f32 %v4701_v52, %v1289_v29  ;;  %v1600_v49 = vld [vmem:[#allocation2 + $0x18] sm:$0xff] }
 0x156   : > { %v1207_v34 = vsel %vm1189_vm10, %v1182_v32, %v4793_v46  ;;  %v1636_v53 = vpack.c.bf16 %v1600_v49, %v1600_v49 }
 0x157   : > { %vm1370_vm5 = vcmp.ge.f32.partialorder %v1346_v33, 0.0  ;;  %v1394_v36 = vmul.f32 0.1, %v1346_v33  ;;  %3795 = vmatmul.msk.bf16.gmra.mxu0 %vm1241_vm11, %v1207_v34  ;;  %3841 = vmatmul.msk.bf16.gmra.mxu2 %vm1241_vm11, %v1207_v34 }
 0x158   : > { %v1601_v46 = vld [vmem:[#allocation2 + $0x20] sm:$0xff]  ;;  %v1602_v30 = vld [vmem:[#allocation2 + $0x28] sm:$0x3]  ;;  %v1697_v58 = vunpack.c.l.b16 %v1636_v53 }
 0x159   : > { %v1418_v37 = vsel %vm1370_vm5, %v1346_v33, %v1394_v36  ;;  %v1637_v55 = vpack.c.bf16 %v1601_v46, %v1601_v46  ;;  %v1638_v50 = vpack.c.bf16 %v1602_v30, %v1602_v30  ;;  %vm1466_vm5 = vcmp.lt.s32.totalorder %v1442_v8, 16 }
 0x15a   : > { %v1515_v40 = vsel %vm4865_vm14, %v1418_v37, 0.0 }
 0x15b   : > { %1577 = vst.msk [vmem:[#allocation2 + $0x31] sm:$0xff] %vm1535_vm12, %v1515_v40  ;;  %v758_v41 = vpop.permute.xlu0 %757  ;;  %v4878_v56 = vpop.permute.xlu2 %759  ;;  %v1698_v16 = vunpack.c.l.b16 %v1637_v55  ;;  %v1736_v47 = vunpack.c.l.b16 %v1638_v50 }
 0x15c   : > { %v819_v42 = vpop.permute.xlu1 %818  ;;  %v1291_v44 = vpop.f32.mrf.mxu0  ;;  %v1034_v45 = vsel %vm1014_vm3, %v4481_v7, %v758_v41 }
 0x15d   : > { %v1347_v48 = vadd.f32 %v4701_v52, %v1291_v44  ;;  %v1059_v26 = vsel %vm6234_vm13, %v1034_v45, %v819_v42  ;;  %v4883_v59 = vpack.c.b16 %v1698_v16, %v1697_v58  ;;  %v1746_v60 = vpack.c.b16 %v1736_v47, %v1736_v47 }
 0x15e   : > { %v1084_v61 = vsel %vm6235_vm4, %v1059_v26, %v4820_v6  ;;  %v1036_v45 = vsel %vm1014_vm3, %v4502_v39, %v4878_v56  ;;  %vm6238_vm4 = vcmask 130048  }
 0x15f   : > { %vm1371_vm2 = vcmp.ge.f32.partialorder %v1347_v48, 0.0  ;;  %v1395_v54 = vmul.f32 0.1, %v1347_v48  ;;  %1950 = vrot.lane.b32.xlu2 %v4883_v59, %s4099_s27  ;;  %v1898_v2 = vrot.slane %v4883_v59, 1  ;;  %v1899_v1 = vrot.slane %v1746_v60, 1 }
 0x160   : > { %v1770_v5 = vshll.u32 %v4883_v59, 16  ;;  %v1775_v10 = vshll.u32 %v1746_v60, 16  ;;  %v1768_v12 = vshrl.u32 %v4883_v59, 16 }
 0x161   : > { %v1419_v57 = vsel %vm1371_vm2, %v1347_v48, %v1395_v54  ;;  %v1900_v4 = vsel %vm763_vm0, %v1898_v2, %v1899_v1  ;;  %vm4906_vm2 = vmand %vm1454_vm15, %vm1466_vm5  ;;  %vm6239_vm15 = vcmask 195584  }
 0x162   : > { %v1516_v7 = vsel %vm4865_vm14, %v1419_v57, 0.0  ;;  %v1603_v11 = vld [vmem:[#allocation2 + $0x30] sm:$0xff]  ;;  %1927 = vrot.lane.b32.xlu0 %v1900_v4, %s6227_s14  ;;  %2008 = vrot.lane.b32.xlu1 %v1900_v4, %s4100_s29  ;;  %v1772_v13 = vrot.slane %v1770_v5, 1  ;;  %v1777_v18 = vrot.slane %v1775_v10, 1 }
 0x163   : > { %1578 = vst.msk [vmem:[#allocation2 + $0x39] sm:$0xff] %vm1535_vm12, %v1516_v7  ;;  %v887_v17 = vpop.permute.xlu0 %886  ;;  %v1639_v14 = vpack.c.bf16 %v1603_v11, %v1603_v11  ;;  %v889_v20 = vpop.permute.xlu2 %888 }
 0x164   : > { %v914_v63 = vpop.permute.xlu1 %913  ;;  %v1109_v3 = vsel %vm1089_vm6, %v1084_v61, %v887_v17  ;;  %v1773_v15 = vor.u32 %v1772_v13, %v1768_v12 }
 0x165   : > { %v1134_v6 = vsel %vm1114_vm7, %v1109_v3, %v914_v63  ;;  %v1699_v32 = vunpack.c.l.b16 %v1639_v14  ;;  %v1443_v3 = vadd.s32 4, %v4703_v9 }
 0x166   : > { %v1159_v21 = vsel %vm1139_vm8, %v1134_v6, %v943_v35  ;;  %v1778_v28 = vsel %vm594_vm1, %v1773_v15, %v1777_v18 }
 0x167   : > { %1877 = vrot.lane.b32.xlu2 %v1778_v28, %s6209_s25  ;;  %vm1455_vm5 = vcmp.ge.s32.totalorder %v1443_v3, 0 }
 0x16a   : > { %v1604_v27 = vld [vmem:[#allocation2 + $0x38] sm:$0xff]  ;;  %v1605_v19 = vld [vmem:[#allocation2 + $0x40] sm:$0x3]  ;;  %1985 = vrot.lane.b32.xlu0 %v1778_v28, %s6226_s13 }
 0x16b   : > { %v1294_v51 = vpop.f32.mrf.mxu0  ;;  %v982_v22 = vpop.permute.xlu0 %981  ;;  %v1640_v24 = vpack.c.bf16 %v1604_v27, %v1604_v27  ;;  %v1641_v25 = vpack.c.bf16 %v1605_v19, %v1605_v19 }
 0x16c   : > { %v1348_v23 = vadd.f32 %v4701_v52, %v1294_v51  ;;  %v1184_v43 = vsel %vm1164_vm9, %v1159_v21, %v982_v22  ;;  %v1009_v29 = vpop.permute.xlu1 %1008  ;;  %v984_v55 = vpop.permute.xlu2 %983 }
 0x16d   : > { %v1209_v31 = vsel %vm1189_vm10, %v1184_v43, %v1009_v29  ;;  %v1700_v33 = vunpack.c.l.b16 %v1640_v24  ;;  %v1737_v34 = vunpack.c.l.b16 %v1641_v25 }
 0x16e   : > { %vm1372_vm14 = vcmp.ge.f32.partialorder %v1348_v23, 0.0  ;;  %v1396_v35 = vmul.f32 0.1, %v1348_v23  ;;  %3796 = vmatmul.msk.bf16.gmra.mxu0 %vm1241_vm11, %v1209_v31  ;;  %3842 = vmatmul.msk.bf16.gmra.mxu2 %vm1241_vm11, %v1209_v31 }
 0x16f   : > { %v4912_v38 = vpack.c.b16 %v1700_v33, %v1699_v32  ;;  %v1747_v37 = vpack.c.b16 %v1737_v34, %v1737_v34 }
 0x170   : > { %v1420_v40 = vsel %vm1372_vm14, %v1348_v23, %v1396_v35  ;;  %vm1467_vm14 = vcmp.lt.s32.totalorder %v1443_v3, 16 }
 0x171   : > { %v1517_v41 = vsel %vm4906_vm2, %v1420_v40, 0.0  ;;  %1952 = vrot.lane.b32.xlu1 %v4912_v38, %s4099_s27  ;;  %v1901_v42 = vrot.slane %v4912_v38, 1  ;;  %v1902_v44 = vrot.slane %v1747_v37, 1  ;;  %v1782_v46 = vshll.u32 %v4912_v38, 16  ;;  %2033 = vrot.lane.b32.xlu2 %v4912_v38, %s4090_s22 }
 0x172   : > { %1579 = vst.msk [vmem:[#allocation2 + $0x49] sm:$0xff] %vm1535_vm12, %v1517_v41  ;;  %v1780_v16 = vshrl.u32 %v4912_v38, 16  ;;  %v1787_v47 = vshll.u32 %v1747_v37, 16 }
 0x173   : > { %v1296_v48 = vpop.f32.mrf.mxu0  ;;  %v821_v49 = vpop.permute.xlu0 %820  ;;  %v1903_v54 = vsel %vm763_vm0, %v1901_v42, %v1902_v44  ;;  %v1784_v57 = vrot.slane %v1782_v46, 1 }
 0x174   : > { %v1349_v53 = vadd.f32 %v4701_v52, %v1296_v48  ;;  %v850_v30 = vpop.permute.xlu1 %849  ;;  %v1061_v26 = vsel %vm6238_vm4, %v1036_v45, %v821_v49  ;;  %2010 = vrot.lane.b32.xlu0 %v1903_v54, %s4100_s29  ;;  %v1789_v2 = vrot.slane %v1787_v47, 1  ;;  %v823_v10 = vpop.permute.xlu2 %822 }
 0x175   : > { %v1086_v56 = vsel %vm6239_vm15, %v1061_v26, %v850_v30  ;;  %v1785_v60 = vor.u32 %v1784_v57, %v1780_v16 }
 0x176   : > { %vm1373_vm13 = vcmp.ge.f32.partialorder %v1349_v53, 0.0  ;;  %v1397_v50 = vmul.f32 0.1, %v1349_v53  ;;  %v1111_v17 = vsel %vm1089_vm6, %v1086_v56, %v889_v20 }
 0x177   : > { %v1790_v5 = vsel %vm594_vm1, %v1785_v60, %v1789_v2 }
 0x178   : > { %v1421_v58 = vsel %vm1373_vm13, %v1349_v53, %v1397_v50  ;;  %vm4950_vm13 = vmand %vm1455_vm5, %vm1467_vm14  ;;  %vm6242_vm5 = vcmask 195584   ;;  %v1444_v50 = vadd.s32 5, %v4703_v9 }
 0x179   : > { %v1518_v39 = vsel %vm4906_vm2, %v1421_v58, 0.0  ;;  %2091 = vrot.lane.b32.xlu1 %v1903_v54, %s4096_s15  ;;  %1929 = vrot.lane.b32.xlu2 %v1903_v54, %s6227_s14  ;;  %v1606_v1 = vld [vmem:[#allocation2 + $0x48] sm:$0xff] }
 0x17a   : > { %1580 = vst.msk [vmem:[#allocation2 + $0x51] sm:$0xff] %vm1535_vm12, %v1518_v39  ;;  %v1642_v11 = vpack.c.bf16 %v1606_v1, %v1606_v1  ;;  %vm1456_vm14 = vcmp.ge.s32.totalorder %v1444_v50, 0 }
 0x17b   : > { %v916_v7 = vpop.permute.xlu0 %915 }
 0x17c   : > { %v945_v61 = vpop.permute.xlu1 %944  ;;  %v1136_v63 = vsel %vm1114_vm7, %v1111_v17, %v916_v7  ;;  %2068 = vrot.lane.b32.xlu0 %v1790_v5, %s6211_s17  ;;  %v1701_v21 = vunpack.c.l.b16 %v1642_v11  ;;  %v918_v34 = vpop.permute.xlu2 %917 }
 0x17d   : > { %v1161_v8 = vsel %vm1139_vm8, %v1136_v63, %v945_v61 }
 0x17e   : > { %v1186_v15 = vsel %vm1164_vm9, %v1161_v8, %v984_v55 }
 0x181   : > { %1879 = vrot.lane.b32.xlu1 %v1790_v5, %s6209_s25  ;;  %v1607_v4 = vld [vmem:[#allocation2 + $0x50] sm:$0xff]  ;;  %v1608_v6 = vld [vmem:[#allocation2 + $0x58] sm:$0x3]  ;;  %1987 = vrot.lane.b32.xlu2 %v1790_v5, %s6226_s13 }
 0x182   : > { %v1299_v12 = vpop.f32.mrf.mxu0  ;;  %v1643_v13 = vpack.c.bf16 %v1607_v4, %v1607_v4  ;;  %v1644_v14 = vpack.c.bf16 %v1608_v6, %v1608_v6 }
 0x183   : > { %v1350_v18 = vadd.f32 %v4701_v52, %v1299_v12  ;;  %v1011_v27 = vpop.permute.xlu0 %1010 }
 0x184   : > { %v762_v19 = vpop.permute.xlu1 %761  ;;  %v1211_v20 = vsel %vm1189_vm10, %v1186_v15, %v1011_v27  ;;  %v1702_v51 = vunpack.c.l.b16 %v1643_v13  ;;  %v1738_v22 = vunpack.c.l.b16 %v1644_v14  ;;  %v1013_v39 = vpop.permute.xlu2 %1012 }
 0x185   : > { %vm1374_vm2 = vcmp.ge.f32.partialorder %v1350_v18, 0.0  ;;  %v1398_v24 = vmul.f32 0.1, %v1350_v18  ;;  %3797 = vmatmul.msk.bf16.gmra.mxu0 %vm1241_vm11, %v1211_v20  ;;  %v1038_v29 = vsel %vm1014_vm3, %v4540_v62, %v762_v19 }
 0x186   : > { %v4955_v28 = vpack.c.b16 %v1702_v51, %v1701_v21  ;;  %v1748_v23 = vpack.c.b16 %v1738_v22, %v1738_v22  ;;  %v1063_v36 = vsel %vm6238_vm4, %v1038_v29, %v823_v10 }
 0x187   : > { %v1422_v43 = vsel %vm1374_vm2, %v1350_v18, %v1398_v24  ;;  %vm1468_vm2 = vcmp.lt.s32.totalorder %v1444_v50, 16 }
 0x188   : > { %v1519_v31 = vsel %vm4950_vm13, %v1422_v43, 0.0  ;;  %1954 = vrot.lane.b32.xlu0 %v4955_v28, %s4099_s27  ;;  %v1904_v32 = vrot.slane %v4955_v28, 1  ;;  %v1905_v33 = vrot.slane %v1748_v23, 1  ;;  %v1794_v35 = vshll.u32 %v4955_v28, 16 }
 0x189   : > { %1581 = vst.msk [vmem:[#allocation2 + $0x61] sm:$0xff] %vm1535_vm12, %v1519_v31  ;;  %2035 = vrot.lane.b32.xlu1 %v4955_v28, %s4090_s22  ;;  %v1792_v49 = vshrl.u32 %v4955_v28, 16  ;;  %v1799_v46 = vshll.u32 %v1748_v23, 16 }
 0x18a   : > { %v1301_v62 = vpop.f32.mrf.mxu0  ;;  %v1906_v37 = vsel %vm763_vm0, %v1904_v32, %v1905_v33  ;;  %v1796_v44 = vrot.slane %v1794_v35, 1  ;;  %v1445_v35 = vadd.s32 6, %v4703_v9 }
 0x18b   : > { %v1351_v40 = vadd.f32 %v4701_v52, %v1301_v62  ;;  %v852_v41 = vpop.permute.xlu0 %851  ;;  %2012 = vrot.lane.b32.xlu2 %v1906_v37, %s4100_s29  ;;  %v1801_v26 = vrot.slane %v1799_v46, 1 }
 0x18c   : > { %v891_v42 = vpop.permute.xlu1 %890  ;;  %v1088_v48 = vsel %vm6242_vm5, %v1063_v36, %v852_v41  ;;  %v1797_v55 = vor.u32 %v1796_v44, %v1792_v49 }
 0x18d   : > { %vm1375_vm15 = vcmp.ge.f32.partialorder %v1351_v40, 0.0  ;;  %v1399_v45 = vmul.f32 0.1, %v1351_v40  ;;  %v1113_v54 = vsel %vm1089_vm6, %v1088_v48, %v891_v42 }
 0x18e   : > { %v1138_v57 = vsel %vm1114_vm7, %v1113_v54, %v918_v34  ;;  %v1802_v56 = vsel %vm594_vm1, %v1797_v55, %v1801_v26 }
 0x18f   : > { %v1423_v53 = vsel %vm1375_vm15, %v1351_v40, %v1399_v45 }
 0x190   : > { %v1520_v30 = vsel %vm4950_vm13, %v1423_v53, 0.0  ;;  %2093 = vrot.lane.b32.xlu0 %v1906_v37, %s4096_s15  ;;  %v1609_v60 = vld [vmem:[#allocation2 + $0x60] sm:$0xff]  ;;  %vm4988_vm13 = vmand %vm1456_vm14, %vm1468_vm2 }
 0x191   : > { %1582 = vst.msk [vmem:[#allocation2 + $0x69] sm:$0xff] %vm1535_vm12, %v1520_v30  ;;  %1931 = vrot.lane.b32.xlu1 %v1906_v37, %s6227_s14  ;;  %v1645_v3 = vpack.c.bf16 %v1609_v60, %v1609_v60 }
 0x193   : > { %v947_v58 = vpop.permute.xlu0 %946  ;;  %2070 = vrot.lane.b32.xlu2 %v1802_v56, %s6211_s17  ;;  %v1703_v12 = vunpack.c.l.b16 %v1645_v3 }
 0x194   : > { %v1163_v16 = vsel %vm1139_vm8, %v1138_v57, %v947_v58  ;;  %v986_v47 = vpop.permute.xlu1 %985  ;;  %v1304_v7 = vpop.f32.mrf.mxu0 }
 0x195   : > { %v1188_v17 = vsel %vm1164_vm9, %v1163_v16, %v986_v47  ;;  %v1352_v61 = vadd.f32 %v4701_v52, %v1304_v7  ;;  %vm1457_vm9 = vcmp.ge.s32.totalorder %v1445_v35, 0 }
 0x196   : > { %v1213_v63 = vsel %vm1189_vm10, %v1188_v17, %v1013_v39  ;;  %vm1469_vm10 = vcmp.lt.s32.totalorder %v1445_v35, 16 }
 0x197   : > { %vm1376_vm7 = vcmp.ge.f32.partialorder %v1352_v61, 0.0  ;;  %v1400_v2 = vmul.f32 0.1, %v1352_v61  ;;  %3798 = vmatmul.msk.bf16.gmra.mxu0 %vm1241_vm11, %v1213_v63  ;;  %vm5019_vm4 = vmand %vm1457_vm9, %vm1469_vm10 }
 0x198   : > { %1881 = vrot.lane.b32.xlu0 %v1802_v56, %s6209_s25  ;;  %v1610_v5 = vld [vmem:[#allocation2 + $0x68] sm:$0xff]  ;;  %v1611_v10 = vld [vmem:[#allocation2 + $0x70] sm:$0x3] }
 0x199   : > { %v1424_v8 = vsel %vm1376_vm7, %v1352_v61, %v1400_v2  ;;  %1989 = vrot.lane.b32.xlu1 %v1802_v56, %s6226_s13  ;;  %v1646_v11 = vpack.c.bf16 %v1610_v5, %v1610_v5  ;;  %v1647_v4 = vpack.c.bf16 %v1611_v10, %v1611_v10  ;;  %v1446_v10 = vadd.s32 7, %v4703_v9 }
 0x19a   : > { %v1521_v6 = vsel %vm4988_vm13, %v1424_v8, 0.0 }
 0x19b   : > { %1583 = vst.msk [vmem:[#allocation2 + $0x79] sm:$0xff] %vm1535_vm12, %v1521_v6  ;;  %v1704_v13 = vunpack.c.l.b16 %v1646_v11  ;;  %v1739_v14 = vunpack.c.l.b16 %v1647_v4  ;;  %vm1458_vm5 = vcmp.ge.s32.totalorder %v1446_v10, 0  ;;  %vm1470_vm14 = vcmp.lt.s32.totalorder %v1446_v10, 16 }
 0x19c   : > { %v1306_v15 = vpop.f32.mrf.mxu0  ;;  %vm5052_vm7 = vmand %vm1458_vm5, %vm1470_vm14  ;;  %vm2151_vm5 = vcmask 97280  }
 0x19d   : > { %v1353_v18 = vadd.f32 %v4701_v52, %v1306_v15  ;;  %v4999_v27 = vpack.c.b16 %v1704_v13, %v1703_v12  ;;  %v1749_v19 = vpack.c.b16 %v1739_v14, %v1739_v14 }
 0x19f   : > { %vm1377_vm8 = vcmp.ge.f32.partialorder %v1353_v18, 0.0  ;;  %v1401_v20 = vmul.f32 0.1, %v1353_v18  ;;  %1956 = vrot.lane.b32.xlu2 %v4999_v27, %s4099_s27  ;;  %v1907_v21 = vrot.slane %v4999_v27, 1  ;;  %v1908_v51 = vrot.slane %v1749_v19, 1 }
 0x1a0   : > { %2037 = vrot.lane.b32.xlu0 %v4999_v27, %s4090_s22  ;;  %v1806_v22 = vshll.u32 %v4999_v27, 16  ;;  %v1804_v29 = vshrl.u32 %v4999_v27, 16  ;;  %v1811_v31 = vshll.u32 %v1749_v19, 16 }
 0x1a1   : > { %v1425_v24 = vsel %vm1377_vm8, %v1353_v18, %v1401_v20  ;;  %v1909_v25 = vsel %vm763_vm0, %v1907_v21, %v1908_v51 }
 0x1a2   : > { %v1522_v23 = vsel %vm4988_vm13, %v1425_v24, 0.0  ;;  %2014 = vrot.lane.b32.xlu1 %v1909_v25, %s4100_s29  ;;  %v1808_v43 = vrot.slane %v1806_v22, 1  ;;  %v1612_v33 = vld [vmem:[#allocation2 + $0x78] sm:$0xff]  ;;  %v1813_v34 = vrot.slane %v1811_v31, 1  ;;  %vm2310_vm13 = vcmask 1041408  }
 0x1a3   : > { %1584 = vst.msk [vmem:[#allocation2 + $0x81] sm:$0xff] %vm1535_vm12, %v1522_v23  ;;  %v1648_v62 = vpack.c.bf16 %v1612_v33, %v1612_v33 }
 0x1a4   : > { %v1809_v32 = vor.u32 %v1808_v43, %v1804_v29  ;;  %v1673_v29 = vld [vmem:[%s6187_s7 + $0x10] sm:$0x3] }
 0x1a5   : > { %v1705_v48 = vunpack.c.l.b16 %v1648_v62 }
 0x1a6   : > { %v1814_v36 = vsel %vm594_vm1, %v1809_v32, %v1813_v34 }
 0x1a7   : > { %2095 = vrot.lane.b32.xlu2 %v1909_v25, %s4096_s15 }
 0x1a8   : > { %1933 = vrot.lane.b32.xlu0 %v1909_v25, %s6227_s14 }
 0x1aa   : > { %2072 = vrot.lane.b32.xlu1 %v1814_v36, %s6211_s17  ;;  %v1613_v37 = vld [vmem:[#allocation2 + $0x80] sm:$0xff]  ;;  %v1614_v40 = vld [vmem:[#allocation2 + $0x88] sm:$0x3] }
 0x1ab   : > { %v1309_v41 = vpop.f32.mrf.mxu0  ;;  %v1649_v42 = vpack.c.bf16 %v1613_v37, %v1613_v37  ;;  %v1650_v44 = vpack.c.bf16 %v1614_v40, %v1614_v40 }
 0x1ac   : > { %v1354_v45 = vadd.f32 %v4701_v52, %v1309_v41 }
 0x1ad   : > { %v1706_v49 = vunpack.c.l.b16 %v1649_v42  ;;  %v1740_v46 = vunpack.c.l.b16 %v1650_v44 }
 0x1ae   : > { %vm1378_vm11 = vcmp.ge.f32.partialorder %v1354_v45, 0.0  ;;  %v1402_v53 = vmul.f32 0.1, %v1354_v45 }
 0x1af   : > { %1883 = vrot.lane.b32.xlu2 %v1814_v36, %s6209_s25  ;;  %v5024_v54 = vpack.c.b16 %v1706_v49, %v1705_v48  ;;  %v1750_v55 = vpack.c.b16 %v1740_v46, %v1740_v46  ;;  %v3887_v49 = vld [vmem:[%s6187_s7 + $0x8] sm:$0xff] }
 0x1b0   : > { %v1426_v50 = vsel %vm1378_vm11, %v1354_v45, %v1402_v53  ;;  %1991 = vrot.lane.b32.xlu0 %v1814_v36, %s6226_s13  ;;  %v2283_v36 = vunpack.c.l.b16 %v1673_v29  ;;  %v1447_v53 = vadd.s32 8, %v4703_v9 }
 0x1b1   : > { %v1523_v26 = vsel %vm5019_vm4, %v1426_v50, 0.0  ;;  %v1910_v58 = vrot.slane %v5024_v54, 1  ;;  %v1911_v39 = vrot.slane %v1750_v55, 1  ;;  %v1818_v56 = vshll.u32 %v5024_v54, 16 }
 0x1b2   : > { %1585 = vst.msk [vmem:[#allocation2 + $0x91] sm:$0xff] %vm1535_vm12, %v1523_v26  ;;  %1958 = vrot.lane.b32.xlu1 %v5024_v54, %s4099_s27  ;;  %v1816_v63 = vshrl.u32 %v5024_v54, 16  ;;  %v1823_v2 = vshll.u32 %v1750_v55, 16  ;;  %v2286_v37 = vpack.c.b16 %v2283_v36, %v2283_v36  ;;  %vm1459_vm9 = vcmp.ge.s32.totalorder %v1447_v53, 0  ;;  %v3893_v36 = vld [vmem:[%s6185_s5 + $0x8] sm:$0xff] }
 0x1b3   : > { %v1311_v57 = vpop.f32.mrf.mxu0  ;;  %v1912_v7 = vsel %vm763_vm0, %v1910_v58, %v1911_v39  ;;  %v1820_v60 = vrot.slane %v1818_v56, 1  ;;  %v3886_v58 = vld [vmem:[%s6187_s7] sm:$0xff]  ;;  %vm1471_vm10 = vcmp.lt.s32.totalorder %v1447_v53, 16 }
 0x1b4   : > { %v1355_v16 = vadd.f32 %v4701_v52, %v1311_v57  ;;  %v1825_v3 = vrot.slane %v1823_v2, 1  ;;  %v2312_v44 = vsel %vm2310_vm13, %v2286_v37, 0 }
 0x1b5   : > { %v1821_v1 = vor.u32 %v1820_v60, %v1816_v63  ;;  %2319 = vmatpush.bf16.msra.mxu1 %v2312_v44 }
 0x1b6   : > { %vm1379_vm15 = vcmp.ge.f32.partialorder %v1355_v16, 0.0  ;;  %v1403_v47 = vmul.f32 0.1, %v1355_v16 }
 0x1b7   : > { %2039 = vrot.lane.b32.xlu2 %v5024_v54, %s4090_s22  ;;  %v1826_v11 = vsel %vm594_vm1, %v1821_v1, %v1825_v3 }
 0x1b8   : > { %v1427_v17 = vsel %vm1379_vm15, %v1355_v16, %v1403_v47  ;;  %2016 = vrot.lane.b32.xlu0 %v1912_v7, %s4100_s29 }
 0x1b9   : > { %v1524_v61 = vsel %vm5019_vm4, %v1427_v17, 0.0  ;;  %v1615_v5 = vld [vmem:[#allocation2 + $0x90] sm:$0xff]  ;;  %v5045_v8 = vpop.permute.xlu2 %1950  ;;  %2320 = vmatpush.bf16.msra.mxu1 %v3887_v49  ;;  %vm5100_vm4 = vmand %vm1459_vm9, %vm1471_vm10 }
 0x1ba   : > { %1586 = vst.msk [vmem:[#allocation2 + $0x99] sm:$0xff] %vm1535_vm12, %v1524_v61  ;;  %2097 = vrot.lane.b32.xlu1 %v1912_v7, %s4096_s15  ;;  %v1651_v4 = vpack.c.bf16 %v1615_v5, %v1615_v5 }
 0x1bc   : > { %v1707_v19 = vunpack.c.l.b16 %v1651_v4  ;;  %v2775_v4 = vld [vmem:[%s6185_s5 + $0x10] sm:$0x3] }
 0x1bd   : > { %2321 = vmatpush.bf16.msra.mxu1 %v3886_v58  ;;  %v1448_v58 = vadd.s32 9, %v4703_v9 }
 0x1be   : > { %v5091_v57 = vpop.permute.xlu1 %1925 }
 0x1bf   : > { %1935 = vrot.lane.b32.xlu2 %v1912_v7, %s6227_s14  ;;  %vm1460_vm14 = vcmp.ge.s32.totalorder %v1448_v58, 0 }
 0x1c0   : > { %2074 = vrot.lane.b32.xlu0 %v1826_v11, %s6211_s17 }
 0x1c1   : > { %v1616_v6 = vld [vmem:[#allocation2 + $0x98] sm:$0xff]  ;;  %v1617_v12 = vld [vmem:[#allocation2 + $0xa0] sm:$0x3]  ;;  %v5058_v23 = vpop.permute.xlu2 %1877 }
 0x1c2   : > { %1885 = vrot.lane.b32.xlu1 %v1826_v11, %s6209_s25  ;;  %v1314_v13 = vpop.f32.mrf.mxu0  ;;  %v1652_v14 = vpack.c.bf16 %v1616_v6, %v1616_v6  ;;  %v1653_v15 = vpack.c.bf16 %v1617_v12, %v1617_v12 }
 0x1c3   : > { %v1356_v18 = vadd.f32 %v4701_v52, %v1314_v13  ;;  %v5088_v50 = vpop.permute.xlu0 %1875 }
 0x1c4   : > { %v1708_v20 = vunpack.c.l.b16 %v1652_v14  ;;  %v1741_v21 = vunpack.c.l.b16 %v1653_v15  ;;  %v2786_v15 = vunpack.c.l.b16 %v2775_v4 }
 0x1c5   : > { %vm1380_vm2 = vcmp.ge.f32.partialorder %v1356_v18, 0.0  ;;  %v1404_v51 = vmul.f32 0.1, %v1356_v18 }
 0x1c6   : > { %v5056_v24 = vpack.c.b16 %v1708_v20, %v1707_v19  ;;  %v1751_v25 = vpack.c.b16 %v1741_v21, %v1741_v21  ;;  %v5120_v19 = vld [vmem:[%s6184_s4] ss:$0 sm:$0xff]  ;;  %v2789_v22 = vpack.c.b16 %v2786_v15, %v2786_v15 }
 0x1c7   : > { %v1428_v43 = vsel %vm1380_vm2, %v1356_v18, %v1404_v51  ;;  %1993 = vrot.lane.b32.xlu2 %v1826_v11, %s6226_s13  ;;  %vm1472_vm2 = vcmp.lt.s32.totalorder %v1448_v58, 16 }
 0x1c8   : > { %v1525_v31 = vsel %vm5052_vm7, %v1428_v43, 0.0  ;;  %1960 = vrot.lane.b32.xlu0 %v5056_v24, %s4099_s27  ;;  %v1913_v33 = vrot.slane %v5056_v24, 1  ;;  %v1914_v34 = vrot.slane %v1751_v25, 1  ;;  %v1830_v35 = vshll.u32 %v5056_v24, 16  ;;  %vm5166_vm10 = vmand %vm1460_vm14, %vm1472_vm2 }
 0x1c9   : > { %1587 = vst.msk [vmem:[#allocation2 + $0xa9] sm:$0xff] %vm1535_vm12, %v1525_v31  ;;  %v1828_v30 = vshrl.u32 %v5056_v24, 16  ;;  %v1835_v55 = vshll.u32 %v1751_v25, 16 }
 0x1ca   : > { %2041 = vrot.lane.b32.xlu1 %v5056_v24, %s4090_s22  ;;  %v1316_v32 = vpop.f32.mrf.mxu0  ;;  %v1915_v41 = vsel %vm763_vm0, %v1913_v33, %v1914_v34  ;;  %v1832_v42 = vrot.slane %v1830_v35, 1  ;;  %v2793_v33 = vsel %vm2310_vm13, %v2789_v22, 0 }
 0x1cb   : > { %v1357_v62 = vadd.f32 %v4701_v52, %v1316_v32  ;;  %v5076_v48 = vpop.permute.xlu2 %2033  ;;  %v1837_v56 = vrot.slane %v1835_v55, 1  ;;  %2800 = vmatpush.bf16.msrb.mxu2 %v2793_v33  ;;  %3897 = vmatpush.bf16.msra.mxu3 %v2793_v33 }
 0x1cc   : > { %v1833_v26 = vor.u32 %v1832_v42, %v1828_v30 }
 0x1cd   : > { %vm1381_vm8 = vcmp.ge.f32.partialorder %v1357_v62, 0.0  ;;  %v1405_v40 = vmul.f32 0.1, %v1357_v62 }
 0x1ce   : > { %v1838_v7 = vsel %vm594_vm1, %v1833_v26, %v1837_v56 }
 0x1cf   : > { %v1429_v45 = vsel %vm1381_vm8, %v1357_v62, %v1405_v40  ;;  %2018 = vrot.lane.b32.xlu2 %v1915_v41, %s4100_s29  ;;  %2801 = vmatpush.bf16.msrb.mxu2 %v3893_v36  ;;  %vm6251_vm8 = vcmask 130048  }
 0x1d0   : > { %v1526_v46 = vsel %vm5052_vm7, %v1429_v45, 0.0  ;;  %2099 = vrot.lane.b32.xlu0 %v1915_v41, %s4096_s15  ;;  %v1618_v16 = vld [vmem:[#allocation2 + $0xa8] sm:$0xff]  ;;  %v2112_v45 = vsel %vm1535_vm12, %v4815_v0, %v5088_v50  ;;  %3898 = vmatpush.bf16.msra.mxu3 %v3893_v36  ;;  %vm2192_vm7 = vcmask 162816   ;;  %vm6256_vm2 = vmmov %vm6251_vm8 }
 0x1d1   : > { %1588 = vst.msk [vmem:[#allocation2 + $0xb1] sm:$0xff] %vm1535_vm12, %v1526_v46  ;;  %v1654_v63 = vpack.c.bf16 %v1618_v16, %v1618_v16  ;;  %v3892_v46 = vld [vmem:[%s6185_s5] sm:$0xff]  ;;  %v2132_v30 = vsel %vm1014_vm3, %v2112_v45, %v5091_v57 }
 0x1d2   : > { %1937 = vrot.lane.b32.xlu1 %v1915_v41, %s6227_s14 }
 0x1d3   : > { %v5098_v60 = vpop.permute.xlu2 %1929  ;;  %v1709_v12 = vunpack.c.l.b16 %v1654_v63  ;;  %2802 = vmatpush.bf16.msrb.mxu2 %v3892_v46 }
 0x1d4   : > { %v1319_v39 = vpop.f32.mrf.mxu0  ;;  %v5108_v11 = vpop.permute.xlu0 %1927  ;;  %3899 = vmatpush.bf16.msra.mxu3 %v3892_v46 }
 0x1d5   : > { %v1358_v47 = vadd.f32 %v4701_v52, %v1319_v39  ;;  %v5114_v6 = vpop.permute.xlu1 %2008  ;;  %v2153_v39 = vsel %vm2151_vm5, %v2132_v30, %v5045_v8 }
 0x1d7   : > { %vm1382_vm11 = vcmp.ge.f32.partialorder %v1358_v47, 0.0  ;;  %v1406_v17 = vmul.f32 0.1, %v1358_v47  ;;  %2076 = vrot.lane.b32.xlu2 %v1838_v7, %s6211_s17 }
 0x1d8   : > { %1887 = vrot.lane.b32.xlu0 %v1838_v7, %s6209_s25  ;;  %v1619_v2 = vld [vmem:[#allocation2 + $0xb0] sm:$0xff]  ;;  %v1620_v1 = vld [vmem:[#allocation2 + $0xb8] sm:$0x3]  ;;  %s6271_s25 = sshll.u32 %s4071_s20, 3 }
 0x1d9   : > { %v1430_v3 = vsel %vm1382_vm11, %v1358_v47, %v1406_v17  ;;  %v1655_v52 = vpack.c.bf16 %v1619_v2, %v1619_v2  ;;  %v1656_v5 = vpack.c.bf16 %v1620_v1, %v1620_v1  ;;  %vm2233_vm11 = vcmask 228352   ;;  %s3818_s12 = sadd.s32 4294967295, %s6271_s25 }
 0x1da   : > { %v1527_v10 = vsel %vm5100_vm4, %v1430_v3, 0.0  ;;  %1995 = vrot.lane.b32.xlu1 %v1838_v7, %s6226_s13 }
 0x1db   : > { %1589 = vst.msk [vmem:[#allocation2 + $0xc1] sm:$0xff] %vm1535_vm12, %v1527_v10  ;;  %v1710_v13 = vunpack.c.l.b16 %v1655_v52  ;;  %v1742_v14 = vunpack.c.l.b16 %v1656_v5  ;;  %v5125_v25 = vpop.permute.xlu2 %1987 }
 0x1dc   : > { %v1321_v18 = vpop.f32.mrf.mxu0  ;;  %v1986_v37 = vpop.permute.xlu0 %1985 }
 0x1dd   : > { %v1359_v20 = vadd.f32 %v5120_v19, %v1321_v18  ;;  %v5123_v21 = vpack.c.b16 %v1710_v13, %v1709_v12  ;;  %v1752_v51 = vpack.c.b16 %v1742_v14, %v1742_v14  ;;  %v2173_v63 = vsel %vm6251_vm8, %v2153_v39, %v1986_v37 }
 0x1de   : > { %v2194_v10 = vsel %vm2192_vm7, %v2173_v63, %v5114_v6 }
 0x1df   : > { %vm1383_vm15 = vcmp.ge.f32.partialorder %v1359_v20, 0.0  ;;  %v1407_v43 = vmul.f32 0.1, %v1359_v20  ;;  %1962 = vrot.lane.b32.xlu2 %v5123_v21, %s4099_s27  ;;  %v1916_v29 = vrot.slane %v5123_v21, 1  ;;  %v1917_v31 = vrot.slane %v1752_v51, 1 }
 0x1e0   : > { %2043 = vrot.lane.b32.xlu0 %v5123_v21, %s4090_s22  ;;  %v1842_v32 = vshll.u32 %v5123_v21, 16  ;;  %v1840_v42 = vshrl.u32 %v5123_v21, 16  ;;  %v1847_v44 = vshll.u32 %v1752_v51, 16 }
 0x1e1   : > { %v1431_v34 = vsel %vm1383_vm15, %v1359_v20, %v1407_v43  ;;  %v1918_v35 = vsel %vm763_vm0, %v1916_v29, %v1917_v31  ;;  %vm2289_vm15 = vcmask 293888  }
 0x1e2   : > { %v1528_v62 = vsel %vm5100_vm4, %v1431_v34, 0.0  ;;  %2020 = vrot.lane.b32.xlu1 %v1918_v35, %s4100_s29  ;;  %v1844_v40 = vrot.slane %v1842_v32, 1  ;;  %v1621_v53 = vld [vmem:[#allocation2 + $0xc0] sm:$0xff]  ;;  %v1849_v26 = vrot.slane %v1847_v44, 1  ;;  %vm6255_vm4 = vcmask 195584  }
 0x1e3   : > { %1590 = vst.msk [vmem:[#allocation2 + $0xc9] sm:$0xff] %vm1535_vm12, %v1528_v62  ;;  %v5142_v41 = vpop.permute.xlu1 %1952  ;;  %v1657_v50 = vpack.c.bf16 %v1621_v53, %v1621_v53  ;;  %v2214_v18 = vsel %vm6255_vm4, %v2194_v10, %v5076_v48  ;;  %v2114_v48 = vsel %vm1535_vm12, %v4883_v59, %v5058_v23  ;;  %v1449_v53 = vadd.s32 10, %v4703_v9  ;;  %vm6257_vm8 = vmmov %vm6255_vm4 }
 0x1e4   : > { %v1845_v49 = vor.u32 %v1844_v40, %v1840_v42 }
 0x1e5   : > { %v5153_v55 = vpop.permute.xlu2 %2012  ;;  %v1711_v1 = vunpack.c.l.b16 %v1657_v50 }
 0x1e6   : > { %v1850_v0 = vsel %vm594_vm1, %v1845_v49, %v1849_v26  ;;  %v5161_v56 = vpop.permute.xlu0 %2010 }
 0x1e7   : > { %2101 = vrot.lane.b32.xlu2 %v1918_v35, %s4096_s15 }
 0x1e8   : > { %1939 = vrot.lane.b32.xlu0 %v1918_v35, %s6227_s14  ;;  %v2134_v35 = vsel %vm1014_vm3, %v2114_v48, %v5108_v11 }
 0x1e9   : > { %v2155_v37 = vsel %vm2151_vm5, %v2134_v35, %v5142_v41 }
 0x1ea   : > { %2078 = vrot.lane.b32.xlu1 %v1850_v0, %s6211_s17  ;;  %v1622_v57 = vld [vmem:[#allocation2 + $0xc8] sm:$0xff]  ;;  %v1623_v16 = vld [vmem:[#allocation2 + $0xd0] sm:$0x3]  ;;  %v2175_v41 = vsel %vm6256_vm2, %v2155_v37, %v5125_v25 }
 0x1eb   : > { %v2092_v47 = vpop.permute.xlu1 %2091  ;;  %v1324_v7 = vpop.f32.mrf.mxu0  ;;  %v1658_v17 = vpack.c.bf16 %v1622_v57, %v1622_v57  ;;  %v1659_v61 = vpack.c.bf16 %v1623_v16, %v1623_v16  ;;  %v2196_v26 = vsel %vm2192_vm7, %v2175_v41, %v5161_v56 }
 0x1ec   : > { %v1360_v2 = vadd.f32 %v5120_v19, %v1324_v7 }
 0x1ed   : > { %v1712_v3 = vunpack.c.l.b16 %v1658_v17  ;;  %v1743_v8 = vunpack.c.l.b16 %v1659_v61  ;;  %v2071_v15 = vpop.permute.xlu2 %2070 }
 0x1ee   : > { %vm1384_vm9 = vcmp.ge.f32.partialorder %v1360_v2, 0.0  ;;  %v1408_v52 = vmul.f32 0.1, %v1360_v2  ;;  %v2069_v20 = vpop.permute.xlu0 %2068 }
 0x1ef   : > { %1889 = vrot.lane.b32.xlu2 %v1850_v0, %s6254_s24  ;;  %v5173_v4 = vpack.c.b16 %v1712_v3, %v1711_v1  ;;  %v1753_v12 = vpack.c.b16 %v1743_v8, %v1743_v8  ;;  %v2235_v6 = vsel %vm2233_vm11, %v2214_v18, %v2069_v20 }
 0x1f0   : > { %v1432_v13 = vsel %vm1384_vm9, %v1360_v2, %v1408_v52  ;;  %1997 = vrot.lane.b32.xlu0 %v1850_v0, %s6226_s13  ;;  %v2255_v32 = vsel %vm1089_vm6, %v2235_v6, %v2092_v47  ;;  %vm1461_vm9 = vcmp.ge.s32.totalorder %v1449_v53, 0 }
 0x1f1   : > { %v1529_v14 = vsel %vm5166_vm10, %v1432_v13, 0.0  ;;  %v1919_v43 = vrot.slane %v5173_v4, 1  ;;  %v1920_v29 = vrot.slane %v1753_v12, 1  ;;  %v1854_v31 = vshll.u32 %v5173_v4, 16  ;;  %3808 = vmatmul.msk.bf16.vlgmr.msra.gmra.mxu1 %vm2289_vm15, %v2255_v32 }
 0x1f2   : > { %1591 = vst.msk [vmem:[#allocation2 + $0xd9] sm:$0xff] %vm1535_vm12, %v1529_v14  ;;  %1964 = vrot.lane.b32.xlu1 %v5173_v4, %s4099_s27  ;;  %v1852_v42 = vshrl.u32 %v5173_v4, 16  ;;  %v1859_v11 = vshll.u32 %v1753_v12, 16 }
 0x1f3   : > { %v5184_v51 = vpop.permute.xlu1 %1879  ;;  %v1326_v22 = vpop.f32.mrf.mxu0  ;;  %v1921_v36 = vsel %vm763_vm0, %v1919_v43, %v1920_v29  ;;  %v1856_v62 = vrot.slane %v1854_v31, 1 }
 0x1f4   : > { %v1361_v33 = vadd.f32 %v5120_v19, %v1326_v22  ;;  %v1861_v46 = vrot.slane %v1859_v11, 1  ;;  %v2116_v41 = vsel %vm1535_vm12, %v4912_v38, %v5184_v51 }
 0x1f5   : > { %v1857_v49 = vor.u32 %v1856_v62, %v1852_v42  ;;  %v1450_v42 = vadd.s32 11, %v4703_v9 }
 0x1f6   : > { %vm1385_vm14 = vcmp.ge.f32.partialorder %v1361_v33, 0.0  ;;  %v1409_v34 = vmul.f32 0.1, %v1361_v33 }
 0x1f7   : > { %2045 = vrot.lane.b32.xlu2 %v5173_v4, %s4090_s22  ;;  %v1862_v0 = vsel %vm594_vm1, %v1857_v49, %v1861_v46 }
 0x1f8   : > { %v1433_v40 = vsel %vm1385_vm14, %v1361_v33, %v1409_v34  ;;  %2022 = vrot.lane.b32.xlu0 %v1921_v36, %s4100_s29 }
 0x1f9   : > { %v1530_v59 = vsel %vm5166_vm10, %v1433_v40, 0.0  ;;  %v5204_v23 = vpop.permute.xlu2 %1956  ;;  %v1624_v30 = vld [vmem:[#allocation2 + $0xd8] sm:$0xff]  ;;  %vm1473_vm10 = vcmp.lt.s32.totalorder %v1449_v53, 16 }
 0x1fa   : > { %1592 = vst.msk [vmem:[#allocation2 + $0xe1] sm:$0xff] %vm1535_vm12, %v1530_v59  ;;  %2103 = vrot.lane.b32.xlu1 %v1921_v36, %s4096_s15  ;;  %v5209_v44 = vpop.permute.xlu0 %1954  ;;  %v1660_v50 = vpack.c.bf16 %v1624_v30, %v1624_v30  ;;  %vm5230_vm14 = vmand %vm1461_vm9, %vm1473_vm10  ;;  %vm1474_vm9 = vcmp.lt.s32.totalorder %v1450_v42, 16  ;;  %v2136_v30 = vsel %vm1014_vm3, %v2116_v41, %v5098_v60 }
 0x1fb   : > { %v2036_v45 = vpop.permute.xlu1 %2035 }
 0x1fc   : > { %v2216_v58 = vsel %vm6257_vm8, %v2196_v26, %v2036_v45  ;;  %v1713_v1 = vunpack.c.l.b16 %v1660_v50  ;;  %vm1462_vm8 = vcmp.ge.s32.totalorder %v1450_v42, 0  ;;  %v2157_v26 = vsel %vm2151_vm5, %v2136_v30, %v5209_v44 }
 0x1fd   : > { %v2237_v56 = vsel %vm2233_vm11, %v2216_v58, %v2071_v15 }
 0x1ff   : > { %1941 = vrot.lane.b32.xlu2 %v1921_v36, %s6227_s14 }
 0x200   : > { %2080 = vrot.lane.b32.xlu0 %v1862_v0, %s6211_s17 }
 0x201   : > { %v5220_v39 = vpop.permute.xlu2 %2095  ;;  %v1625_v25 = vld [vmem:[#allocation2 + $0xe0] sm:$0xff]  ;;  %v1626_v57 = vld [vmem:[#allocation2 + $0xe8] sm:$0x3] }
 0x202   : > { %1891 = vrot.lane.b32.xlu1 %v1862_v0, %s6254_s24  ;;  %v1329_v16 = vpop.f32.mrf.mxu0  ;;  %v2094_v47 = vpop.permute.xlu0 %2093  ;;  %v1661_v7 = vpack.c.bf16 %v1625_v25, %v1625_v25  ;;  %v1662_v17 = vpack.c.bf16 %v1626_v57, %v1626_v57 }
 0x203   : > { %v1362_v61 = vadd.f32 %v5120_v19, %v1329_v16  ;;  %v5225_v63 = vpop.permute.xlu1 %1931  ;;  %v2257_v2 = vsel %vm1089_vm6, %v2237_v56, %v2094_v47 }
 0x204   : > { %3851 = vmatmul.msk.bf16.vlgmr.msrb.gmra.mxu2 %vm2289_vm15, %v2257_v2  ;;  %v1714_v3 = vunpack.c.l.b16 %v1661_v7  ;;  %v1744_v8 = vunpack.c.l.b16 %v1662_v17  ;;  %3809 = vmatmul.msk.bf16.gmra.mxu1 %vm2289_vm15, %v2257_v2 }
 0x205   : > { %vm1386_vm4 = vcmp.ge.f32.partialorder %v1362_v61, 0.0  ;;  %v1410_v52 = vmul.f32 0.1, %v1362_v61 }
 0x206   : > { %v5235_v10 = vpack.c.b16 %v1714_v3, %v1713_v1  ;;  %v1754_v12 = vpack.c.b16 %v1744_v8, %v1744_v8 }
 0x207   : > { %v1434_v13 = vsel %vm1386_vm4, %v1362_v61, %v1410_v52  ;;  %1999 = vrot.lane.b32.xlu2 %v1862_v0, %s6226_s13  ;;  %vm5281_vm4 = vmand %vm1462_vm8, %vm1474_vm9 }
 0x208   : > { %v1531_v14 = vsel %vm5230_vm14, %v1434_v13, 0.0  ;;  %1966 = vrot.lane.b32.xlu0 %v5235_v10, %s4099_s27  ;;  %v1866_v15 = vshll.u32 %v5235_v10, 16  ;;  %v1871_v18 = vshll.u32 %v1754_v12, 16  ;;  %v1864_v43 = vshrl.u32 %v5235_v10, 16 }
 0x209   : > { %1593 = vst.msk [vmem:[#allocation2 + $0xf1] sm:$0xff] %vm1535_vm12, %v1531_v14  ;;  %v5244_v20 = vpop.permute.xlu2 %1883  ;;  %v1922_v33 = vrot.slane %v5235_v10, 1  ;;  %v1923_v48 = vrot.slane %v1754_v12, 1 }
 0x20a   : > { %2047 = vrot.lane.b32.xlu1 %v5235_v10, %s4090_s22  ;;  %v1331_v6 = vpop.f32.mrf.mxu0  ;;  %v5248_v22 = vpop.permute.xlu0 %1881  ;;  %v1868_v29 = vrot.slane %v1866_v15, 1  ;;  %v1873_v35 = vrot.slane %v1871_v18, 1 }
 0x20b   : > { %v1363_v31 = vadd.f32 %v5120_v19, %v1331_v6  ;;  %v1990_v32 = vpop.permute.xlu1 %1989  ;;  %v5259_v40 = vsel %vm763_vm0, %v1922_v33, %v1923_v48 }
 0x20c   : > { %v1869_v34 = vor.u32 %v1868_v29, %v1864_v43 }
 0x20d   : > { %vm1387_vm2 = vcmp.ge.f32.partialorder %v1363_v31, 0.0  ;;  %v1411_v36 = vmul.f32 0.1, %v1363_v31 }
 0x20e   : > { %v5254_v62 = vsel %vm594_vm1, %v1869_v34, %v1873_v35 }
 0x20f   : > { %v1435_v37 = vsel %vm1387_vm2, %v1363_v31, %v1411_v36  ;;  %2082 = vrot.lane.b32.xlu2 %v5254_v62, %s6211_s17  ;;  %vm6263_vm2 = vcmask 195584   ;;  %v2118_v36 = vsel %vm1535_vm12, %v4955_v28, %v5248_v22 }
 0x210   : > { %v1532_v59 = vsel %vm5230_vm14, %v1435_v37, 0.0  ;;  %2105 = vrot.lane.b32.xlu0 %v5259_v40, %s4096_s15  ;;  %v1627_v53 = vld [vmem:[#allocation2 + $0xf0] sm:$0xff]  ;;  %vm6262_vm14 = vcmask 130048  }
 0x211   : > { %1594 = vst.msk [vmem:[#allocation2 + $0xf9] sm:$0xff] %vm1535_vm12, %v1532_v59  ;;  %v5272_v45 = vpop.permute.xlu2 %2039  ;;  %v1663_v51 = vpack.c.bf16 %v1627_v53, %v1627_v53  ;;  %v2177_v0 = vsel %vm6262_vm14, %v2157_v26, %v1990_v32  ;;  %vm6264_vm9 = vmmov %vm6262_vm14 }
 0x212   : > { %2001 = vrot.lane.b32.xlu1 %v5254_v62, %s6226_s13  ;;  %v2038_v11 = vpop.permute.xlu0 %2037  ;;  %v2198_v56 = vsel %vm2192_vm7, %v2177_v0, %v5153_v55  ;;  %vm6267_vm14 = vmmov %vm6263_vm2 }
 0x213   : > { %v1947_v7 = vunpack.c.l.b16 %v1663_v51  ;;  %v2218_v2 = vsel %vm6263_vm2, %v2198_v56, %v2038_v11  ;;  %v2138_v11 = vsel %vm1014_vm3, %v2118_v36, %v5225_v63 }
 0x214   : > { %v5274_v49 = vpop.permute.xlu1 %2014  ;;  %v1334_v46 = vpop.f32.mrf.mxu0  ;;  %v2159_v28 = vsel %vm2151_vm5, %v2138_v11, %v5204_v23 }
 0x215   : > { %v1364_v9 = vadd.f32 %v5120_v19, %v1334_v46 }
 0x217   : > { %vm1388_vm10 = vcmp.ge.f32.partialorder %v1364_v9, 0.0  ;;  %v1412_v58 = vmul.f32 0.1, %v1364_v9  ;;  %2024 = vrot.lane.b32.xlu2 %v5259_v40, %s4100_s29 }
 0x218   : > { %v1628_v50 = vld [vmem:[#allocation2 + $0xf8] sm:$0xff]  ;;  %v1629_v25 = vld [vmem:[#allocation2 + $0x100] sm:$0x3] }
 0x219   : > { %v1436_v57 = vsel %vm1388_vm10, %v1364_v9, %v1412_v58  ;;  %v1664_v16 = vpack.c.bf16 %v1628_v50, %v1628_v50  ;;  %v1665_v60 = vpack.c.bf16 %v1629_v25, %v1629_v25  ;;  %v5296_v8 = vpop.permute.xlu2 %1935  ;;  %vm6265_vm10 = vmmov %vm6263_vm2 }
 0x21a   : > { %v1533_v44 = vsel %vm5281_vm4, %v1436_v57, 0.0  ;;  %v5290_v47 = vpop.permute.xlu0 %1933 }
 0x21b   : > { %1595 = vst.msk [vmem:[#allocation2 + $0x109] sm:$0xff] %vm1535_vm12, %v1533_v44  ;;  %v1948_v17 = vunpack.c.l.b16 %v1664_v16  ;;  %v1971_v61 = vunpack.c.l.b16 %v1665_v60 }
 0x21c   : > { %v2073_v1 = vpop.permute.xlu1 %2072  ;;  %v1336_v3 = vpop.f32.mrf.mxu0 }
 0x21d   : > { %v2239_v52 = vsel %vm2233_vm11, %v2218_v2, %v2073_v1  ;;  %v1365_v5 = vadd.f32 %v5120_v19, %v1336_v3  ;;  %v1949_v12 = vpack.c.b16 %v1948_v17, %v1947_v7  ;;  %v1972_v13 = vpack.c.b16 %v1971_v61, %v1971_v61 }
 0x21e   : > { %v2259_v55 = vsel %vm1089_vm6, %v2239_v52, %v5220_v39 }
 0x21f   : > { %vm1389_vm8 = vcmp.ge.f32.partialorder %v1365_v5, 0.0  ;;  %v1413_v14 = vmul.f32 0.1, %v1365_v5  ;;  %2049 = vrot.lane.b32.xlu0 %v1949_v12, %s4090_s22  ;;  %3810 = vmatmul.msk.bf16.gmra.mxu1 %vm2289_vm15, %v2259_v55  ;;  %v2005_v15 = vrot.slane %v1949_v12, 1  ;;  %v2006_v18 = vrot.slane %v1972_v13, 1 }
 0x220   : > { %3852 = vmatmul.msk.bf16.gmra.mxu2 %vm2289_vm15, %v2259_v55  ;;  %v1976_v6 = vshll.u32 %v1949_v12, 16  ;;  %v1981_v43 = vshll.u32 %v1972_v13, 16  ;;  %v1974_v32 = vshrl.u32 %v1949_v12, 16 }
 0x221   : > { %v1437_v29 = vsel %vm1389_vm8, %v1365_v5, %v1413_v14  ;;  %v2007_v19 = vsel %vm763_vm0, %v2005_v15, %v2006_v18  ;;  %v1994_v42 = vpop.permute.xlu2 %1993  ;;  %vm6269_vm8 = vmmov %vm6265_vm10 }
 0x222   : > { %v1534_v31 = vsel %vm5281_vm4, %v1437_v29, 0.0  ;;  %2107 = vrot.lane.b32.xlu2 %v2007_v19, %s4096_s15  ;;  %v1992_v39 = vpop.permute.xlu0 %1991  ;;  %v1978_v33 = vrot.slane %v1976_v6, 1  ;;  %v1983_v35 = vrot.slane %v1981_v43, 1  ;;  %v1630_v59 = vld [vmem:[#allocation2 + $0x108] sm:$0xff]  ;;  %vm6266_vm4 = vmmov %vm6264_vm9 }
 0x223   : > { %1596 = vst.msk [vmem:[#allocation2 + $0x111] sm:$0xff] %vm1535_vm12, %v1534_v31  ;;  %v1666_v41 = vpack.c.bf16 %v1630_v59, %v1630_v59  ;;  %v2179_v26 = vsel %vm6264_vm9, %v2159_v28, %v1992_v39  ;;  %vm6268_vm2 = vmmov %vm6266_vm4 }
 0x224   : > { %v1959_v48 = vpop.permute.xlu1 %1958  ;;  %v1979_v34 = vor.u32 %v1978_v33, %v1974_v32  ;;  %v2200_v63 = vsel %vm2192_vm7, %v2179_v26, %v5274_v49  ;;  %vm6270_vm9 = vmmov %vm6268_vm2 }
 0x225   : > { %v2030_v38 = vunpack.c.l.b16 %v1666_v41  ;;  %v2220_v16 = vsel %vm6265_vm10, %v2200_v63, %v5272_v45  ;;  %v2120_v45 = vsel %vm1535_vm12, %v4999_v27, %v5244_v20  ;;  %v5378_v63 = vld [vmem:[%s6188_s8] ss:$0 sm:$0xff] }
 0x226   : > { %v1984_v37 = vsel %vm594_vm1, %v1979_v34, %v1983_v35  ;;  %v2140_v1 = vsel %vm1014_vm3, %v2120_v45, %v5290_v47 }
 0x227   : > { %2084 = vrot.lane.b32.xlu1 %v1984_v37, %s6211_s17  ;;  %1893 = vrot.lane.b32.xlu0 %v5254_v62, %s6254_s24  ;;  %v2161_v3 = vsel %vm2151_vm5, %v2140_v1, %v1959_v48 }
 0x228   : > { %v2181_v14 = vsel %vm6266_vm4, %v2161_v3, %v1994_v42 }
 0x229   : > { %v2019_v25 = vpop.permute.xlu2 %2018 }
 0x22a   : > { %1968 = vrot.lane.b32.xlu2 %v1949_v12, %s4099_s27  ;;  %v2017_v46 = vpop.permute.xlu0 %2016  ;;  %v1631_v53 = vld [vmem:[#allocation2 + $0x110] sm:$0xff]  ;;  %v1632_v9 = vld [vmem:[#allocation2 + $0x118] sm:$0x3] }
 0x22b   : > { %v1667_v22 = vpack.c.bf16 %v1631_v53, %v1631_v53  ;;  %v1668_v30 = vpack.c.bf16 %v1632_v9, %v1632_v9  ;;  %v2202_v15 = vsel %vm2192_vm7, %v2181_v14, %v2017_v46 }
 0x22c   : > { %v2098_v58 = vpop.permute.xlu1 %2097 }
 0x22d   : > { %v2031_v51 = vunpack.c.l.b16 %v1667_v22  ;;  %v2054_v62 = vunpack.c.l.b16 %v1668_v30 }
 0x22f   : > { %1943 = vrot.lane.b32.xlu1 %v5259_v40, %s6227_s14  ;;  %2003 = vrot.lane.b32.xlu0 %v1984_v37, %s6226_s13  ;;  %v2032_v0 = vpack.c.b16 %v2031_v51, %v2030_v38  ;;  %v2055_v50 = vpack.c.b16 %v2054_v62, %v2054_v62 }
 0x231   : > { %v2059_v23 = vshll.u32 %v2032_v0, 16  ;;  %v2064_v57 = vshll.u32 %v2055_v50, 16  ;;  %v2057_v56 = vshrl.u32 %v2032_v0, 16  ;;  %v2088_v5 = vrot.slane %v2032_v0, 1  ;;  %v2077_v13 = vpop.permute.xlu2 %2076 }
 0x232   : > { %2051 = vrot.lane.b32.xlu2 %v2032_v0, %s4090_s22  ;;  %v2075_v60 = vpop.permute.xlu0 %2074  ;;  %v2089_v12 = vrot.slane %v2055_v50, 1 }
 0x233   : > { %v2241_v44 = vsel %vm2233_vm11, %v2220_v16, %v2075_v60  ;;  %v2061_v49 = vrot.slane %v2059_v23, 1  ;;  %v2066_v61 = vrot.slane %v2064_v57, 1 }
 0x234   : > { %v1886_v7 = vpop.permute.xlu1 %1885  ;;  %v2261_v40 = vsel %vm1089_vm6, %v2241_v44, %v2098_v58  ;;  %v2090_v18 = vsel %vm763_vm0, %v2088_v5, %v2089_v12 }
 0x235   : > { %3811 = vmatmul.msk.bf16.gmra.mxu1 %vm2289_vm15, %v2261_v40  ;;  %3853 = vmatmul.msk.bf16.gmra.mxu2 %vm2289_vm15, %v2261_v40  ;;  %v2062_v17 = vor.u32 %v2061_v49, %v2057_v56  ;;  %v2122_v33 = vsel %vm1535_vm12, %v5024_v54, %v1886_v7 }
 0x236   : > { %v2142_v34 = vsel %vm1014_vm3, %v2122_v33, %v5296_v8 }
 0x237   : > { %2026 = vrot.lane.b32.xlu1 %v2007_v19, %s4100_s29  ;;  %v2067_v2 = vsel %vm594_vm1, %v2062_v17, %v2066_v61 }
 0x238   : > { %2086 = vrot.lane.b32.xlu0 %v2067_v2, %s6211_s17  ;;  %s6286_s17 = smov 28  }
 0x239   : > { %v1963_v29 = vpop.permute.xlu2 %1962 }
 0x23a   : > { %v1961_v52 = vpop.permute.xlu0 %1960 }
 0x23b   : > { %v2163_v35 = vsel %vm2151_vm5, %v2142_v34, %v1961_v52 }
 0x23c   : > { %v2042_v55 = vpop.permute.xlu1 %2041 }
 0x23d   : > { %v2222_v27 = vsel %vm6267_vm14, %v2202_v15, %v2042_v55  ;;  %vm6272_vm14 = vmmov %vm6269_vm8 }
 0x23e   : > { %v2243_v47 = vsel %vm2233_vm11, %v2222_v27, %v2077_v13 }
 0x23f   : > { %2109 = vrot.lane.b32.xlu1 %v2090_v18, %s4096_s15 }
 0x241   : > { %v2102_v39 = vpop.permute.xlu2 %2101 }
 0x242   : > { %v2100_v20 = vpop.permute.xlu0 %2099 }
 0x243   : > { %v2263_v6 = vsel %vm1089_vm6, %v2243_v47, %v2100_v20 }
 0x244   : > { %v1938_v43 = vpop.permute.xlu1 %1937 }
 0x245   : > { %3812 = vmatmul.msk.bf16.gmra.mxu1 %vm2289_vm15, %v2263_v6  ;;  %3854 = vmatmul.msk.bf16.gmra.mxu2 %vm2289_vm15, %v2263_v6 }
 0x249   : > { %v1890_v37 = vpop.permute.xlu2 %1889 }
 0x24a   : > { %v1888_v19 = vpop.permute.xlu0 %1887  ;;  %v2126_v40 = vsel %vm1535_vm12, %v5123_v21, %v1890_v37 }
 0x24b   : > { %v2124_v28 = vsel %vm1535_vm12, %v5056_v24, %v1888_v19  ;;  %v5380_v24 = vstv %s3818_s12 }
 0x24c   : > { %v1996_v31 = vpop.permute.xlu1 %1995  ;;  %v2144_v22 = vsel %vm1014_vm3, %v2124_v28, %v1938_v43  ;;  %vm2467_vm10 = vcmp.ge.s32.totalorder %v5380_v24, 0  ;;  %vm2477_vm4 = vcmp.lt.s32.totalorder %v5380_v24, 16  ;;  %v2458_v13 = vadd.s32 1, %v5380_v24 }
 0x24d   : > { %v2183_v36 = vsel %vm6268_vm2, %v2163_v35, %v1996_v31  ;;  %v2165_v26 = vsel %vm2151_vm5, %v2144_v22, %v1963_v29  ;;  %v5427_v22 = vpop.f32.mrf.mxu2 }
 0x24e   : > { %v2204_v42 = vsel %vm2192_vm7, %v2183_v36, %v2019_v25 }
 0x251   : > { %v2046_v53 = vpop.permute.xlu2 %2045 }
 0x252   : > { %v2044_v32 = vpop.permute.xlu0 %2043 }
 0x253   : > { %v2224_v11 = vsel %vm6269_vm8, %v2204_v42, %v2044_v32  ;;  %vm5390_vm8 = vmand %vm2467_vm10, %vm2477_vm4 }
 0x254   : > { %v2021_v48 = vpop.permute.xlu1 %2020  ;;  %vm6275_vm4 = vmmov %vm6272_vm14 }
 0x259   : > { %v5372_v51 = vpop.permute.xlu2 %1941 }
 0x25a   : > { %v1940_v59 = vpop.permute.xlu0 %1939 }
 0x25b   : > { %v2146_v61 = vsel %vm1014_vm3, %v2126_v40, %v1940_v59 }
 0x25c   : > { %v2079_v41 = vpop.permute.xlu1 %2078 }
 0x25d   : > { %v2245_v46 = vsel %vm2233_vm11, %v2224_v11, %v2079_v41 }
 0x25e   : > { %v2265_v54 = vsel %vm1089_vm6, %v2245_v46, %v2102_v39 }
 0x25f   : > { %3813 = vmatmul.msk.bf16.gmra.mxu1 %vm2289_vm15, %v2265_v54  ;;  %3855 = vmatmul.msk.bf16.vlgmr.msra.gmra.mxu3 %vm2289_vm15, %v2265_v54 }
 0x261   : > { %v2000_v49 = vpop.permute.xlu2 %1999 }
 0x262   : > { %v1998_v8 = vpop.permute.xlu0 %1997 }
 0x263   : > { %v2185_v58 = vsel %vm6270_vm9, %v2165_v26, %v1998_v8 }
 0x264   : > { %v1965_v9 = vpop.permute.xlu1 %1964  ;;  %v2206_v62 = vsel %vm2192_vm7, %v2185_v58, %v2021_v48 }
 0x265   : > { %v2226_v50 = vsel %vm6272_vm14, %v2206_v62, %v2046_v53  ;;  %v2167_v2 = vsel %vm2151_vm5, %v2146_v61, %v1965_v9  ;;  %vm2468_vm14 = vcmp.ge.s32.totalorder %v2458_v13, 0  ;;  %v2459_v61 = vadd.s32 2, %v5380_v24 }
 0x266   : > { %v2187_v5 = vsel %vm6270_vm9, %v2167_v2, %v2000_v49 }
 0x269   : > { %v2083_v18 = vpop.permute.xlu2 %2082 }
 0x26a   : > { %v2023_v30 = vpop.permute.xlu0 %2022 }
 0x26b   : > { %v2208_v21 = vsel %vm2192_vm7, %v2187_v5, %v2023_v30 }
 0x26c   : > { %v2104_v38 = vpop.permute.xlu1 %2103 }
 0x26e   : > { %v2323_v0 = vpop.f32.mrf.mxu1 }
 0x26f   : > { %v2376_v23 = vadd.f32 %v5378_v63, %v2323_v0 }
 0x271   : > { %vm2396_vm2 = vcmp.ge.f32.partialorder %v2376_v23, 0.0  ;;  %v2416_v44 = vmul.f32 0.1, %v2376_v23  ;;  %v2025_v30 = vpop.permute.xlu2 %2024 }
 0x272   : > { %v2081_v25 = vpop.permute.xlu0 %2080 }
 0x273   : > { %v2247_v57 = vsel %vm2233_vm11, %v2226_v50, %v2081_v25  ;;  %v2436_v7 = vsel %vm2396_vm2, %v2376_v23, %v2416_v44  ;;  %vm2478_vm2 = vcmp.lt.s32.totalorder %v2458_v13, 16 }
 0x274   : > { %v5387_v16 = vpop.permute.xlu1 %1891  ;;  %v2267_v60 = vsel %vm1089_vm6, %v2247_v57, %v2104_v38  ;;  %v2517_v17 = vsel %vm5390_vm8, %v2436_v7, 0.0 }
 0x275   : > { %3814 = vmatmul.msk.bf16.gmra.mxu1 %vm2289_vm15, %v2267_v60  ;;  %3856 = vmatmul.msk.bf16.gmra.mxu3 %vm2289_vm15, %v2267_v60  ;;  %2567 = vst.msk [vmem:[#allocation3 + $0x1] sm:$0xff] %vm1535_vm12, %v2517_v17  ;;  %v2128_v26 = vsel %vm1535_vm12, %v5173_v4, %v5387_v16 }
 0x276   : > { %v2325_v45 = vpop.f32.mrf.mxu1  ;;  %v2148_v4 = vsel %vm1014_vm3, %v2128_v26, %v5372_v51 }
 0x277   : > { %v2377_v3 = vadd.f32 %v5378_v63, %v2325_v45 }
 0x279   : > { %vm2397_vm10 = vcmp.ge.f32.partialorder %v2377_v3, 0.0  ;;  %v2417_v12 = vmul.f32 0.1, %v2377_v3 }
 0x27a   : > { %v1967_v1 = vpop.permute.xlu0 %1966 }
 0x27b   : > { %v2437_v55 = vsel %vm2397_vm10, %v2377_v3, %v2417_v12  ;;  %vm5414_vm10 = vmand %vm2468_vm14, %vm2478_vm2  ;;  %v2169_v16 = vsel %vm2151_vm5, %v2148_v4, %v1967_v1  ;;  %vm6279_vm14 = vcmask 195584   ;;  %v5448_v12 = vpop.f32.mrf.mxu2  ;;  %vm2469_vm2 = vcmp.ge.s32.totalorder %v2459_v61, 0 }
 0x27c   : > { %v2048_v52 = vpop.permute.xlu1 %2047  ;;  %v2518_v15 = vsel %vm5390_vm8, %v2437_v55, 0.0  ;;  %v2587_v29 = vld [vmem:[#allocation3] sm:$0xff]  ;;  %v2108_v3 = vpop.permute.xlu2 %2107 }
 0x27d   : > { %v2228_v14 = vsel %vm6275_vm4, %v2208_v21, %v2048_v52  ;;  %2568 = vst.msk [vmem:[#allocation3 + $0x9] sm:$0xff] %vm1535_vm12, %v2518_v15  ;;  %v2617_v32 = vpack.c.bf16 %v2587_v29, %v2587_v29  ;;  %vm6278_vm4 = vcmask 130048  }
 0x27e   : > { %v2249_v47 = vsel %vm2233_vm11, %v2228_v14, %v2083_v18 }
 0x27f   : > { %v2901_v42 = vunpack.c.l.b16 %v2617_v32 }
 0x281   : > { %v2328_v27 = vpop.f32.mrf.mxu1 }
 0x282   : > { %v2106_v20 = vpop.permute.xlu0 %2105  ;;  %v2378_v6 = vadd.f32 %v5378_v63, %v2328_v27 }
 0x283   : > { %v2269_v43 = vsel %vm1089_vm6, %v2249_v47, %v2106_v20 }
 0x284   : > { %vm2398_vm9 = vcmp.ge.f32.partialorder %v2378_v6, 0.0  ;;  %v2418_v19 = vmul.f32 0.1, %v2378_v6  ;;  %v2588_v48 = vld [vmem:[#allocation3 + $0x8] sm:$0xff]  ;;  %v2589_v34 = vld [vmem:[#allocation3 + $0x10] sm:$0x3]  ;;  %v2002_v0 = vpop.permute.xlu1 %2001 }
 0x285   : > { %3815 = vmatmul.msk.bf16.gmra.mxu1 %vm2289_vm15, %v2269_v43  ;;  %3857 = vmatmul.msk.bf16.gmra.mxu3 %vm2289_vm15, %v2269_v43  ;;  %v2618_v35 = vpack.c.bf16 %v2588_v48, %v2588_v48  ;;  %v2619_v36 = vpack.c.bf16 %v2589_v34, %v2589_v34  ;;  %v2189_v49 = vsel %vm6278_vm4, %v2169_v16, %v2002_v0 }
 0x286   : > { %v2438_v39 = vsel %vm2398_vm9, %v2378_v6, %v2418_v19  ;;  %v2210_v17 = vsel %vm2192_vm7, %v2189_v49, %v2025_v30  ;;  %vm2479_vm9 = vcmp.lt.s32.totalorder %v2459_v61, 16 }
 0x287   : > { %v2519_v33 = vsel %vm5414_vm10, %v2438_v39, 0.0  ;;  %v2902_v11 = vunpack.c.l.b16 %v2618_v35  ;;  %v2933_v41 = vunpack.c.l.b16 %v2619_v36  ;;  %v5466_v35 = vpop.f32.mrf.mxu2 }
 0x288   : > { %2569 = vst.msk [vmem:[#allocation3 + $0x19] sm:$0xff] %vm1535_vm12, %v2519_v33 }
 0x289   : > { %v2330_v37 = vpop.f32.mrf.mxu1  ;;  %v5424_v54 = vpack.c.b16 %v2902_v11, %v2901_v42  ;;  %v2941_v8 = vpack.c.b16 %v2933_v41, %v2933_v41  ;;  %v1969_v42 = vpop.permute.xlu2 %1968 }
 0x28a   : > { %v2379_v59 = vadd.f32 %v5378_v63, %v2330_v37 }
 0x28b   : > { %v3061_v9 = vrot.slane %v5424_v54, 1  ;;  %v3062_v28 = vrot.slane %v2941_v8, 1  ;;  %v2952_v38 = vshll.u32 %v5424_v54, 16  ;;  %v2957_v62 = vshll.u32 %v2941_v8, 16 }
 0x28c   : > { %vm2399_vm8 = vcmp.ge.f32.partialorder %v2379_v59, 0.0  ;;  %v2419_v46 = vmul.f32 0.1, %v2379_v59  ;;  %v2950_v23 = vshrl.u32 %v5424_v54, 16 }
 0x28d   : > { %v3063_v50 = vsel %vm763_vm0, %v3061_v9, %v3062_v28  ;;  %v2954_v57 = vrot.slane %v2952_v38, 1  ;;  %v2959_v44 = vrot.slane %v2957_v62, 1 }
 0x28e   : > { %v2439_v53 = vsel %vm2399_vm8, %v2379_v59, %v2419_v46  ;;  %3085 = vrot.lane.b32.xlu0 %v3063_v50, %s6227_s14  ;;  %vm5457_vm8 = vmand %vm2469_vm2, %vm2479_vm9  ;;  %vm6283_vm2 = vcmask 195584  }
 0x28f   : > { %v2520_v58 = vsel %vm5414_vm10, %v2439_v53, 0.0  ;;  %v2955_v60 = vor.u32 %v2954_v57, %v2950_v23  ;;  %v2590_v56 = vld [vmem:[#allocation3 + $0x18] sm:$0xff] }
 0x290   : > { %2570 = vst.msk [vmem:[#allocation3 + $0x21] sm:$0xff] %vm1535_vm12, %v2520_v58  ;;  %v2620_v40 = vpack.c.bf16 %v2590_v56, %v2590_v56 }
 0x291   : > { %v2050_v25 = vpop.permute.xlu0 %2049  ;;  %v2960_v7 = vsel %vm594_vm1, %v2955_v60, %v2959_v44  ;;  %v2052_v23 = vpop.permute.xlu2 %2051  ;;  %v2460_v60 = vadd.s32 3, %v5380_v24 }
 0x292   : > { %3045 = vrot.lane.b32.xlu2 %v2960_v7, %s6254_s24  ;;  %v2230_v51 = vsel %vm6279_vm14, %v2210_v17, %v2050_v25  ;;  %v2903_v14 = vunpack.c.l.b16 %v2620_v40  ;;  %vm6282_vm14 = vcmask 130048   ;;  %v5487_v25 = vpop.f32.mrf.mxu2 }
 0x293   : > { %vm2470_vm9 = vcmp.ge.s32.totalorder %v2460_v60, 0 }
 0x297   : > { %v2591_v2 = vld [vmem:[#allocation3 + $0x20] sm:$0xff]  ;;  %v2592_v45 = vld [vmem:[#allocation3 + $0x28] sm:$0x3] }
 0x298   : > { %v2621_v52 = vpack.c.bf16 %v2591_v2, %v2591_v2  ;;  %v2622_v5 = vpack.c.bf16 %v2592_v45, %v2592_v45 }
 0x299   : > { %v2085_v1 = vpop.permute.xlu1 %2084  ;;  %v1894_v13 = vpop.permute.xlu0 %1893 }
 0x29a   : > { %v2251_v21 = vsel %vm2233_vm11, %v2230_v51, %v2085_v1  ;;  %v2904_v15 = vunpack.c.l.b16 %v2621_v52  ;;  %v2934_v18 = vunpack.c.l.b16 %v2622_v5  ;;  %v2130_v11 = vsel %vm1535_vm12, %v5235_v10, %v1894_v13  ;;  %v5495_v51 = vpop.f32.mrf.mxu2 }
 0x29b   : > { %v2271_v55 = vsel %vm1089_vm6, %v2251_v21, %v2108_v3 }
 0x29c   : > { %3816 = vmatmul.msk.bf16.gmra.mxu1 %vm2289_vm15, %v2271_v55  ;;  %3858 = vmatmul.msk.bf16.gmra.mxu3 %vm2289_vm15, %v2271_v55  ;;  %v2333_v27 = vpop.f32.mrf.mxu1  ;;  %v5455_v47 = vpack.c.b16 %v2904_v15, %v2903_v14  ;;  %v2942_v6 = vpack.c.b16 %v2934_v18, %v2934_v18 }
 0x29d   : > { %v2380_v20 = vadd.f32 %v5378_v63, %v2333_v27 }
 0x29e   : > { %3106 = vrot.lane.b32.xlu1 %v5455_v47, %s4099_s27  ;;  %v3064_v19 = vrot.slane %v5455_v47, 1  ;;  %v3065_v31 = vrot.slane %v2942_v6, 1  ;;  %v2964_v39 = vshll.u32 %v5455_v47, 16  ;;  %v2969_v32 = vshll.u32 %v2942_v6, 16 }
 0x29f   : > { %vm2400_vm10 = vcmp.ge.f32.partialorder %v2380_v20, 0.0  ;;  %v2420_v43 = vmul.f32 0.1, %v2380_v20  ;;  %v2962_v37 = vshrl.u32 %v5455_v47, 16 }
 0x2a0   : > { %v3066_v34 = vsel %vm763_vm0, %v3064_v19, %v3065_v31  ;;  %v2966_v59 = vrot.slane %v2964_v39, 1  ;;  %v2971_v9 = vrot.slane %v2969_v32, 1 }
 0x2a1   : > { %v2440_v33 = vsel %vm2400_vm10, %v2380_v20, %v2420_v43  ;;  %v1944_v48 = vpop.permute.xlu1 %1943  ;;  %3087 = vrot.lane.b32.xlu2 %v3066_v34, %s6227_s14  ;;  %3156 = vrot.lane.b32.xlu0 %v3066_v34, %s4100_s29  ;;  %v2004_v46 = vpop.permute.xlu0 %2003  ;;  %vm2480_vm10 = vcmp.lt.s32.totalorder %v2460_v60, 16  ;;  %v2461_v34 = vadd.s32 4, %v5380_v24 }
 0x2a2   : > { %v2521_v36 = vsel %vm5457_vm8, %v2440_v33, 0.0  ;;  %v2150_v41 = vsel %vm1014_vm3, %v2130_v11, %v1944_v48  ;;  %v2967_v53 = vor.u32 %v2966_v59, %v2962_v37  ;;  %v5516_v48 = vpop.f32.mrf.mxu2 }
 0x2a3   : > { %2571 = vst.msk [vmem:[#allocation3 + $0x31] sm:$0xff] %vm1535_vm12, %v2521_v36  ;;  %v2171_v26 = vsel %vm2151_vm5, %v2150_v41, %v1969_v42 }
 0x2a4   : > { %v2335_v8 = vpop.f32.mrf.mxu1  ;;  %v2972_v30 = vsel %vm594_vm1, %v2967_v53, %v2971_v9  ;;  %v2191_v62 = vsel %vm6282_vm14, %v2171_v26, %v2004_v46 }
 0x2a5   : > { %v2381_v28 = vadd.f32 %v5378_v63, %v2335_v8 }
 0x2a6   : > { %3047 = vrot.lane.b32.xlu1 %v2972_v30, %s6254_s24 }
 0x2a7   : > { %vm2401_vm4 = vcmp.ge.f32.partialorder %v2381_v28, 0.0  ;;  %v2421_v58 = vmul.f32 0.1, %v2381_v28 }
 0x2a9   : > { %v2441_v38 = vsel %vm2401_vm4, %v2381_v28, %v2421_v58  ;;  %v2027_v10 = vpop.permute.xlu1 %2026  ;;  %3137 = vrot.lane.b32.xlu2 %v2972_v30, %s6226_s13  ;;  %vm5497_vm4 = vmand %vm2470_vm9, %vm2480_vm10  ;;  %vm2481_vm9 = vcmp.lt.s32.totalorder %v2461_v34, 16 }
 0x2aa   : > { %v2522_v0 = vsel %vm5457_vm8, %v2441_v38, 0.0  ;;  %v2212_v50 = vsel %vm2192_vm7, %v2191_v62, %v2027_v10  ;;  %v2593_v57 = vld [vmem:[#allocation3 + $0x30] sm:$0xff]  ;;  %v2087_v16 = vpop.permute.xlu0 %2086  ;;  %v5531_v28 = vpop.f32.mrf.mxu2 }
 0x2ab   : > { %2572 = vst.msk [vmem:[#allocation3 + $0x39] sm:$0xff] %vm1535_vm12, %v2522_v0  ;;  %v2232_v4 = vsel %vm6283_vm2, %v2212_v50, %v2052_v23  ;;  %v2623_v44 = vpack.c.bf16 %v2593_v57, %v2593_v57  ;;  %vm2471_vm2 = vcmp.ge.s32.totalorder %v2461_v34, 0 }
 0x2ac   : > { %v2253_v56 = vsel %vm2233_vm11, %v2232_v4, %v2087_v16 }
 0x2ad   : > { %v2905_v1 = vunpack.c.l.b16 %v2623_v44 }
 0x2b1   : > { %v2110_v49 = vpop.permute.xlu1 %2109 }
 0x2b2   : > { %v2338_v7 = vpop.f32.mrf.mxu1  ;;  %v2273_v40 = vsel %vm1089_vm6, %v2253_v56, %v2110_v49  ;;  %v2594_v17 = vld [vmem:[#allocation3 + $0x38] sm:$0xff]  ;;  %v2595_v61 = vld [vmem:[#allocation3 + $0x40] sm:$0x3] }
 0x2b3   : > { %v2382_v2 = vadd.f32 %v5378_v63, %v2338_v7  ;;  %3817 = vmatmul.msk.bf16.gmra.mxu1 %vm2289_vm15, %v2273_v40  ;;  %v2624_v45 = vpack.c.bf16 %v2594_v17, %v2594_v17  ;;  %v2625_v3 = vpack.c.bf16 %v2595_v61, %v2595_v61  ;;  %v5544_v17 = vpop.f32.mrf.mxu2 }
 0x2b5   : > { %vm2402_vm8 = vcmp.ge.f32.partialorder %v2382_v2, 0.0  ;;  %v2422_v52 = vmul.f32 0.1, %v2382_v2  ;;  %v2906_v21 = vunpack.c.l.b16 %v2624_v45  ;;  %v2935_v13 = vunpack.c.l.b16 %v2625_v3 }
 0x2b7   : > { %v2442_v55 = vsel %vm2402_vm8, %v2382_v2, %v2422_v52  ;;  %v5501_v14 = vpack.c.b16 %v2906_v21, %v2905_v1  ;;  %v2943_v15 = vpack.c.b16 %v2935_v13, %v2935_v13  ;;  %vm5527_vm8 = vmand %vm2471_vm2, %vm2481_vm9 }
 0x2b8   : > { %v2523_v18 = vsel %vm5497_vm4, %v2442_v55, 0.0 }
 0x2b9   : > { %2573 = vst.msk [vmem:[#allocation3 + $0x49] sm:$0xff] %vm1535_vm12, %v2523_v18  ;;  %3108 = vrot.lane.b32.xlu0 %v5501_v14, %s4099_s27  ;;  %3177 = vrot.lane.b32.xlu1 %v5501_v14, %s4090_s22  ;;  %v3067_v27 = vrot.slane %v5501_v14, 1  ;;  %v3068_v20 = vrot.slane %v2943_v15, 1  ;;  %v2976_v43 = vshll.u32 %v5501_v14, 16  ;;  %v2974_v32 = vshrl.u32 %v5501_v14, 16 }
 0x2ba   : > { %v2340_v6 = vpop.f32.mrf.mxu1  ;;  %v2981_v33 = vshll.u32 %v2943_v15, 16  ;;  %v2462_v15 = vadd.s32 5, %v5380_v24 }
 0x2bb   : > { %v2383_v29 = vadd.f32 %v5378_v63, %v2340_v6  ;;  %v3069_v19 = vsel %vm763_vm0, %v3067_v27, %v3068_v20  ;;  %v2978_v31 = vrot.slane %v2976_v43, 1  ;;  %v5556_v55 = vpop.f32.mrf.mxu2 }
 0x2bc   : > { %3158 = vrot.lane.b32.xlu2 %v3069_v19, %s4100_s29  ;;  %v2983_v42 = vrot.slane %v2981_v33, 1  ;;  %vm2482_vm2 = vcmp.lt.s32.totalorder %v2462_v15, 16 }
 0x2bd   : > { %vm2403_vm14 = vcmp.ge.f32.partialorder %v2383_v29, 0.0  ;;  %v2423_v39 = vmul.f32 0.1, %v2383_v29  ;;  %v2979_v37 = vor.u32 %v2978_v31, %v2974_v32 }
 0x2bf   : > { %v2443_v36 = vsel %vm2403_vm14, %v2383_v29, %v2423_v39  ;;  %v2984_v46 = vsel %vm594_vm1, %v2979_v37, %v2983_v42  ;;  %vm2472_vm14 = vcmp.ge.s32.totalorder %v2462_v15, 0 }
 0x2c0   : > { %v2524_v59 = vsel %vm5497_vm4, %v2443_v36, 0.0  ;;  %v2596_v8 = vld [vmem:[#allocation3 + $0x48] sm:$0xff] }
 0x2c1   : > { %2574 = vst.msk [vmem:[#allocation3 + $0x51] sm:$0xff] %vm1535_vm12, %v2524_v59  ;;  %3089 = vrot.lane.b32.xlu1 %v3069_v19, %s6227_s14  ;;  %3227 = vrot.lane.b32.xlu0 %v3069_v19, %s4096_s15  ;;  %v2626_v26 = vpack.c.bf16 %v2596_v8, %v2596_v8 }
 0x2c2   : > { %v2343_v11 = vpop.f32.mrf.mxu1 }
 0x2c3   : > { %v2384_v41 = vadd.f32 %v5378_v63, %v2343_v11  ;;  %v2907_v57 = vunpack.c.l.b16 %v2626_v26  ;;  %v5571_v11 = vpop.f32.mrf.mxu2 }
 0x2c4   : > { %3208 = vrot.lane.b32.xlu2 %v2984_v46, %s6286_s17 }
 0x2c5   : > { %vm2404_vm10 = vcmp.ge.f32.partialorder %v2384_v41, 0.0  ;;  %v2424_v53 = vmul.f32 0.1, %v2384_v41 }
 0x2c7   : > { %v2444_v30 = vsel %vm2404_vm10, %v2384_v41, %v2424_v53  ;;  %vm5563_vm10 = vmand %vm2472_vm14, %vm2482_vm2 }
 0x2c8   : > { %v2525_v58 = vsel %vm5527_vm8, %v2444_v30, 0.0  ;;  %v2597_v38 = vld [vmem:[#allocation3 + $0x50] sm:$0xff]  ;;  %v2598_v10 = vld [vmem:[#allocation3 + $0x58] sm:$0x3] }
 0x2c9   : > { %2575 = vst.msk [vmem:[#allocation3 + $0x61] sm:$0xff] %vm1535_vm12, %v2525_v58  ;;  %3049 = vrot.lane.b32.xlu0 %v2984_v46, %s6254_s24  ;;  %3139 = vrot.lane.b32.xlu1 %v2984_v46, %s6226_s13  ;;  %v2627_v62 = vpack.c.bf16 %v2597_v38, %v2597_v38  ;;  %v2628_v0 = vpack.c.bf16 %v2598_v10, %v2598_v10 }
 0x2ca   : > { %v2345_v50 = vpop.f32.mrf.mxu1 }
 0x2cb   : > { %v2385_v23 = vadd.f32 %v5378_v63, %v2345_v50  ;;  %v2908_v4 = vunpack.c.l.b16 %v2627_v62  ;;  %v2936_v16 = vunpack.c.l.b16 %v2628_v0  ;;  %v5585_v62 = vpop.f32.mrf.mxu2 }
 0x2cd   : > { %vm2405_vm4 = vcmp.ge.f32.partialorder %v2385_v23, 0.0  ;;  %v2425_v60 = vmul.f32 0.1, %v2385_v23  ;;  %v5539_v44 = vpack.c.b16 %v2908_v4, %v2907_v57  ;;  %v2944_v56 = vpack.c.b16 %v2936_v16, %v2936_v16 }
 0x2cf   : > { %v2445_v49 = vsel %vm2405_vm4, %v2385_v23, %v2425_v60  ;;  %3110 = vrot.lane.b32.xlu2 %v5539_v44, %s4099_s27  ;;  %v3070_v7 = vrot.slane %v5539_v44, 1  ;;  %v3071_v40 = vrot.slane %v2944_v56, 1  ;;  %v2988_v2 = vshll.u32 %v5539_v44, 16 }
 0x2d0   : > { %v2526_v61 = vsel %vm5527_vm8, %v2445_v49, 0.0  ;;  %v2986_v1 = vshrl.u32 %v5539_v44, 16  ;;  %v2993_v52 = vshll.u32 %v2944_v56, 16  ;;  %v2599_v13 = vld [vmem:[#allocation3 + $0x60] sm:$0xff]  ;;  %v2463_v60 = vadd.s32 6, %v5380_v24 }
 0x2d1   : > { %2576 = vst.msk [vmem:[#allocation3 + $0x69] sm:$0xff] %vm1535_vm12, %v2526_v61  ;;  %3179 = vrot.lane.b32.xlu0 %v5539_v44, %s4090_s22  ;;  %v3072_v45 = vsel %vm763_vm0, %v3070_v7, %v3071_v40  ;;  %v2990_v3 = vrot.slane %v2988_v2, 1  ;;  %v2629_v29 = vpack.c.bf16 %v2599_v13, %v2599_v13 }
 0x2d2   : > { %3160 = vrot.lane.b32.xlu1 %v3072_v45, %s4100_s29  ;;  %v2995_v21 = vrot.slane %v2993_v52, 1  ;;  %vm2473_vm4 = vcmp.ge.s32.totalorder %v2463_v60, 0  ;;  %vm2483_vm14 = vcmp.lt.s32.totalorder %v2463_v60, 16 }
 0x2d3   : > { %v2991_v5 = vor.u32 %v2990_v3, %v2986_v1  ;;  %v2909_v33 = vunpack.c.l.b16 %v2629_v29  ;;  %v5598_v1 = vpop.f32.mrf.mxu2 }
 0x2d5   : > { %v2996_v20 = vsel %vm594_vm1, %v2991_v5, %v2995_v21 }
 0x2d7   : > { %3229 = vrot.lane.b32.xlu2 %v3072_v45, %s4096_s15 }
 0x2d8   : > { %v2600_v18 = vld [vmem:[#allocation3 + $0x68] sm:$0xff]  ;;  %v2601_v27 = vld [vmem:[#allocation3 + $0x70] sm:$0x3] }
 0x2d9   : > { %3091 = vrot.lane.b32.xlu0 %v3072_v45, %s6227_s14  ;;  %v2630_v6 = vpack.c.bf16 %v2600_v18, %v2600_v18  ;;  %v2631_v43 = vpack.c.bf16 %v2601_v27, %v2601_v27 }
 0x2da   : > { %3210 = vrot.lane.b32.xlu1 %v2996_v20, %s6286_s17 }
 0x2db   : > { %v2910_v31 = vunpack.c.l.b16 %v2630_v6  ;;  %v2937_v39 = vunpack.c.l.b16 %v2631_v43  ;;  %v2883_v6 = vld [vmem:[%s6189_s9 + $0x10] sm:$0x3]  ;;  %v5620_v36 = vpop.f32.mrf.mxu2 }
 0x2dc   : > { %v2348_v19 = vpop.f32.mrf.mxu1  ;;  %v3380_v29 = vunpack.c.l.b16 %v2883_v6 }
 0x2dd   : > { %v2386_v32 = vadd.f32 %v5378_v63, %v2348_v19  ;;  %v5568_v37 = vpack.c.b16 %v2910_v31, %v2909_v33  ;;  %v2945_v59 = vpack.c.b16 %v2937_v39, %v2937_v39 }
 0x2de   : > { %v3383_v33 = vpack.c.b16 %v3380_v29, %v3380_v29 }
 0x2df   : > { %vm2406_vm9 = vcmp.ge.f32.partialorder %v2386_v32, 0.0  ;;  %v2426_v34 = vmul.f32 0.1, %v2386_v32  ;;  %3051 = vrot.lane.b32.xlu2 %v2996_v20, %s6254_s24  ;;  %v3073_v8 = vrot.slane %v5568_v37, 1  ;;  %v3074_v53 = vrot.slane %v2945_v59, 1 }
 0x2e0   : > { %v3000_v9 = vshll.u32 %v5568_v37, 16  ;;  %v2998_v50 = vshrl.u32 %v5568_v37, 16  ;;  %v3005_v23 = vshll.u32 %v2945_v59, 16  ;;  %v3403_v59 = vsel %vm2310_vm13, %v3383_v33, 0 }
 0x2e1   : > { %v2446_v42 = vsel %vm2406_vm9, %v2386_v32, %v2426_v34  ;;  %3141 = vrot.lane.b32.xlu0 %v2996_v20, %s6226_s13  ;;  %v3075_v58 = vsel %vm763_vm0, %v3073_v8, %v3074_v53  ;;  %vm5600_vm9 = vmand %vm2473_vm4, %vm2483_vm14  ;;  %3410 = vmatpush.bf16.msrb.mxu3 %v3403_v59  ;;  %v2464_v8 = vadd.s32 7, %v5380_v24 }
 0x2e2   : > { %v2527_v41 = vsel %vm5563_vm10, %v2446_v42, 0.0  ;;  %3112 = vrot.lane.b32.xlu1 %v5568_v37, %s4099_s27  ;;  %v3002_v38 = vrot.slane %v3000_v9, 1  ;;  %v3007_v16 = vrot.slane %v3005_v23, 1 }
 0x2e3   : > { %2577 = vst.msk [vmem:[#allocation3 + $0x79] sm:$0xff] %vm1535_vm12, %v2527_v41  ;;  %vm2474_vm13 = vcmp.ge.s32.totalorder %v2464_v8, 0  ;;  %v5641_v60 = vpop.f32.mrf.mxu2 }
 0x2e4   : > { %v2350_v46 = vpop.f32.mrf.mxu1  ;;  %v3003_v57 = vor.u32 %v3002_v38, %v2998_v50 }
 0x2e5   : > { %v2387_v30 = vadd.f32 %v5378_v63, %v2350_v46 }
 0x2e6   : > { %v3008_v56 = vsel %vm594_vm1, %v3003_v57, %v3007_v16 }
 0x2e7   : > { %vm2407_vm8 = vcmp.ge.f32.partialorder %v2387_v30, 0.0  ;;  %v2427_v26 = vmul.f32 0.1, %v2387_v30  ;;  %3181 = vrot.lane.b32.xlu2 %v5568_v37, %s4090_s22 }
 0x2e9   : > { %v2447_v10 = vsel %vm2407_vm8, %v2387_v30, %v2427_v26  ;;  %3162 = vrot.lane.b32.xlu0 %v3075_v58, %s4100_s29  ;;  %vm2484_vm8 = vcmp.lt.s32.totalorder %v2464_v8, 16 }
 0x2ea   : > { %v2528_v0 = vsel %vm5563_vm10, %v2447_v10, 0.0  ;;  %3231 = vrot.lane.b32.xlu1 %v3075_v58, %s4096_s15  ;;  %v2602_v4 = vld [vmem:[#allocation3 + $0x78] sm:$0xff]  ;;  %vm5637_vm14 = vmand %vm2474_vm13, %vm2484_vm8 }
 0x2eb   : > { %2578 = vst.msk [vmem:[#allocation3 + $0x81] sm:$0xff] %vm1535_vm12, %v2528_v0  ;;  %v2632_v49 = vpack.c.bf16 %v2602_v4, %v2602_v4  ;;  %v5656_v29 = vpop.f32.mrf.mxu2 }
 0x2ec   : > { %v5623_v42 = vpop.permute.xlu2 %3045 }
 0x2ed   : > { %v2911_v52 = vunpack.c.l.b16 %v2632_v49 }
 0x2ef   : > { %3093 = vrot.lane.b32.xlu2 %v3075_v58, %s6227_s14 }
 0x2f1   : > { %3212 = vrot.lane.b32.xlu0 %v3008_v56, %s6286_s17 }
 0x2f2   : > { %3053 = vrot.lane.b32.xlu1 %v3008_v56, %s6254_s24  ;;  %v2353_v7 = vpop.f32.mrf.mxu1  ;;  %v2603_v40 = vld [vmem:[#allocation3 + $0x80] sm:$0xff]  ;;  %v2604_v61 = vld [vmem:[#allocation3 + $0x88] sm:$0x3] }
 0x2f3   : > { %v2388_v2 = vadd.f32 %v5378_v63, %v2353_v7  ;;  %v2633_v45 = vpack.c.bf16 %v2603_v40, %v2603_v40  ;;  %v2634_v3 = vpack.c.bf16 %v2604_v61, %v2604_v61 }
 0x2f5   : > { %vm2408_vm2 = vcmp.ge.f32.partialorder %v2388_v2, 0.0  ;;  %v2428_v5 = vmul.f32 0.1, %v2388_v2  ;;  %v2912_v13 = vunpack.c.l.b16 %v2633_v45  ;;  %v2938_v15 = vunpack.c.l.b16 %v2634_v3 }
 0x2f7   : > { %v2448_v18 = vsel %vm2408_vm2, %v2388_v2, %v2428_v5  ;;  %3143 = vrot.lane.b32.xlu2 %v3008_v56, %s6226_s13  ;;  %v5605_v27 = vpack.c.b16 %v2912_v13, %v2911_v52  ;;  %v2946_v20 = vpack.c.b16 %v2938_v15, %v2938_v15 }
 0x2f8   : > { %v2529_v43 = vsel %vm5600_vm9, %v2448_v18, 0.0  ;;  %v3895_v18 = vld [vmem:[%s6189_s9 + $0x8] sm:$0xff] }
 0x2f9   : > { %2579 = vst.msk [vmem:[#allocation3 + $0x91] sm:$0xff] %vm1535_vm12, %v2529_v43  ;;  %3114 = vrot.lane.b32.xlu0 %v5605_v27, %s4099_s27  ;;  %v3076_v31 = vrot.slane %v5605_v27, 1  ;;  %v3077_v39 = vrot.slane %v2946_v20, 1  ;;  %v3012_v32 = vshll.u32 %v5605_v27, 16  ;;  %v3010_v26 = vshrl.u32 %v5605_v27, 16  ;;  %3411 = vmatpush.bf16.msrb.mxu3 %v3895_v18 }
 0x2fa   : > { %3183 = vrot.lane.b32.xlu1 %v5605_v27, %s4090_s22  ;;  %v2355_v19 = vpop.f32.mrf.mxu1  ;;  %v3017_v58 = vshll.u32 %v2946_v20, 16 }
 0x2fb   : > { %v2389_v34 = vadd.f32 %v5378_v63, %v2355_v19  ;;  %v3078_v46 = vsel %vm763_vm0, %v3076_v31, %v3077_v39  ;;  %v3014_v53 = vrot.slane %v3012_v32, 1  ;;  %v5635_v57 = vpop.permute.xlu2 %3087 }
 0x2fc   : > { %v3019_v50 = vrot.slane %v3017_v58, 1 }
 0x2fd   : > { %vm2409_vm10 = vcmp.ge.f32.partialorder %v2389_v34, 0.0  ;;  %v2429_v41 = vmul.f32 0.1, %v2389_v34  ;;  %v3015_v10 = vor.u32 %v3014_v53, %v3010_v26  ;;  %v2465_v53 = vadd.s32 8, %v5380_v24 }
 0x2ff   : > { %v2449_v9 = vsel %vm2409_vm10, %v2389_v34, %v2429_v41  ;;  %3164 = vrot.lane.b32.xlu2 %v3078_v46, %s4100_s29  ;;  %v3020_v56 = vsel %vm594_vm1, %v3015_v10, %v3019_v50  ;;  %v3894_v10 = vld [vmem:[%s6189_s9] sm:$0xff]  ;;  %vm2485_vm10 = vcmp.lt.s32.totalorder %v2465_v53, 16 }
 0x300   : > { %v2530_v30 = vsel %vm5600_vm9, %v2449_v9, 0.0  ;;  %v2605_v23 = vld [vmem:[#allocation3 + $0x90] sm:$0xff]  ;;  %vm2475_vm9 = vcmp.ge.s32.totalorder %v2465_v53, 0  ;;  %3412 = vmatpush.bf16.msrb.mxu3 %v3894_v10  ;;  %v3244_v10 = vsel %vm1535_vm12, %v5424_v54, %v5623_v42 }
 0x301   : > { %2580 = vst.msk [vmem:[#allocation3 + $0x99] sm:$0xff] %vm1535_vm12, %v2530_v30  ;;  %3233 = vrot.lane.b32.xlu0 %v3078_v46, %s4096_s15  ;;  %v2635_v7 = vpack.c.bf16 %v2605_v23, %v2605_v23  ;;  %vm5686_vm8 = vmand %vm2475_vm9, %vm2485_vm10  ;;  %vm6298_vm9 = vcmask 195584  }
 0x302   : > { %3095 = vrot.lane.b32.xlu1 %v3078_v46, %s6227_s14  ;;  %v2358_v38 = vpop.f32.mrf.mxu1 }
 0x303   : > { %v2390_v0 = vadd.f32 %v5378_v63, %v2358_v38  ;;  %v2913_v21 = vunpack.c.l.b16 %v2635_v7  ;;  %v5658_v19 = vpop.permute.xlu2 %3137 }
 0x305   : > { %vm2410_vm4 = vcmp.ge.f32.partialorder %v2390_v0, 0.0  ;;  %v2430_v4 = vmul.f32 0.1, %v2390_v0 }
 0x307   : > { %v2450_v49 = vsel %vm2410_vm4, %v2390_v0, %v2430_v4  ;;  %3214 = vrot.lane.b32.xlu2 %v3020_v56, %s6286_s17  ;;  %v5679_v0 = vpop.f32.mrf.mxu2 }
 0x308   : > { %v2531_v40 = vsel %vm5637_vm14, %v2450_v49, 0.0  ;;  %v2606_v61 = vld [vmem:[#allocation3 + $0x98] sm:$0xff]  ;;  %v2607_v2 = vld [vmem:[#allocation3 + $0xa0] sm:$0x3] }
 0x309   : > { %2581 = vst.msk [vmem:[#allocation3 + $0xa9] sm:$0xff] %vm1535_vm12, %v2531_v40  ;;  %3055 = vrot.lane.b32.xlu0 %v3020_v56, %s6254_s24  ;;  %v2636_v45 = vpack.c.bf16 %v2606_v61, %v2606_v61  ;;  %v2637_v3 = vpack.c.bf16 %v2607_v2, %v2607_v2  ;;  %v3086_v61 = vpop.permute.xlu0 %3085 }
 0x30a   : > { %3145 = vrot.lane.b32.xlu1 %v3020_v56, %s6226_s13  ;;  %v2360_v52 = vpop.f32.mrf.mxu1 }
 0x30b   : > { %v2391_v5 = vadd.f32 %v5378_v63, %v2360_v52  ;;  %v2914_v13 = vunpack.c.l.b16 %v2636_v45  ;;  %v2939_v15 = vunpack.c.l.b16 %v2637_v3 }
 0x30d   : > { %vm2411_vm2 = vcmp.ge.f32.partialorder %v2391_v5, 0.0  ;;  %v2431_v20 = vmul.f32 0.1, %v2391_v5  ;;  %v5654_v6 = vpack.c.b16 %v2914_v13, %v2913_v21  ;;  %v2947_v43 = vpack.c.b16 %v2939_v15, %v2939_v15 }
 0x30f   : > { %v2451_v31 = vsel %vm2411_vm2, %v2391_v5, %v2431_v20  ;;  %3116 = vrot.lane.b32.xlu2 %v5654_v6, %s4099_s27  ;;  %v3079_v39 = vrot.slane %v5654_v6, 1  ;;  %v3080_v32 = vrot.slane %v2947_v43, 1  ;;  %v3024_v34 = vshll.u32 %v5654_v6, 16 }
 0x310   : > { %v2532_v33 = vsel %vm5637_vm14, %v2451_v31, 0.0  ;;  %v3022_v46 = vshrl.u32 %v5654_v6, 16  ;;  %v3029_v8 = vshll.u32 %v2947_v43, 16  ;;  %v2608_v9 = vld [vmem:[#allocation3 + $0xa8] sm:$0xff]  ;;  %v3107_v4 = vpop.permute.xlu1 %3106  ;;  %v5696_v43 = vpop.f32.mrf.mxu2  ;;  %vm6297_vm14 = vcmask 130048  }
 0x311   : > { %2582 = vst.msk [vmem:[#allocation3 + $0xb1] sm:$0xff] %vm1535_vm12, %v2532_v33  ;;  %3185 = vrot.lane.b32.xlu0 %v5654_v6, %s4090_s22  ;;  %v3081_v59 = vsel %vm763_vm0, %v3079_v39, %v3080_v32  ;;  %v3026_v41 = vrot.slane %v3024_v34, 1  ;;  %v2638_v38 = vpack.c.bf16 %v2608_v9, %v2608_v9 }
 0x312   : > { %3166 = vrot.lane.b32.xlu1 %v3081_v59, %s4100_s29  ;;  %v3031_v58 = vrot.slane %v3029_v8, 1 }
 0x313   : > { %v3027_v30 = vor.u32 %v3026_v41, %v3022_v46  ;;  %v2915_v2 = vunpack.c.l.b16 %v2638_v38  ;;  %v3157_v41 = vpop.permute.xlu0 %3156 }
 0x315   : > { %v3032_v56 = vsel %vm594_vm1, %v3027_v30, %v3031_v58 }
 0x316   : > { %v5673_v26 = vpop.permute.xlu2 %3158 }
 0x317   : > { %3235 = vrot.lane.b32.xlu2 %v3081_v59, %s4096_s15 }
 0x318   : > { %v2609_v50 = vld [vmem:[#allocation3 + $0xb0] sm:$0xff]  ;;  %v2610_v23 = vld [vmem:[#allocation3 + $0xb8] sm:$0x3]  ;;  %v5704_v46 = vpop.permute.xlu1 %3047  ;;  %v5727_v42 = vpop.f32.mrf.mxu2 }
 0x319   : > { %v2363_v16 = vpop.f32.mrf.mxu1  ;;  %3097 = vrot.lane.b32.xlu0 %v3081_v59, %s6227_s14  ;;  %v2639_v49 = vpack.c.bf16 %v2609_v50, %v2609_v50  ;;  %v2640_v7 = vpack.c.bf16 %v2610_v23, %v2610_v23  ;;  %v3260_v23 = vsel %vm1014_vm3, %v3244_v10, %v3086_v61  ;;  %v2466_v61 = vadd.s32 9, %v5380_v24 }
 0x31a   : > { %v2392_v40 = vadd.f32 %v5378_v63, %v2363_v16  ;;  %3216 = vrot.lane.b32.xlu1 %v3032_v56, %s6286_s17 }
 0x31b   : > { %v2916_v45 = vunpack.c.l.b16 %v2639_v49  ;;  %v2940_v3 = vunpack.c.l.b16 %v2640_v7  ;;  %vm2476_vm2 = vcmp.ge.s32.totalorder %v2466_v61, 0  ;;  %vm2486_vm10 = vcmp.lt.s32.totalorder %v2466_v61, 16 }
 0x31c   : > { %vm2412_vm13 = vcmp.ge.f32.partialorder %v2392_v40, 0.0  ;;  %v2432_v52 = vmul.f32 0.1, %v2392_v40 }
 0x31d   : > { %v5690_v21 = vpack.c.b16 %v2916_v45, %v2915_v2  ;;  %v2948_v15 = vpack.c.b16 %v2940_v3, %v2940_v3 }
 0x31e   : > { %v2452_v13 = vsel %vm2412_vm13, %v2392_v40, %v2432_v52  ;;  %v3209_v31 = vpop.permute.xlu2 %3208 }
 0x31f   : > { %v2533_v18 = vsel %vm5686_vm8, %v2452_v13, 0.0  ;;  %3057 = vrot.lane.b32.xlu2 %v3032_v56, %s6254_s24  ;;  %v3036_v20 = vshll.u32 %v5690_v21, 16  ;;  %v3034_v34 = vshrl.u32 %v5690_v21, 16  ;;  %v3041_v59 = vshll.u32 %v2948_v15, 16 }
 0x320   : > { %2583 = vst.msk [vmem:[#allocation3 + $0xc1] sm:$0xff] %vm1535_vm12, %v2533_v18  ;;  %v3082_v9 = vrot.slane %v5690_v21, 1  ;;  %v3083_v30 = vrot.slane %v2948_v15, 1 }
 0x321   : > { %v2365_v39 = vpop.f32.mrf.mxu1  ;;  %3147 = vrot.lane.b32.xlu0 %v3032_v56, %s6226_s13  ;;  %v3038_v32 = vrot.slane %v3036_v20, 1  ;;  %v3043_v38 = vrot.slane %v3041_v59, 1  ;;  %v3276_v56 = vsel %vm2151_vm5, %v3260_v23, %v3107_v4 }
 0x322   : > { %v2393_v33 = vadd.f32 %v5378_v63, %v2365_v39  ;;  %3118 = vrot.lane.b32.xlu1 %v5690_v21, %s4099_s27  ;;  %v5725_v54 = vsel %vm763_vm0, %v3082_v9, %v3083_v30  ;;  %v3292_v4 = vsel %vm6297_vm14, %v3276_v56, %v5658_v19  ;;  %v5745_v19 = vpop.f32.mrf.mxu2 }
 0x323   : > { %v3039_v53 = vor.u32 %v3038_v32, %v3034_v34  ;;  %v3308_v3 = vsel %vm2192_vm7, %v3292_v4, %v3157_v41  ;;  %v5747_v32 = vpop.f32.mrf.mxu3  ;;  %v3992_v4 = vld [vmem:[%s6188_s8] ss:$0 sm:$0xff] }
 0x324   : > { %vm2413_vm4 = vcmp.ge.f32.partialorder %v2393_v33, 0.0  ;;  %v2433_v8 = vmul.f32 0.1, %v2393_v33 }
 0x325   : > { %v5717_v16 = vsel %vm594_vm1, %v3039_v53, %v3043_v38 }
 0x326   : > { %v2453_v58 = vsel %vm2413_vm4, %v2393_v33, %v2433_v8 }
 0x327   : > { %v2534_v50 = vsel %vm5686_vm8, %v2453_v58, 0.0  ;;  %3187 = vrot.lane.b32.xlu2 %v5690_v21, %s4090_s22  ;;  %v2611_v2 = vld [vmem:[#allocation3 + $0xc0] sm:$0xff]  ;;  %vm5750_vm8 = vmand %vm2476_vm2, %vm2486_vm10 }
 0x328   : > { %2584 = vst.msk [vmem:[#allocation3 + $0xc9] sm:$0xff] %vm1535_vm12, %v2534_v50  ;;  %v2641_v45 = vpack.c.bf16 %v2611_v2, %v2611_v2  ;;  %vm6301_vm2 = vmmov %vm6298_vm9 }
 0x329   : > { %v5720_v49 = vpop.permute.xlu2 %3110  ;;  %3218 = vrot.lane.b32.xlu0 %v5717_v16, %s6286_s17 }
 0x32a   : > { %3237 = vrot.lane.b32.xlu1 %v5725_v54, %s4096_s15  ;;  %v3103_v33 = vunpack.c.l.b16 %v2641_v45 }
 0x32b   : > { %v3178_v7 = vpop.permute.xlu1 %3177  ;;  %v5731_v40 = vpop.permute.xlu0 %3108 }
 0x32c   : > { %v3324_v13 = vsel %vm6298_vm9, %v3308_v3, %v3178_v7 }
 0x32d   : > { %v3340_v53 = vsel %vm2233_vm11, %v3324_v13, %v3209_v31 }
 0x32f   : > { %3149 = vrot.lane.b32.xlu2 %v5717_v16, %s6226_s13  ;;  %v2612_v52 = vld [vmem:[#allocation3 + $0xc8] sm:$0xff]  ;;  %v2613_v5 = vld [vmem:[#allocation3 + $0xd0] sm:$0x3] }
 0x330   : > { %v2368_v15 = vpop.f32.mrf.mxu1  ;;  %v2642_v18 = vpack.c.bf16 %v2612_v52, %v2612_v52  ;;  %v2643_v20 = vpack.c.bf16 %v2613_v5, %v2613_v5 }
 0x331   : > { %v2394_v24 = vadd.f32 %v5378_v63, %v2368_v15  ;;  %v5741_v39 = vpop.permute.xlu2 %3229  ;;  %3168 = vrot.lane.b32.xlu0 %v5725_v54, %s4100_s29 }
 0x332   : > { %v3104_v34 = vunpack.c.l.b16 %v2642_v18  ;;  %v3123_v59 = vunpack.c.l.b16 %v2643_v20 }
 0x333   : > { %vm2414_vm13 = vcmp.ge.f32.partialorder %v2394_v24, 0.0  ;;  %v2434_v41 = vmul.f32 0.1, %v2394_v24  ;;  %v5754_v63 = vpop.permute.xlu1 %3089  ;;  %v3228_v9 = vpop.permute.xlu0 %3227 }
 0x334   : > { %v3356_v30 = vsel %vm1089_vm6, %v3340_v53, %v3228_v9  ;;  %v3105_v58 = vpack.c.b16 %v3104_v34, %v3103_v33  ;;  %v3124_v38 = vpack.c.b16 %v3123_v59, %v3123_v59  ;;  %v5772_v33 = vpop.f32.mrf.mxu3  ;;  %v5774_v34 = vpop.f32.mrf.mxu2 }
 0x335   : > { %v2454_v10 = vsel %vm2414_vm13, %v2394_v24, %v2434_v41  ;;  %3867 = vmatmul.msk.bf16.vlgmr.msrb.gmra.mxu3 %vm2289_vm15, %v3356_v30 }
 0x336   : > { %v2535_v50 = vsel %vm5750_vm8, %v2454_v10, 0.0  ;;  %3189 = vrot.lane.b32.xlu1 %v3105_v58, %s4090_s22  ;;  %v3153_v23 = vrot.slane %v3105_v58, 1  ;;  %v3154_v56 = vrot.slane %v3124_v38, 1  ;;  %v3128_v7 = vshll.u32 %v3105_v58, 16 }
 0x337   : > { %2585 = vst.msk [vmem:[#allocation3 + $0xd9] sm:$0xff] %vm1535_vm12, %v2535_v50  ;;  %v3133_v61 = vshll.u32 %v3124_v38, 16  ;;  %v3126_v52 = vshrl.u32 %v3105_v58, 16  ;;  %v3246_v38 = vsel %vm1535_vm12, %v5455_v47, %v5704_v46 }
 0x338   : > { %v2370_v31 = vpop.f32.mrf.mxu1  ;;  %v3155_v2 = vsel %vm763_vm0, %v3153_v23, %v3154_v56  ;;  %v3130_v5 = vrot.slane %v3128_v7, 1 }
 0x339   : > { %v2395_v45 = vadd.f32 %v3992_v4, %v2370_v31  ;;  %v5767_v3 = vpop.permute.xlu2 %3051  ;;  %3239 = vrot.lane.b32.xlu0 %v3155_v2, %s4096_s15  ;;  %v3135_v24 = vrot.slane %v3133_v61, 1 }
 0x33a   : > { %v3131_v20 = vor.u32 %v3130_v5, %v3126_v52 }
 0x33b   : > { %vm2415_vm4 = vcmp.ge.f32.partialorder %v2395_v45, 0.0  ;;  %v2435_v13 = vmul.f32 0.1, %v2395_v45  ;;  %v3140_v15 = vpop.permute.xlu1 %3139  ;;  %v5770_v18 = vpop.permute.xlu0 %3049 }
 0x33c   : > { %v3136_v41 = vsel %vm594_vm1, %v3131_v20, %v3135_v24  ;;  %v5789_v50 = vpop.f32.mrf.mxu3  ;;  %v5793_v23 = vpop.f32.mrf.mxu2 }
 0x33d   : > { %v2455_v59 = vsel %vm2415_vm4, %v2395_v45, %v2435_v13  ;;  %3220 = vrot.lane.b32.xlu2 %v3136_v41, %s6286_s17 }
 0x33e   : > { %v2536_v53 = vsel %vm5750_vm8, %v2455_v59, 0.0  ;;  %3059 = vrot.lane.b32.xlu1 %v5717_v16, %s6254_s24  ;;  %v2614_v30 = vld [vmem:[#allocation3 + $0xd8] sm:$0xff]  ;;  %v3262_v16 = vsel %vm1014_vm3, %v3246_v38, %v5635_v57  ;;  %v5808_v57 = vld [vmem:[%s6186_s6] ss:$0 sm:$0xff]  ;;  %s3878_s24 = sshll.u32 %s4075_s21, 5 }
 0x33f   : > { %2586 = vst.msk [vmem:[#allocation3 + $0xe1] sm:$0xff] %vm1535_vm12, %v2536_v53  ;;  %v2644_v56 = vpack.c.bf16 %v2614_v30, %v2614_v30  ;;  %v3278_v47 = vsel %vm2151_vm5, %v3262_v16, %v5731_v40  ;;  %v2847_v38 = vadd.f32 %v5808_v57, %v5696_v43 }
 0x340   : > { %v3294_v31 = vsel %vm6297_vm14, %v3278_v47, %v3140_v15 }
 0x341   : > { %v5783_v9 = vpop.permute.xlu2 %3181  ;;  %3120 = vrot.lane.b32.xlu0 %v3105_v58, %s4099_s27  ;;  %v3174_v45 = vunpack.c.l.b16 %v2644_v56 }
 0x343   : > { %v3180_v10 = vpop.permute.xlu0 %3179 }
 0x344   : > { %v5791_v8 = vpop.permute.xlu1 %3160  ;;  %v5817_v30 = vpop.f32.mrf.mxu3 }
 0x345   : > { %3099 = vrot.lane.b32.xlu2 %v5725_v54, %s6227_s14  ;;  %v3310_v54 = vsel %vm2192_vm7, %v3294_v31, %v5673_v26  ;;  %v2816_v56 = vpop.f32.mrf.mxu2  ;;  %v2863_v31 = vmax.f32 %v2847_v38, 0.0 }
 0x346   : > { %3151 = vrot.lane.b32.xlu1 %v3136_v41, %s6226_s13  ;;  %v2615_v58 = vld [vmem:[#allocation3 + $0xe0] sm:$0xff]  ;;  %v2616_v7 = vld [vmem:[#allocation3 + $0xe8] sm:$0x3]  ;;  %v3326_v24 = vsel %vm6301_vm2, %v3310_v54, %v3180_v10  ;;  %v2850_v54 = vadd.f32 %v5808_v57, %v5774_v34  ;;  %v2852_v38 = vadd.f32 %v5808_v57, %v2816_v56 }
 0x347   : > { %v2645_v46 = vpack.c.bf16 %v2615_v58, %v2615_v58  ;;  %v2646_v61 = vpack.c.bf16 %v2616_v7, %v2616_v7 }
 0x349   : > { %v5803_v4 = vpop.permute.xlu2 %3093  ;;  %v3175_v52 = vunpack.c.l.b16 %v2645_v46  ;;  %v3194_v5 = vunpack.c.l.b16 %v2646_v61 }
 0x34b   : > { %v5812_v13 = vpop.permute.xlu0 %3091  ;;  %v3176_v40 = vpack.c.b16 %v3175_v52, %v3174_v45  ;;  %v3195_v20 = vpack.c.b16 %v3194_v5, %v3194_v5  ;;  %v2848_v52 = vadd.f32 %v5808_v57, %v5727_v42  ;;  %v3248_v5 = vsel %vm1535_vm12, %v5501_v14, %v5770_v18 }
 0x34c   : > { %v3211_v15 = vpop.permute.xlu1 %3210 }
 0x34d   : > { %v3342_v59 = vsel %vm2233_vm11, %v3326_v24, %v3211_v15  ;;  %3191 = vrot.lane.b32.xlu0 %v3176_v40, %s4090_s22  ;;  %v3199_v41 = vshll.u32 %v3176_v40, 16  ;;  %v3204_v53 = vshll.u32 %v3195_v20, 16  ;;  %3170 = vrot.lane.b32.xlu2 %v3155_v2, %s4100_s29  ;;  %v3197_v10 = vshrl.u32 %v3176_v40, 16  ;;  %v2819_v24 = vpop.f32.mrf.mxu2 }
 0x34e   : > { %v3358_v26 = vsel %vm1089_vm6, %v3342_v59, %v5741_v39  ;;  %v3224_v46 = vrot.slane %v3176_v40, 1  ;;  %v3225_v61 = vrot.slane %v3195_v20, 1  ;;  %v2849_v40 = vadd.f32 %v5808_v57, %v5745_v19  ;;  %v2834_v20 = vpop.f32.mrf.mxu3 }
 0x34f   : > { %3868 = vmatmul.msk.bf16.gmra.mxu3 %vm2289_vm15, %v3358_v26  ;;  %v3201_v16 = vrot.slane %v3199_v41, 1  ;;  %v3206_v47 = vrot.slane %v3204_v53, 1  ;;  %v3264_v15 = vsel %vm1014_vm3, %v3248_v5, %v5754_v63  ;;  %v2864_v42 = vmax.f32 %v2848_v52, 0.0 }
 0x350   : > { %v3226_v43 = vsel %vm763_vm0, %v3224_v46, %v3225_v61  ;;  %v2866_v41 = vmax.f32 %v2850_v54, 0.0  ;;  %v2865_v26 = vmax.f32 %v2849_v40, 0.0  ;;  %v3280_v14 = vsel %vm2151_vm5, %v3264_v15, %v5720_v49  ;;  %vm6302_vm0 = vmmov %vm6297_vm14 }
 0x351   : > { %v5825_v58 = vpop.permute.xlu2 %3143  ;;  %v3202_v7 = vor.u32 %v3201_v16, %v3197_v10  ;;  %v2851_v19 = vadd.f32 %v5808_v57, %v5793_v23  ;;  %v2853_v63 = vadd.f32 %v5808_v57, %v2819_v24  ;;  %v3250_v52 = vsel %vm1535_vm12, %v5539_v44, %v5767_v3  ;;  %vm6304_vm9 = vmmov %vm6302_vm0 }
 0x352   : > { %v3266_v24 = vsel %vm1014_vm3, %v3250_v52, %v5812_v13  ;;  %v2859_v3 = vadd.f32 %v5808_v57, %v2834_v20  ;;  %vm6306_vm13 = vmmov %vm6302_vm0 }
 0x353   : > { %v3207_v2 = vsel %vm594_vm1, %v3202_v7, %v3206_v47  ;;  %v3142_v45 = vpop.permute.xlu0 %3141  ;;  %v2867_v16 = vmax.f32 %v2851_v19, 0.0  ;;  %v2869_v47 = vmax.f32 %v2853_v63, 0.0  ;;  %vm6303_vm1 = vmmov %vm6301_vm2 }
 0x354   : > { %3222 = vrot.lane.b32.xlu1 %v3207_v2, %s6286_s17  ;;  %v3113_v39 = vpop.permute.xlu1 %3112  ;;  %v3296_v34 = vsel %vm6302_vm0, %v3280_v14, %v3142_v45  ;;  %v2868_v2 = vmax.f32 %v2852_v38, 0.0  ;;  %vm6305_vm10 = vmmov %vm6303_vm1  ;;  %v2875_v19 = vmax.f32 %v2859_v3, 0.0  ;;  %s391_s17 = sand.u32 1, %s4063_s18  }
 0x355   : > { %3505 = vrot.lane.b32.xlu0 %v2863_v31, %s6227_s14  ;;  %3241 = vrot.lane.b32.xlu2 %v3226_v43, %s4096_s15  ;;  %v3312_v10 = vsel %vm2192_vm7, %v3296_v34, %v5791_v8  ;;  %v2821_v46 = vpop.f32.mrf.mxu2  ;;  %v2855_v43 = vadd.f32 %v5808_v57, %v5747_v32  ;;  %v2857_v32 = vadd.f32 %v5808_v57, %v5789_v50  ;;  %vm6307_vm8 = vmmov %vm6303_vm1  ;;  %s3767_s25 = sshll.u32 %s391_s17, 7 }
 0x356   : > { %v2836_v7 = vpop.f32.mrf.mxu3  ;;  %v3328_v61 = vsel %vm6303_vm1, %v3312_v10, %v5783_v9  ;;  %v2854_v8 = vadd.f32 %v5808_v57, %v2821_v46  ;;  %v2856_v9 = vadd.f32 %v5808_v57, %v5772_v33  ;;  %vm6308_vm4 = vmmov %vm6302_vm0  ;;  %s6035_s12 = scalar_lea.vmem [#allocation4], %s3767_s25  ;;  %s3666_s25 = scalar_lea.sflag [#allocation5], %s391_s17 }
 0x357   : > { %vm6309_vm14 = vmmov %vm6303_vm1  ;;  %s3681_s13 = sshll.u32 %s6035_s12, 4  ;;  %s3682_s13 = int_to_ptr.vmem [resolvable:$true] %s3681_s13 }
 0x358   : > { %v2870_v54 = vmax.f32 %v2854_v8, 0.0  ;;  %v2872_v15 = vmax.f32 %v2856_v9, 0.0  ;;  %vm6310_vm2 = vmmov %vm6302_vm0 }
 0x359   : > { %v5843_v59 = vpop.permute.xlu2 %3164  ;;  %vm6311_vm0 = vmmov %vm6303_vm1 }
 0x35a   : > { %vm6312_vm1 = vmmov %vm6310_vm2 }
 0x35b   : > { %v3163_v53 = vpop.permute.xlu0 %3162 }
 0x35c   : > { %3507 = vrot.lane.b32.xlu1 %v2864_v42, %s6227_s14  ;;  %v3232_v18 = vpop.permute.xlu1 %3231  ;;  %v3282_v42 = vsel %vm2151_vm5, %v3266_v24, %v3113_v39  ;;  %v2858_v39 = vadd.f32 %v5808_v57, %v5817_v30 }
 0x35d   : > { %3511 = vrot.lane.b32.xlu0 %v2866_v41, %s6227_s14  ;;  %3509 = vrot.lane.b32.xlu2 %v2865_v26, %s6227_s14  ;;  %v2871_v26 = vmax.f32 %v2855_v43, 0.0  ;;  %v3298_v44 = vsel %vm6304_vm9, %v3282_v42, %v5825_v58  ;;  %vm6318_vm9 = vmmov %vm6312_vm1 }
 0x35e   : > { %v2839_v40 = vpop.f32.mrf.mxu3  ;;  %v3314_v13 = vsel %vm2192_vm7, %v3298_v44, %v3163_v53  ;;  %v2874_v38 = vmax.f32 %v2858_v39, 0.0  ;;  %v2860_v53 = vadd.f32 %v5808_v57, %v2836_v7 }
 0x361   : > { %v3215_v49 = vpop.permute.xlu2 %3214 }
 0x363   : > { %v3213_v31 = vpop.permute.xlu0 %3212 }
 0x364   : > { %3513 = vrot.lane.b32.xlu1 %v2867_v16, %s6227_s14  ;;  %v3344_v23 = vsel %vm2233_vm11, %v3328_v61, %v3213_v31  ;;  %v3054_v45 = vpop.permute.xlu1 %3053  ;;  %v2861_v16 = vadd.f32 %v5808_v57, %v2839_v40 }
 0x365   : > { %3517 = vrot.lane.b32.xlu0 %v2869_v47, %s6227_s14  ;;  %v3360_v56 = vsel %vm1089_vm6, %v3344_v23, %v3232_v18  ;;  %3515 = vrot.lane.b32.xlu2 %v2868_v2, %s6227_s14  ;;  %v2873_v18 = vmax.f32 %v2857_v32, 0.0  ;;  %v3252_v7 = vsel %vm1535_vm12, %v5568_v37, %v3054_v45 }
 0x366   : > { %3869 = vmatmul.msk.bf16.gmra.mxu3 %vm2289_vm15, %v3360_v56  ;;  %v2841_v10 = vpop.f32.mrf.mxu3  ;;  %v2877_v61 = vmax.f32 %v2861_v16, 0.0 }
 0x367   : > { %v2862_v30 = vadd.f32 %v5808_v57, %v2841_v10  ;;  %v3268_v57 = vsel %vm1014_vm3, %v3252_v7, %v5803_v4 }
 0x369   : > { %v3117_v5 = vpop.permute.xlu2 %3116  ;;  %v2878_v47 = vmax.f32 %v2862_v30, 0.0 }
 0x36b   : > { %v3115_v41 = vpop.permute.xlu0 %3114 }
 0x36c   : > { %3519 = vrot.lane.b32.xlu1 %v2870_v54, %s6227_s14  ;;  %v3184_v33 = vpop.permute.xlu1 %3183  ;;  %v3284_v9 = vsel %vm2151_vm5, %v3268_v57, %v3115_v41 }
 0x36d   : > { %3523 = vrot.lane.b32.xlu0 %v2872_v15, %s6227_s14  ;;  %3521 = vrot.lane.b32.xlu2 %v2871_v26, %s6227_s14  ;;  %v3330_v14 = vsel %vm6305_vm10, %v3314_v13, %v3184_v33  ;;  %vm6319_vm10 = vmmov %vm6312_vm1 }
 0x36e   : > { %v3346_v50 = vsel %vm2233_vm11, %v3330_v14, %v3215_v49  ;;  %v2876_v49 = vmax.f32 %v2860_v53, 0.0 }
 0x371   : > { %v3236_v34 = vpop.permute.xlu2 %3235 }
 0x373   : > { %v3234_v63 = vpop.permute.xlu0 %3233 }
 0x374   : > { %3525 = vrot.lane.b32.xlu1 %v2873_v18, %s6227_s14  ;;  %v3096_v58 = vpop.permute.xlu1 %3095  ;;  %v3362_v20 = vsel %vm1089_vm6, %v3346_v50, %v3234_v63 }
 0x375   : > { %3529 = vrot.lane.b32.xlu0 %v2875_v19, %s6227_s14  ;;  %3527 = vrot.lane.b32.xlu2 %v2874_v38, %s6227_s14 }
 0x376   : > { %3870 = vmatmul.msk.bf16.gmra.mxu3 %vm2289_vm15, %v3362_v20 }
 0x379   : > { %v3058_v31 = vpop.permute.xlu2 %3057 }
 0x37b   : > { %v3056_v46 = vpop.permute.xlu0 %3055 }
 0x37c   : > { %3531 = vrot.lane.b32.xlu1 %v2876_v49, %s6227_s14  ;;  %v3146_v2 = vpop.permute.xlu1 %3145  ;;  %v3254_v37 = vsel %vm1535_vm12, %v5605_v27, %v3056_v46  ;;  %v5935_v49 = vld [vmem:[%s6182_s2] ss:$0 sm:$0xff] }
 0x37d   : > { %3535 = vrot.lane.b32.xlu0 %v2878_v47, %s6227_s14  ;;  %3533 = vrot.lane.b32.xlu2 %v2877_v61, %s6227_s14  ;;  %v3300_v43 = vsel %vm6306_vm13, %v3284_v9, %v3146_v2  ;;  %v3270_v42 = vsel %vm1014_vm3, %v3254_v37, %v3096_v58  ;;  %v2741_v47 = vadd.f32 %v5935_v49, %v5466_v35  ;;  %v5942_v61 = vld [vmem:[%s6190_s10] ss:$0 sm:$0xff]  ;;  %vm6320_vm13 = vmmov %vm6312_vm1 }
 0x37e   : > { %v3316_v52 = vsel %vm2192_vm7, %v3300_v43, %v5843_v59  ;;  %v3286_v26 = vsel %vm2151_vm5, %v3270_v42, %v3117_v5  ;;  %v3256_v5 = vsel %vm1535_vm12, %v5654_v6, %v3058_v31 }
 0x37f   : > { %v2757_v31 = vmax.f32 %v2741_v47, 0.0 }
 0x381   : > { %v3188_v8 = vpop.permute.xlu2 %3187 }
 0x383   : > { %v3186_v23 = vpop.permute.xlu0 %3185 }
 0x384   : > { %v3167_v56 = vpop.permute.xlu1 %3166  ;;  %v3332_v40 = vsel %vm6307_vm8, %v3316_v52, %v3186_v23  ;;  %vm6321_vm8 = vmmov %vm6312_vm1 }
 0x389   : > { %v3150_v4 = vpop.permute.xlu2 %3149 }
 0x38b   : > { %v3098_v54 = vpop.permute.xlu0 %3097 }
 0x38c   : > { %v3217_v24 = vpop.permute.xlu1 %3216  ;;  %v3272_v19 = vsel %vm1014_vm3, %v3256_v5, %v3098_v54 }
 0x38d   : > { %v3348_v15 = vsel %vm2233_vm11, %v3332_v40, %v3217_v24 }
 0x38e   : > { %v3364_v45 = vsel %vm1089_vm6, %v3348_v15, %v3236_v34 }
 0x38f   : > { %3871 = vmatmul.msk.bf16.gmra.mxu3 %vm2289_vm15, %v3364_v45 }
 0x393   : > { %v3148_v41 = vpop.permute.xlu0 %3147 }
 0x394   : > { %v3119_v59 = vpop.permute.xlu1 %3118  ;;  %v3302_v33 = vsel %vm6308_vm4, %v3286_v26, %v3148_v41  ;;  %vm6322_vm4 = vmmov %vm6312_vm1 }
 0x395   : > { %v3318_v32 = vsel %vm2192_vm7, %v3302_v33, %v3167_v56  ;;  %v3288_v63 = vsel %vm2151_vm5, %v3272_v19, %v3119_v59  ;;  %v2745_v19 = vadd.f32 %v5935_v49, %v5531_v28 }
 0x396   : > { %v3334_v3 = vsel %vm6309_vm14, %v3318_v32, %v3188_v8  ;;  %v3304_v50 = vsel %vm6310_vm2, %v3288_v63, %v3150_v4  ;;  %v2744_v8 = vadd.f32 %v5935_v49, %v5516_v48  ;;  %vm6323_vm14 = vmmov %vm6312_vm1 }
 0x397   : > { %v3221_v44 = vpop.permute.xlu2 %3220  ;;  %vm6324_vm2 = vmmov %vm6312_vm1 }
 0x398   : > { %v2760_v52 = vmax.f32 %v2744_v8, 0.0 }
 0x39b   : > { %v3219_v13 = vpop.permute.xlu0 %3218 }
 0x39c   : > { %v3350_v27 = vsel %vm2233_vm11, %v3334_v3, %v3219_v13  ;;  %v3238_v39 = vpop.permute.xlu1 %3237 }
 0x39d   : > { %v3366_v14 = vsel %vm1089_vm6, %v3350_v27, %v3238_v39 }
 0x39f   : > { %3872 = vmatmul.msk.bf16.gmra.mxu3 %vm2289_vm15, %v3366_v14  ;;  %v3100_v18 = vpop.permute.xlu2 %3099 }
 0x3a3   : > { %v3169_v34 = vpop.permute.xlu0 %3168 }
 0x3a4   : > { %v3320_v58 = vsel %vm2192_vm7, %v3304_v50, %v3169_v34 }
 0x3a7   : > { %v3171_v38 = vpop.permute.xlu2 %3170 }
 0x3a8   : > { %v3190_v10 = vpop.permute.xlu1 %3189 }
 0x3a9   : > { %v3336_v20 = vsel %vm6311_vm0, %v3320_v58, %v3190_v10  ;;  %v2761_v10 = vmax.f32 %v2745_v19, 0.0 }
 0x3aa   : > { %v3352_v30 = vsel %vm2233_vm11, %v3336_v20, %v3221_v44 }
 0x3ab   : > { %v3240_v53 = vpop.permute.xlu0 %3239 }
 0x3ac   : > { %v3368_v16 = vsel %vm1089_vm6, %v3352_v30, %v3240_v53  ;;  %v2746_v53 = vadd.f32 %v5935_v49, %v5544_v17  ;;  %v2748_v30 = vadd.f32 %v5935_v49, %v5571_v11  ;;  %v2749_v17 = vadd.f32 %v5935_v49, %v5585_v62 }
 0x3ad   : > { %v2751_v11 = vadd.f32 %v5935_v49, %v5620_v36 }
 0x3af   : > { %3873 = vmatmul.msk.bf16.gmra.mxu3 %vm2289_vm15, %v3368_v16  ;;  %v3242_v6 = vpop.permute.xlu2 %3241  ;;  %v2767_v8 = vmax.f32 %v2751_v11, 0.0 }
 0x3b0   : > { %v3060_v46 = vpop.permute.xlu1 %3059 }
 0x3b1   : > { %v3258_v35 = vsel %vm1535_vm12, %v5690_v21, %v3060_v46  ;;  %v2747_v21 = vadd.f32 %v5935_v49, %v5556_v55  ;;  %vm6313_vm12 = vmmov %vm6311_vm0  ;;  %v2750_v55 = vadd.f32 %v5935_v49, %v5598_v1  ;;  %v2764_v46 = vmax.f32 %v2748_v30, 0.0 }
 0x3b2   : > { %v3274_v40 = vsel %vm1014_vm3, %v3258_v35, %v3100_v18  ;;  %vm6325_vm0 = vmmov %vm6312_vm1 }
 0x3b3   : > { %v3121_v2 = vpop.permute.xlu0 %3120  ;;  %v2763_v33 = vmax.f32 %v2747_v21, 0.0  ;;  %v2766_v14 = vmax.f32 %v2750_v55, 0.0 }
 0x3b4   : > { %v3290_v15 = vsel %vm2151_vm5, %v3274_v40, %v3121_v2 }
 0x3b7   : > { %v3510_v7 = vpop.permute.xlu2 %3509 }
 0x3b8   : > { %v5945_v23 = vsel %vm1014_vm3, %v2757_v31, %v3510_v7  ;;  %v3414_v56 = vpop.f32.mrf.mxu3  ;;  %v3152_v43 = vpop.permute.xlu1 %3151 }
 0x3b9   : > { %v3457_v57 = vadd.f32 %v5942_v61, %v3414_v56  ;;  %v3306_v48 = vsel %vm6312_vm1, %v3290_v15, %v3152_v43 }
 0x3ba   : > { %v3322_v41 = vsel %vm2192_vm7, %v3306_v48, %v3171_v38  ;;  %vm6315_vm7 = vmmov %vm6312_vm1 }
 0x3bb   : > { %v3473_v9 = vmax.f32 %v3457_v57, 0.0  ;;  %v2765_v57 = vmax.f32 %v2749_v17, 0.0 }
 0x3bd   : > { %3569 = vrot.lane.b32.xlu1 %v3473_v9, %s4099_s27 }
 0x3bf   : > { %v3192_v54 = vpop.permute.xlu0 %3191  ;;  %v3516_v24 = vpop.permute.xlu2 %3515 }
 0x3c0   : > { %v5956_v37 = vsel %vm1014_vm3, %v2760_v52, %v3516_v24  ;;  %v3416_v45 = vpop.f32.mrf.mxu3  ;;  %v3338_v26 = vsel %vm6313_vm12, %v3322_v41, %v3192_v54  ;;  %vm6327_vm12 = vmmov %vm6325_vm0 }
 0x3c1   : > { %v3458_v4 = vadd.f32 %v5942_v61, %v3416_v45 }
 0x3c3   : > { %v3474_v42 = vmax.f32 %v3458_v4, 0.0 }
 0x3c5   : > { %3571 = vrot.lane.b32.xlu2 %v3474_v42, %s4099_s27 }
 0x3c6   : > { %v3223_v59 = vpop.permute.xlu1 %3222 }
 0x3c7   : > { %v3354_v32 = vsel %vm2233_vm11, %v3338_v26, %v3223_v59  ;;  %v5966_v44 = vpop.permute.xlu0 %3505  ;;  %v3522_v3 = vpop.permute.xlu2 %3521  ;;  %vm6316_vm11 = vmmov %vm6312_vm1 }
 0x3c8   : > { %v3370_v13 = vsel %vm1089_vm6, %v3354_v32, %v3242_v6  ;;  %v5970_v27 = vsel %vm1014_vm3, %v2763_v33, %v3522_v3  ;;  %v2762_v6 = vmax.f32 %v2746_v53, 0.0  ;;  %v2740_v3 = vadd.f32 %v5935_v49, %v5448_v12  ;;  %vm6314_vm6 = vmmov %vm6312_vm1 }
 0x3c9   : > { %3874 = vmatmul.msk.bf16.gmra.mxu3 %vm2289_vm15, %v3370_v13  ;;  %vm6317_vm15 = vmmov %vm6312_vm1 }
 0x3ca   : > { %vm6326_vm1 = vmmov %vm6325_vm0 }
 0x3ce   : > { %v5975_v39 = vpop.permute.xlu1 %3507 }
 0x3cf   : > { %v5977_v18 = vpop.permute.xlu0 %3511  ;;  %v3528_v5 = vpop.permute.xlu2 %3527 }
 0x3d0   : > { %v5980_v34 = vsel %vm1014_vm3, %v2766_v14, %v3528_v5  ;;  %v2756_v5 = vmax.f32 %v2740_v3, 0.0 }
 0x3d2   : > { %v3419_v63 = vpop.f32.mrf.mxu3  ;;  %v3618_v19 = vsel %vm1014_vm3, %v2756_v5, %v5975_v39  ;;  %v2739_v39 = vadd.f32 %v5935_v49, %v5427_v22 }
 0x3d3   : > { %v3459_v50 = vadd.f32 %v5942_v61, %v3419_v63 }
 0x3d5   : > { %v3475_v38 = vmax.f32 %v3459_v50, 0.0 }
 0x3d6   : > { %v5985_v58 = vpop.permute.xlu1 %3513 }
 0x3d7   : > { %v3518_v1 = vpop.permute.xlu0 %3517  ;;  %3573 = vrot.lane.b32.xlu0 %v3475_v38, %s4099_s27  ;;  %v6023_v32 = vpop.permute.xlu2 %3533 }
 0x3d8   : > { %v5989_v20 = vsel %vm1014_vm3, %v2761_v10, %v3518_v1 }
 0x3da   : > { %v3421_v28 = vpop.f32.mrf.mxu3 }
 0x3db   : > { %v3460_v16 = vadd.f32 %v5942_v61, %v3421_v28 }
 0x3dd   : > { %v3476_v47 = vmax.f32 %v3460_v16, 0.0  ;;  %v2755_v16 = vmax.f32 %v2739_v39, 0.0 }
 0x3de   : > { %v3520_v31 = vpop.permute.xlu1 %3519 }
 0x3df   : > { %v5997_v2 = vsel %vm1014_vm3, %v2762_v6, %v3520_v31  ;;  %v3524_v7 = vpop.permute.xlu0 %3523  ;;  %3575 = vrot.lane.b32.xlu1 %v3476_v47, %s4099_s27  ;;  %v3617_v6 = vsel %vm1014_vm3, %v2755_v16, %v5966_v44 }
 0x3e0   : > { %v6001_v56 = vsel %vm1014_vm3, %v2764_v46, %v3524_v7 }
 0x3e6   : > { %v3526_v9 = vpop.permute.xlu1 %3525 }
 0x3e7   : > { %v6008_v35 = vsel %vm1014_vm3, %v2765_v57, %v3526_v9  ;;  %v3530_v43 = vpop.permute.xlu0 %3529 }
 0x3e8   : > { %v6011_v52 = vsel %vm1014_vm3, %v2767_v8, %v3530_v43  ;;  %v2743_v8 = vadd.f32 %v5935_v49, %v5495_v51 }
 0x3e9   : > { %v3424_v54 = vpop.f32.mrf.mxu3 }
 0x3ea   : > { %v3461_v40 = vadd.f32 %v5942_v61, %v3424_v54  ;;  %v2759_v9 = vmax.f32 %v2743_v8, 0.0 }
 0x3ec   : > { %v3477_v24 = vmax.f32 %v3461_v40, 0.0  ;;  %v3621_v43 = vsel %vm1014_vm3, %v2759_v9, %v5985_v58 }
 0x3ee   : > { %3577 = vrot.lane.b32.xlu2 %v3477_v24, %s4099_s27  ;;  %v6041_v1 = vpop.permute.xlu1 %3531 }
 0x3ef   : > { %v6056_v44 = vpop.permute.xlu0 %3535 }
 0x3f1   : > { %v3426_v62 = vpop.f32.mrf.mxu3 }
 0x3f2   : > { %v3462_v15 = vadd.f32 %v5942_v61, %v3426_v62 }
 0x3f4   : > { %v3478_v36 = vmax.f32 %v3462_v15, 0.0  ;;  %v2742_v15 = vadd.f32 %v5935_v49, %v5487_v25 }
 0x3f6   : > { %3579 = vrot.lane.b32.xlu0 %v3478_v36, %s4099_s27  ;;  %v2758_v58 = vmax.f32 %v2742_v15, 0.0 }
 0x3f9   : > { %v3429_v45 = vpop.f32.mrf.mxu3 }
 0x3fa   : > { %v3463_v48 = vadd.f32 %v5942_v61, %v3429_v45 }
 0x3fc   : > { %v3479_v4 = vmax.f32 %v3463_v48, 0.0  ;;  %v3620_v48 = vsel %vm1014_vm3, %v2758_v58, %v5977_v18 }
 0x3fe   : > { %3581 = vrot.lane.b32.xlu1 %v3479_v4, %s4099_s27 }
 0x401   : > { %v3431_v21 = vpop.f32.mrf.mxu3 }
 0x402   : > { %v3464_v42 = vadd.f32 %v5942_v61, %v3431_v21 }
 0x404   : > { %v3480_v41 = vmax.f32 %v3464_v42, 0.0 }
 0x406   : > { %3583 = vrot.lane.b32.xlu2 %v3480_v41, %s4099_s27 }
 0x412   : > { %v3434_v26 = vpop.f32.mrf.mxu3 }
 0x413   : > { %v3465_v59 = vadd.f32 %v5942_v61, %v3434_v26 }
 0x415   : > { %v3481_v33 = vmax.f32 %v3465_v59, 0.0 }
 0x417   : > { %3585 = vrot.lane.b32.xlu0 %v3481_v33, %s4099_s27 }
 0x41a   : > { %v3436_v13 = vpop.f32.mrf.mxu3 }
 0x41b   : > { %v3466_v55 = vadd.f32 %v5942_v61, %v3436_v13 }
 0x41d   : > { %v3482_v14 = vmax.f32 %v3466_v55, 0.0 }
 0x41f   : > { %3587 = vrot.lane.b32.xlu1 %v3482_v14, %s4099_s27  ;;  %v3572_v63 = vpop.permute.xlu2 %3571  ;;  %v2752_v14 = vadd.f32 %v5935_v49, %v5641_v60 }
 0x420   : > { %v3634_v50 = vsel %vm2151_vm5, %v3618_v19, %v3572_v63 }
 0x421   : > { %3650 = vst.msk [vmem:[%s6035_s12 + $0x8] sm:$0xff] %vm6314_vm6, %v3634_v50  ;;  %vm6328_vm6 = vmmov %vm6325_vm0 }
 0x422   : > { %v3439_v12 = vpop.f32.mrf.mxu3 }
 0x423   : > { %v3467_v38 = vadd.f32 %v5942_v61, %v3439_v12  ;;  %v2753_v12 = vadd.f32 %v5935_v49, %v5656_v29 }
 0x425   : > { %v3483_v10 = vmax.f32 %v3467_v38, 0.0  ;;  %v2769_v38 = vmax.f32 %v2753_v12, 0.0 }
 0x427   : > { %3589 = vrot.lane.b32.xlu2 %v3483_v10, %s4099_s27 }
 0x42a   : > { %v3441_v53 = vpop.f32.mrf.mxu3 }
 0x42b   : > { %v3468_v30 = vadd.f32 %v5942_v61, %v3441_v53 }
 0x42d   : > { %v3484_v28 = vmax.f32 %v3468_v30, 0.0 }
 0x42f   : > { %3591 = vrot.lane.b32.xlu0 %v3484_v28, %s4099_s27  ;;  %v3570_v47 = vpop.permute.xlu1 %3569 }
 0x430   : > { %v3633_v46 = vsel %vm2151_vm5, %v3617_v6, %v3570_v47 }
 0x431   : > { %3649 = vst.msk [vmem:[%s6035_s12] sm:$0xff] %vm6315_vm7, %v3633_v46  ;;  %vm6329_vm7 = vmmov %vm6325_vm0 }
 0x432   : > { %v3444_v31 = vpop.f32.mrf.mxu3 }
 0x433   : > { %v3469_v7 = vadd.f32 %v5942_v61, %v3444_v31 }
 0x435   : > { %v3485_v22 = vmax.f32 %v3469_v7, 0.0 }
 0x437   : > { %3593 = vrot.lane.b32.xlu1 %v3485_v22, %s4099_s27 }
 0x43a   : > { %v3446_v17 = vpop.f32.mrf.mxu3 }
 0x43b   : > { %v3470_v11 = vadd.f32 %v5942_v61, %v3446_v17 }
 0x43d   : > { %v3486_v57 = vmax.f32 %v3470_v11, 0.0 }
 0x43f   : > { %3595 = vrot.lane.b32.xlu2 %v3486_v57, %s4099_s27 }
 0x448   : > { %v3578_v54 = vpop.permute.xlu2 %3577 }
 0x449   : > { %v3637_v40 = vsel %vm2151_vm5, %v3621_v43, %v3578_v54  ;;  %v3574_v24 = vpop.permute.xlu0 %3573 }
 0x44a   : > { %3653 = vst.msk [vmem:[%s6035_s12 + $0x20] sm:$0xff] %vm6316_vm11, %v3637_v40  ;;  %v3635_v62 = vsel %vm2151_vm5, %v5945_v23, %v3574_v24 }
 0x44b   : > { %3651 = vst.msk [vmem:[%s6035_s12 + $0x10] sm:$0xff] %vm6317_vm15, %v3635_v62 }
 0x44c   : > { %v3449_v51 = vpop.f32.mrf.mxu3 }
 0x44d   : > { %v3471_v36 = vadd.f32 %v5942_v61, %v3449_v51 }
 0x44f   : > { %v3487_v45 = vmax.f32 %v3471_v36, 0.0 }
 0x451   : > { %3597 = vrot.lane.b32.xlu0 %v3487_v45, %s4099_s27  ;;  %v3576_v4 = vpop.permute.xlu1 %3575 }
 0x452   : > { %v3636_v23 = vsel %vm2151_vm5, %v3620_v48, %v3576_v4 }
 0x453   : > { %3652 = vst.msk [vmem:[%s6035_s12 + $0x18] sm:$0xff] %vm6318_vm9, %v3636_v23 }
 0x454   : > { %v3451_v25 = vpop.f32.mrf.mxu3 }
 0x455   : > { %v3472_v21 = vadd.f32 %v5942_v61, %v3451_v25 }
 0x457   : > { %v3488_v42 = vmax.f32 %v3472_v21, 0.0 }
 0x459   : > { %3599 = vrot.lane.b32.xlu1 %v3488_v42, %s4099_s27  ;;  %s3896_s27 = sshll.u32 %s4071_s20, 4  ;;  %s4013_s20 = scalar_lea.hbm %s6191_s11, 512 }
 0x45a   : > { %s3678_s26 = sadd.s32 %s3896_s27, %s3878_s24 }
 0x45b   : > { %s3879_s22 = sshll.u32 %s3678_s26, 3 }
 0x45c   : > { %s3680_s15 = scalar_lea.hbm %s6191_s11, %s3879_s22 }
 0x45d   : > { %s3683_s29 = sshll.u32 %s3680_s15, 4  ;;  %s3684_s29 = int_to_ptr.hbm [resolvable:$true] %s3683_s29 }
 0x45e   : > { %s4007_s27 = sshra.s32 %s3684_s29, 4  ;;  %s4008_s27 = int_to_ptr.hbm [resolvable:$true] %s4007_s27 }
 0x45f   : > { %s4009_s24 = scalar_lea.hbm %s4008_s27, 128  ;;  %p4014_p2 = scmp.lt.s32.totalorder %s4008_s27, %s6191_s11 }
 0x460   : > { %v3584_v41 = vpop.permute.xlu2 %3583  ;;  %p4010_p13 = scmp.ne.s32.totalorder %s4008_s27, %s4009_s24  ;;  %p4015_p4 = scmp.lt.s32.totalorder %s4013_s20, %s4009_s24 }
 0x461   : > { %v3640_v18 = vsel %vm2151_vm5, %v5997_v2, %v3584_v41 }
 0x462   : > { %3656 = vst.msk [vmem:[%s6035_s12 + $0x38] sm:$0xff] %vm6319_vm10, %v3640_v18  ;;  %p4011_p0 = pnand %p4010_p13, %p4214_p3  ;;  %p4016_p5 = por %p4015_p4, %p4014_p2 }
 0x464   : > { %p4012_p1 = pneg %p4011_p0 }
 0x466   : > { %p4017_p6 = pnand %p4016_p5, %p4012_p1 }
 0x468   : > { %v3580_v26 = vpop.permute.xlu0 %3579 }
 0x469   : > { %v3638_v59 = vsel %vm2151_vm5, %v5956_v37, %v3580_v26 }
 0x46a   : > { %3654 = vst.msk [vmem:[%s6035_s12 + $0x28] sm:$0xff] %vm6320_vm13, %v3638_v59 }
 0x470   : > { %v3582_v33 = vpop.permute.xlu1 %3581 }
 0x471   : > { %v3639_v61 = vsel %vm2151_vm5, %v5989_v20, %v3582_v33 }
 0x472   : > { %3655 = vst.msk [vmem:[%s6035_s12 + $0x30] sm:$0xff] %vm6321_vm8, %v3639_v61 }
 0x481   : > { %v3590_v3 = vpop.permute.xlu2 %3589 }
 0x482   : > { %v3643_v2 = vsel %vm2151_vm5, %v6008_v35, %v3590_v3  ;;  %v2768_v35 = vmax.f32 %v2752_v14, 0.0 }
 0x483   : > { %3659 = vst.msk [vmem:[%s6035_s12 + $0x50] sm:$0xff] %vm6322_vm4, %v3643_v2 }
 0x484   : > { %v3630_v5 = vsel %vm1014_vm3, %v2768_v35, %v6041_v1 }
 0x489   : > { %v3586_v13 = vpop.permute.xlu0 %3585 }
 0x48a   : > { %v3641_v37 = vsel %vm2151_vm5, %v5970_v27, %v3586_v13 }
 0x48b   : > { %3657 = vst.msk [vmem:[%s6035_s12 + $0x40] sm:$0xff] %vm6323_vm14, %v3641_v37 }
 0x491   : > { %v3588_v55 = vpop.permute.xlu1 %3587 }
 0x492   : > { %v3642_v20 = vsel %vm2151_vm5, %v6001_v56, %v3588_v55 }
 0x493   : > { %3658 = vst.msk [vmem:[%s6035_s12 + $0x48] sm:$0xff] %vm6324_vm2, %v3642_v20 }
 0x499   : > { %v3596_v19 = vpop.permute.xlu2 %3595 }
 0x49a   : > { %v3646_v27 = vsel %vm2151_vm5, %v3630_v5, %v3596_v19 }
 0x49b   : > { %3662 = vst.msk [vmem:[%s6035_s12 + $0x68] sm:$0xff] %vm6325_vm0, %v3646_v27 }
 0x4a1   : > { %v3592_v63 = vpop.permute.xlu0 %3591 }
 0x4a2   : > { %v3644_v50 = vsel %vm2151_vm5, %v5980_v34, %v3592_v63  ;;  %v3631_v34 = vsel %vm1014_vm3, %v2769_v38, %v6023_v32 }
 0x4a3   : > { %3660 = vst.msk [vmem:[%s6035_s12 + $0x58] sm:$0xff] %vm6326_vm1, %v3644_v50 }
 0x4a9   : > { %v3594_v60 = vpop.permute.xlu1 %3593 }
 0x4aa   : > { %v3645_v56 = vsel %vm2151_vm5, %v6011_v52, %v3594_v60  ;;  %v2754_v52 = vadd.f32 %v5935_v49, %v5679_v0 }
 0x4ab   : > { %3661 = vst.msk [vmem:[%s6035_s12 + $0x60] sm:$0xff] %vm6327_vm12, %v3645_v56 }
 0x4ac   : > { %v2770_v29 = vmax.f32 %v2754_v52, 0.0 }
 0x4ae   : > { %v3632_v32 = vsel %vm1014_vm3, %v2770_v29, %v6056_v44 }
 0x4c3   : > { %v3598_v10 = vpop.permute.xlu0 %3597 }
 0x4c4   : > { %v3647_v1 = vsel %vm2151_vm5, %v3631_v34, %v3598_v10 }
 0x4c5   : > { %3663 = vst.msk [vmem:[%s6035_s12 + $0x70] sm:$0xff] %vm6328_vm6, %v3647_v1 }
 0x4cb   : > { %v3600_v39 = vpop.permute.xlu1 %3599 }
 0x4cc   : > { %v3648_v53 = vsel %vm2151_vm5, %v3632_v32, %v3600_v39 }
 0x4cd   : > { %3664 = vst.msk [vmem:[%s6035_s12 + $0x78] sm:$0xff] %vm6329_vm7, %v3648_v53 }
 0x4ce   : > { %4020 = shalt.err (!%p4017_p6)
}
 0x4cf   : > { %s4102_s17 = smov 128  }
 0x4d0   : > { %3901 = dma.vmem_to_hbm [thread:$0]  (%p4214_p3), %s3682_s13, 2048, %s3684_s29, %s3666_s25, %s4102_s17, %s4102_s17, %s6227_s14  }
 0x4d1 PF: > { %s6330_s12 = sld [smem:[#allocation9_spill]] }
 0x4d2   : > { %s6331_s0 = sld [smem:[#allocation7_spill]] }
 0x4d7   : > { %p3907_p7 = scmp.ge.s32.totalorder %s6330_s12, 2 }
 0x4d8   : > { %s3698_s26 = sand.u32 1, %s6331_s0  }
 0x4d9   : > { %p3904_p9 = pnand %p3907_p7, %p4223_p8  ;;  %s3699_s22 = scalar_lea.sflag [#allocation5], %s3698_s26 }
 0x4db   : > { %p3905_p10 = pneg %p3904_p9 }
 0x4dd   : > { %4054 = dma.done.wait (%p3905_p10), %s3699_s22, 2048  }
 0x4de   : > { %4056 = vsyncadd (%p3905_p10), %s3699_s22, 4294965248  ;;  %s24_s24 = sadd.s32 1, %s6330_s12   ;;  %s6333_s20 = sld [smem:[#allocation8_spill]] }
 0x4df   : > { %p21_p11 = scmp.ge.s32.totalorder %s24_s24, 6   ;;  %s6334_s22 = sld [smem:[#allocation10_spill]] }
 0x4e0   : > { %s6335_s17 = smov %s4063_s18  ;;  %s6336_s18 = smov %s4067_s19 }
 0x4e1   : > { %s6337_s19 = smov %s4232_s16  ;;  %s6338_s21 = smov %s4083_s23 }
 0x4e2   : > { %s6339_s23 = smov %s6345_s28  ;;  %23 = sbr.rel (!%p21_p11) target bundleno = 8 (0x8), region = 100 }
 0x4e7   :  { %3705 = vsyncpa [#allocation5], 1 }
 0x4e8   :  { %3707 = vsyncpa [#allocation5 + $0x1], 1 }

</bundles_post_ra>
